<compile_context>
chip_gen: v7x
topology: tpu7x:2x2x1
jax: 0.10.0
libtpu: 0.0.40
codegen_flags: <defaults>
</compile_context>

<pallas_src>
import math
import functools

import jax
import jax.numpy as jnp
from jax.experimental import pallas as pl
from jax.experimental.pallas import tpu as pltpu

# ----------------- config (small synthetic sizes) -----------------
B = 2              # batch
S = 8              # sequence length (== max positions)
D = 32             # embed_dim (logical)
H = 4              # attention heads
DH = D // H        # head dim
F = 4 * D          # feed-forward hidden (= 128, already lane-dense)
V = 64             # vocab size (logical)
NSEG = 3           # segment vocabulary size
L = 2              # transformer layers
EPS = 1e-12

DP = 128           # padded feature dim (lane-dense)
VP = 128           # padded vocab dim for MLM logits store
NSPP = 128         # padded NSP logit width

_F32 = jnp.float32
_BF16 = jnp.bfloat16


# ----------------- math helpers (valid inside and outside kernels) -----------------
def _gelu(x):
    # BERT tanh approximation of GELU
    return 0.5 * x * (1.0 + jnp.tanh(0.7978845608028654 * (x + 0.044715 * x * x * x)))


def _ln_padded(x, g, b, n_real):
    """LayerNorm over the last axis where only the first n_real lanes are real data
    (padded lanes are exactly zero, and gamma/beta are zero-padded so they stay zero)."""
    s1 = jnp.sum(x, axis=-1, keepdims=True)
    s2 = jnp.sum(x * x, axis=-1, keepdims=True)
    mu = s1 / n_real
    var = jnp.maximum(s2 / n_real - mu * mu, 0.0)
    return (x - mu) * jax.lax.rsqrt(var + EPS) * g + b


def _ln_ref(x, g, b):
    mu = jnp.mean(x, axis=-1, keepdims=True)
    var = jnp.mean((x - mu) ** 2, axis=-1, keepdims=True)
    return (x - mu) * jax.lax.rsqrt(var + EPS) * g + b


# ----------------- fused forward kernel -----------------
def bert_fused_kernel(x_ref, bias_ref,
                      eg_ref, eb_ref,
                      wq_ref, bq_ref, wk_ref, bk_ref, wv_ref, bv_ref,
                      wo_ref, bo_ref, g1_ref, b1_ref,
                      w1_ref, bf1_ref, w2_ref, bf2_ref, g2_ref, b2_ref,
                      wm_ref, bm_ref, gm_ref, gb_ref, wdec_ref, wnsp_ref, bnsp_ref,
                      mlm_ref, nsp_ref):
    BB = x_ref.shape[0]                  # batch elements handled by this grid step
    M = BB * S
    scale = 1.0 / math.sqrt(DH)

    # Whole block as one lane-dense (M, 128) slab; padded lanes are exactly zero.
    x = x_ref[...].reshape(M, DP)                                   # f32

    # ---- embedding LayerNorm ----
    x = _ln_padded(x, eg_ref[...], eb_ref[...], D)

    # ---- transformer blocks (static unroll over L, weights resident in VMEM) ----
    for l in range(L):
        xb = x.astype(_BF16)
        # Lane-packed projections: single (M,128)@(128,128) bf16 matmuls, heads
        # packed along output lanes [h*DH + d]; one full-lane bias add each.
        q = jnp.dot(xb, wq_ref[l], preferred_element_type=_F32) + bq_ref[l]   # (M, DP)
        k = jnp.dot(xb, wk_ref[l], preferred_element_type=_F32) + bk_ref[l]
        v = jnp.dot(xb, wv_ref[l], preferred_element_type=_F32) + bv_ref[l]

        # Attention core per (batch element, head) on tiny (S,DH) slices (f32).
        ctx_rows = []
        for b in range(BB):
            bias_b = bias_ref[b]                                    # (1, S) additive mask bias
            r0 = b * S
            ctx_heads = []
            for h in range(H):
                c0 = h * DH
                qh = q[r0:r0 + S, c0:c0 + DH]                       # (S, DH)
                kh = k[r0:r0 + S, c0:c0 + DH]
                vh = v[r0:r0 + S, c0:c0 + DH]
                s = jnp.dot(qh, kh.T, preferred_element_type=_F32) * scale + bias_b
                s = s - jnp.max(s, axis=-1, keepdims=True)
                p = jnp.exp(s)
                p = p * pl.reciprocal(jnp.sum(p, axis=-1, keepdims=True), approx=True)
                ctx_heads.append(jnp.dot(p, vh, preferred_element_type=_F32))   # (S, DH)
            ctx_rows.append(jnp.concatenate(ctx_heads, axis=-1))    # (S, D) lane-packed
        ctx = jnp.concatenate(ctx_rows, axis=0)                     # (M, D)

        # Single output projection matmul instead of per-head einsum + reduce.
        attn = jnp.dot(ctx.astype(_BF16), wo_ref[l],
                       preferred_element_type=_F32) + bo_ref[l]     # (M, DP)
        h1 = _ln_padded(x + attn, g1_ref[l], b1_ref[l], D)

        ff1 = _gelu(jnp.dot(h1.astype(_BF16), w1_ref[l],
                            preferred_element_type=_F32) + bf1_ref[l])         # (M, F)
        ff = jnp.dot(ff1.astype(_BF16), w2_ref[l],
                     preferred_element_type=_F32) + bf2_ref[l]                  # (M, DP)
        x = _ln_padded(h1 + ff, g2_ref[l], b2_ref[l], D)

    # ---- pretraining head ----
    hm = _gelu(jnp.dot(x.astype(_BF16), wm_ref[...],
                       preferred_element_type=_F32) + bm_ref[...])
    hm = _ln_padded(hm, gm_ref[...], gb_ref[...], D)
    mlm = jnp.dot(hm.astype(_BF16), wdec_ref[...], preferred_element_type=_F32)  # (M, VP)
    mlm_ref[...] = mlm.reshape(BB, S, VP)

    # NSP on the full slab (no M=1 MXU push); keep only the [CLS] row of each element.
    nsp = jnp.dot(x.astype(_BF16), wnsp_ref[...],
                  preferred_element_type=_F32) + bnsp_ref[...]                   # (M, NSPP)
    for b in range(BB):
        nsp_ref[b] = nsp[b * S:b * S + 1, :]


# ----------------- grid selection (per-chip) -----------------
def _pick_grid():
    """(num_grid_steps, block_batch). v7x has 2 TensorCores -> one batch element per
    parallel grid step; 1-TC chips (v5e/v6e) -> single step over the whole batch."""
    kind = ""
    try:
        kind = jax.devices()[0].device_kind.lower()
    except Exception:
        pass
    if B > 1 and ("v7" in kind or "7x" in kind):
        return B, 1
    return 1, B


def bert_pallas_forward(kp, x_emb_pad, bias3):
    """One fused pallas_call for the whole forward."""
    num_steps, bb = _pick_grid()

    def full(a):
        return pl.BlockSpec(a.shape, lambda i, _n=a.ndim: (0,) * _n)

    weights = (kp["eg"], kp["eb"],
               kp["wq"], kp["bq"], kp["wk"], kp["bk"], kp["wv"], kp["bv"],
               kp["wo"], kp["bo"], kp["ln1_g"], kp["ln1_b"],
               kp["w1"], kp["bf1"], kp["w2"], kp["bf2"], kp["ln2_g"], kp["ln2_b"],
               kp["wm"], kp["bm"], kp["gm"], kp["gb"], kp["wdec"], kp["wnsp"], kp["bnsp"])

    act_spec = pl.BlockSpec((bb, S, DP), lambda i: (i, 0, 0))
    bias_spec = pl.BlockSpec((bb, 1, S), lambda i: (i, 0, 0))
    in_specs = [act_spec, bias_spec] + [full(w) for w in weights]

    out_shapes = (jax.ShapeDtypeStruct((B, S, VP), _F32),
                  jax.ShapeDtypeStruct((B, 1, NSPP), _F32))
    out_specs = (pl.BlockSpec((bb, S, VP), lambda i: (i, 0, 0)),
                 pl.BlockSpec((bb, 1, NSPP), lambda i: (i, 0, 0)))

    return pl.pallas_call(
        bert_fused_kernel,
        out_shape=out_shapes,
        grid=(num_steps,),
        in_specs=in_specs,
        out_specs=out_specs,
        compiler_params=pltpu.CompilerParams(
            dimension_semantics=("parallel",),
            vmem_limit_bytes=32 * 1024 * 1024),   # generous headroom vs ~1 MiB footprint
    )(x_emb_pad, bias3, *weights)


# ----------------- parameter init (logical / unpadded, same as reference) -----------------
def init_params(key):
    keys = jax.random.split(key, 64)
    it = iter(keys)

    def nrm(shape, scale=0.02):
        return (scale * jax.random.normal(next(it), shape)).astype(_F32)

    ones = lambda shape: jnp.ones(shape, _F32)
    zeros = lambda shape: jnp.zeros(shape, _F32)

    params = {
        "tok_emb": nrm((V, D)),
        "seg_emb": nrm((NSEG, D)),
        "pos_emb": nrm((S, D)),
        "emb_ln_g": ones((1, D)),
        "emb_ln_b": zeros((1, D)),
        "layers": [],
        "head": {
            "w_mlm": nrm((D, D)), "b_mlm": zeros((1, D)),
            "mlm_ln_g": ones((1, D)), "mlm_ln_b": zeros((1, D)),
            "w_dec": nrm((D, V)),
            "w_nsp": nrm((D, 2)), "b_nsp": zeros((1, 2)),
        },
    }
    for _ in range(L):
        params["layers"].append({
            "wq": nrm((D, D)), "bq": zeros((1, D)),
            "wk": nrm((D, D)), "bk": zeros((1, D)),
            "wv": nrm((D, D)), "bv": zeros((1, D)),
            "wo": nrm((D, D)), "bo": zeros((1, D)),
            "ln1_g": ones((1, D)), "ln1_b": zeros((1, D)),
            "w1": nrm((D, F)), "b1": zeros((1, F)),
            "w2": nrm((F, D)), "b2": zeros((1, D)),
            "ln2_g": ones((1, D)), "ln2_b": zeros((1, D)),
        })
    return params


# ----------------- pad / stack params into the kernel layout -----------------
def prepare_kernel_params(p):
    def pad_vec(v, n=DP):                      # (1, d) -> (1, n) f32, zero pad (lane-dense bias)
        return jnp.pad(v, ((0, 0), (0, n - v.shape[-1]))).astype(_F32)

    def pad_mat(w, rows, cols):                # 2D -> (rows, cols) bf16, zero pad
        return jnp.pad(w, ((0, rows - w.shape[0]), (0, cols - w.shape[1]))).astype(_BF16)

    layers = p["layers"]
    stack = lambda fn: jnp.stack([fn(lp) for lp in layers], axis=0)
    hd = p["head"]

    return {
        "eg": pad_vec(p["emb_ln_g"]), "eb": pad_vec(p["emb_ln_b"]),
        # Q/K/V kept lane-packed exactly like the original (D, D) layout, padded to (DP, DP).
        "wq": stack(lambda lp: pad_mat(lp["wq"], DP, DP)), "bq": stack(lambda lp: pad_vec(lp["bq"])),
        "wk": stack(lambda lp: pad_mat(lp["wk"], DP, DP)), "bk": stack(lambda lp: pad_vec(lp["bk"])),
        "wv": stack(lambda lp: pad_mat(lp["wv"], DP, DP)), "bv": stack(lambda lp: pad_vec(lp["bv"])),
        # Output projection rows indexed by h*DH+d (matches lane-packed ctx), cols padded to DP.
        "wo": stack(lambda lp: pad_mat(lp["wo"], D, DP)), "bo": stack(lambda lp: pad_vec(lp["bo"])),
        "ln1_g": stack(lambda lp: pad_vec(lp["ln1_g"])), "ln1_b": stack(lambda lp: pad_vec(lp["ln1_b"])),
        "w1": stack(lambda lp: pad_mat(lp["w1"], DP, F)), "bf1": stack(lambda lp: lp["b1"].astype(_F32)),
        "w2": stack(lambda lp: pad_mat(lp["w2"], F, DP)), "bf2": stack(lambda lp: pad_vec(lp["b2"])),
        "ln2_g": stack(lambda lp: pad_vec(lp["ln2_g"])), "ln2_b": stack(lambda lp: pad_vec(lp["ln2_b"])),
        "wm": pad_mat(hd["w_mlm"], DP, DP), "bm": pad_vec(hd["b_mlm"]),
        "gm": pad_vec(hd["mlm_ln_g"]), "gb": pad_vec(hd["mlm_ln_b"]),
        "wdec": pad_mat(hd["w_dec"], DP, VP),
        "wnsp": pad_mat(hd["w_nsp"], DP, NSPP), "bnsp": pad_vec(hd["b_nsp"], NSPP),
    }


# ----------------- full model forward (wrapper) -----------------
def bert_forward(params, kparams, ids, seg, mask):
    # Embedding table gathers stay JAX-side (data-dependent gather); everything
    # else runs inside the single fused Pallas kernel.
    tok_e = jnp.take(params["tok_emb"], ids, axis=0)                    # (B, S, D)
    seg_e = jnp.take(params["seg_emb"], seg, axis=0)                    # (B, S, D)
    x_emb = tok_e + seg_e + params["pos_emb"][None]                     # (B, S, D)
    x_emb = jnp.pad(x_emb, ((0, 0), (0, 0), (0, DP - D)))               # lane-pad to 128

    # Hoisted additive attention-mask bias (f32), computed once outside the kernel.
    bias3 = ((1.0 - mask.astype(_F32)) * (-1e9)).reshape(B, 1, S)

    mlm_pad, nsp_pad = bert_pallas_forward(kparams, x_emb, bias3)
    return mlm_pad[:, :, :V], nsp_pad[:, 0, :2]


# ----------------- pure-JAX reference (unpadded, f32) -----------------
def ref_forward(p, ids, seg, mask):
    x = p["tok_emb"][ids] + p["seg_emb"][seg] + p["pos_emb"][None]
    x = _ln_ref(x, p["emb_ln_g"], p["emb_ln_b"])
    m = mask.reshape(B, 1, 1, S)
    for lp in p["layers"]:
        q = x @ lp["wq"] + lp["bq"]
        k = x @ lp["wk"] + lp["bk"]
        v = x @ lp["wv"] + lp["bv"]
        split = lambda t: t.reshape(B, S, H, DH).transpose(0, 2, 1, 3)
        qh, kh, vh = split(q), split(k), split(v)
        s = jnp.einsum('bhqd,bhkd->bhqk', qh, kh) / math.sqrt(DH)
        s = jnp.where(m > 0, s, -1e9)
        pa = jax.nn.softmax(s, axis=-1)
        ctx = jnp.einsum('bhqk,bhkd->bhqd', pa, vh)
        ctx = ctx.transpose(0, 2, 1, 3).reshape(B, S, D)
        attn = ctx @ lp["wo"] + lp["bo"]
        h1 = _ln_ref(x + attn, lp["ln1_g"], lp["ln1_b"])
        ff = _gelu(h1 @ lp["w1"] + lp["b1"]) @ lp["w2"] + lp["b2"]
        x = _ln_ref(h1 + ff, lp["ln2_g"], lp["ln2_b"])
    hd = p["head"]
    h = _gelu(x @ hd["w_mlm"] + hd["b_mlm"])
    h = _ln_ref(h, hd["mlm_ln_g"], hd["mlm_ln_b"])
    mlm = h @ hd["w_dec"]
    nsp = x[:, 0, :] @ hd["w_nsp"] + hd["b_nsp"]
    return mlm, nsp


if __name__ == "__main__":
    key = jax.random.PRNGKey(0)
    pkey, ikey, skey = jax.random.split(key, 3)

    params = init_params(pkey)
    kparams = prepare_kernel_params(params)

    ids = jax.random.randint(ikey, (B, S), 0, V, dtype=jnp.int32)       # token ids
    seg = jax.random.randint(skey, (B, S), 0, NSEG, dtype=jnp.int32)    # segment labels
    mask = (ids > 0).astype(_F32)                                       # attention mask (1 = attend)

    fwd = jax.jit(functools.partial(bert_forward, params, kparams))
    mlm_logits, nsp_logits = fwd(ids, seg, mask)
    jax.block_until_ready((mlm_logits, nsp_logits))

    assert mlm_logits.shape == (B, S, V), mlm_logits.shape
    assert nsp_logits.shape == (B, 2), nsp_logits.shape
    assert bool(jnp.all(jnp.isfinite(mlm_logits)))
    assert bool(jnp.all(jnp.isfinite(nsp_logits)))

    # correctness vs pure-JAX f32 reference (kernel uses bf16 matmul inputs + approx
    # reciprocal in softmax, hence the slightly looser tolerance)
    mlm_ref, nsp_ref = jax.jit(functools.partial(ref_forward, params))(ids, seg, mask)
    err_mlm = float(jnp.max(jnp.abs(mlm_logits - mlm_ref)))
    err_nsp = float(jnp.max(jnp.abs(nsp_logits - nsp_ref)))
    assert err_mlm < 5e-2 and err_nsp < 5e-2, (err_mlm, err_nsp)

    print("KERNEL_OK")
</pallas_src>

<mosaic_0001>
module attributes {stable_mosaic.version = 11 : i64} {
  func.func @bert_fused_kernel(%arg0: i32, %arg1: memref<2x8x128xf32, #tpu.memory_space<vmem>>, %arg2: memref<2x1x8xf32, #tpu.memory_space<vmem>>, %arg3: memref<1x128xf32, #tpu.memory_space<vmem>>, %arg4: memref<1x128xf32, #tpu.memory_space<vmem>>, %arg5: memref<2x128x128xbf16, #tpu.memory_space<vmem>>, %arg6: memref<2x1x128xf32, #tpu.memory_space<vmem>>, %arg7: memref<2x128x128xbf16, #tpu.memory_space<vmem>>, %arg8: memref<2x1x128xf32, #tpu.memory_space<vmem>>, %arg9: memref<2x128x128xbf16, #tpu.memory_space<vmem>>, %arg10: memref<2x1x128xf32, #tpu.memory_space<vmem>>, %arg11: memref<2x32x128xbf16, #tpu.memory_space<vmem>>, %arg12: memref<2x1x128xf32, #tpu.memory_space<vmem>>, %arg13: memref<2x1x128xf32, #tpu.memory_space<vmem>>, %arg14: memref<2x1x128xf32, #tpu.memory_space<vmem>>, %arg15: memref<2x128x128xbf16, #tpu.memory_space<vmem>>, %arg16: memref<2x1x128xf32, #tpu.memory_space<vmem>>, %arg17: memref<2x128x128xbf16, #tpu.memory_space<vmem>>, %arg18: memref<2x1x128xf32, #tpu.memory_space<vmem>>, %arg19: memref<2x1x128xf32, #tpu.memory_space<vmem>>, %arg20: memref<2x1x128xf32, #tpu.memory_space<vmem>>, %arg21: memref<128x128xbf16, #tpu.memory_space<vmem>>, %arg22: memref<1x128xf32, #tpu.memory_space<vmem>>, %arg23: memref<1x128xf32, #tpu.memory_space<vmem>>, %arg24: memref<1x128xf32, #tpu.memory_space<vmem>>, %arg25: memref<128x128xbf16, #tpu.memory_space<vmem>>, %arg26: memref<128x128xbf16, #tpu.memory_space<vmem>>, %arg27: memref<1x128xf32, #tpu.memory_space<vmem>>, %arg28: memref<2x8x128xf32, #tpu.memory_space<vmem>>, %arg29: memref<2x1x128xf32, #tpu.memory_space<vmem>>) attributes {dimension_semantics = [#tpu.dimension_semantics<parallel>], iteration_bounds = array<i64: 1>, scalar_prefetch = 0 : i64, scratch_operands = 0 : i64, tpu.core_type = #tpu.core_type<tc>, window_params = [{transform_indices = @transform_0, window_bounds = array<i64: 2, 8, 128>}, {transform_indices = @transform_1, window_bounds = array<i64: 2, 1, 8>}, {pipeline_mode = #tpu.pipeline_mode<synchronous>, transform_indices = @transform_2, window_bounds = array<i64: 1, 128>}, {pipeline_mode = #tpu.pipeline_mode<synchronous>, transform_indices = @transform_3, window_bounds = array<i64: 1, 128>}, {pipeline_mode = #tpu.pipeline_mode<synchronous>, transform_indices = @transform_4, window_bounds = array<i64: 2, 128, 128>}, {pipeline_mode = #tpu.pipeline_mode<synchronous>, transform_indices = @transform_5, window_bounds = array<i64: 2, 1, 128>}, {pipeline_mode = #tpu.pipeline_mode<synchronous>, transform_indices = @transform_6, window_bounds = array<i64: 2, 128, 128>}, {pipeline_mode = #tpu.pipeline_mode<synchronous>, transform_indices = @transform_7, window_bounds = array<i64: 2, 1, 128>}, {pipeline_mode = #tpu.pipeline_mode<synchronous>, transform_indices = @transform_8, window_bounds = array<i64: 2, 128, 128>}, {pipeline_mode = #tpu.pipeline_mode<synchronous>, transform_indices = @transform_9, window_bounds = array<i64: 2, 1, 128>}, {pipeline_mode = #tpu.pipeline_mode<synchronous>, transform_indices = @transform_10, window_bounds = array<i64: 2, 32, 128>}, {pipeline_mode = #tpu.pipeline_mode<synchronous>, transform_indices = @transform_11, window_bounds = array<i64: 2, 1, 128>}, {pipeline_mode = #tpu.pipeline_mode<synchronous>, transform_indices = @transform_12, window_bounds = array<i64: 2, 1, 128>}, {pipeline_mode = #tpu.pipeline_mode<synchronous>, transform_indices = @transform_13, window_bounds = array<i64: 2, 1, 128>}, {pipeline_mode = #tpu.pipeline_mode<synchronous>, transform_indices = @transform_14, window_bounds = array<i64: 2, 128, 128>}, {pipeline_mode = #tpu.pipeline_mode<synchronous>, transform_indices = @transform_15, window_bounds = array<i64: 2, 1, 128>}, {pipeline_mode = #tpu.pipeline_mode<synchronous>, transform_indices = @transform_16, window_bounds = array<i64: 2, 128, 128>}, {pipeline_mode = #tpu.pipeline_mode<synchronous>, transform_indices = @transform_17, window_bounds = array<i64: 2, 1, 128>}, {pipeline_mode = #tpu.pipeline_mode<synchronous>, transform_indices = @transform_18, window_bounds = array<i64: 2, 1, 128>}, {pipeline_mode = #tpu.pipeline_mode<synchronous>, transform_indices = @transform_19, window_bounds = array<i64: 2, 1, 128>}, {pipeline_mode = #tpu.pipeline_mode<synchronous>, transform_indices = @transform_20, window_bounds = array<i64: 128, 128>}, {pipeline_mode = #tpu.pipeline_mode<synchronous>, transform_indices = @transform_21, window_bounds = array<i64: 1, 128>}, {pipeline_mode = #tpu.pipeline_mode<synchronous>, transform_indices = @transform_22, window_bounds = array<i64: 1, 128>}, {pipeline_mode = #tpu.pipeline_mode<synchronous>, transform_indices = @transform_23, window_bounds = array<i64: 1, 128>}, {pipeline_mode = #tpu.pipeline_mode<synchronous>, transform_indices = @transform_24, window_bounds = array<i64: 128, 128>}, {pipeline_mode = #tpu.pipeline_mode<synchronous>, transform_indices = @transform_25, window_bounds = array<i64: 128, 128>}, {pipeline_mode = #tpu.pipeline_mode<synchronous>, transform_indices = @transform_26, window_bounds = array<i64: 1, 128>}, {transform_indices = @transform_27, window_bounds = array<i64: 2, 8, 128>}, {transform_indices = @transform_28, window_bounds = array<i64: 2, 1, 128>}]} {
    %c0 = arith.constant 0 : index
    %c0_0 = arith.constant 0 : index
    %c0_1 = arith.constant 0 : index
    %0 = vector.load %arg1[%c0, %c0_0, %c0_1] : memref<2x8x128xf32, #tpu.memory_space<vmem>>, vector<2x8x128xf32>
    %1 = vector.shape_cast %0 : vector<2x8x128xf32> to vector<16x128xf32>
    %c0_2 = arith.constant 0 : index
    %c0_3 = arith.constant 0 : index
    %2 = vector.load %arg3[%c0_2, %c0_3] : memref<1x128xf32, #tpu.memory_space<vmem>>, vector<1x128xf32>
    %c0_4 = arith.constant 0 : index
    %c0_5 = arith.constant 0 : index
    %3 = vector.load %arg4[%c0_4, %c0_5] : memref<1x128xf32, #tpu.memory_space<vmem>>, vector<1x128xf32>
    %cst = arith.constant dense<0.000000e+00> : vector<16xf32>
    %4 = vector.multi_reduction <add>, %1, %cst [1] : vector<16x128xf32> to vector<16xf32>
    %5 = vector.shape_cast %4 : vector<16xf32> to vector<16x1xf32>
    %6 = arith.mulf %1, %1 : vector<16x128xf32>
    %cst_6 = arith.constant dense<0.000000e+00> : vector<16xf32>
    %7 = vector.multi_reduction <add>, %6, %cst_6 [1] : vector<16x128xf32> to vector<16xf32>
    %8 = vector.shape_cast %7 : vector<16xf32> to vector<16x1xf32>
    %cst_7 = arith.constant 3.200000e+01 : f32
    %9 = vector.broadcast %cst_7 : f32 to vector<16x1xf32>
    %10 = arith.divf %5, %9 : vector<16x1xf32>
    %cst_8 = arith.constant 3.200000e+01 : f32
    %11 = vector.broadcast %cst_8 : f32 to vector<16x1xf32>
    %12 = arith.divf %8, %11 : vector<16x1xf32>
    %13 = arith.mulf %10, %10 : vector<16x1xf32>
    %14 = arith.subf %12, %13 : vector<16x1xf32>
    %cst_9 = arith.constant 0.000000e+00 : f32
    %15 = vector.broadcast %cst_9 : f32 to vector<16x1xf32>
    %16 = arith.maximumf %14, %15 : vector<16x1xf32>
    %17 = vector.broadcast %10 : vector<16x1xf32> to vector<16x128xf32>
    %18 = arith.subf %1, %17 : vector<16x128xf32>
    %cst_10 = arith.constant 9.99999996E-13 : f32
    %19 = vector.broadcast %cst_10 : f32 to vector<16x1xf32>
    %20 = arith.addf %16, %19 : vector<16x1xf32>
    %21 = math.rsqrt %20 : vector<16x1xf32>
    %22 = vector.broadcast %21 : vector<16x1xf32> to vector<16x128xf32>
    %23 = arith.mulf %18, %22 : vector<16x128xf32>
    %24 = vector.broadcast %2 : vector<1x128xf32> to vector<16x128xf32>
    %25 = arith.mulf %23, %24 : vector<16x128xf32>
    %26 = vector.broadcast %3 : vector<1x128xf32> to vector<16x128xf32>
    %27 = arith.addf %25, %26 : vector<16x128xf32>
    %28 = arith.truncf %27 : vector<16x128xf32> to vector<16x128xbf16>
    %c0_11 = arith.constant 0 : index
    %c0_12 = arith.constant 0 : index
    %c0_13 = arith.constant 0 : index
    %29 = vector.load %arg5[%c0_11, %c0_12, %c0_13] : memref<2x128x128xbf16, #tpu.memory_space<vmem>>, vector<1x128x128xbf16>
    %30 = vector.shape_cast %29 : vector<1x128x128xbf16> to vector<128x128xbf16>
    %cst_14 = arith.constant dense<0.000000e+00> : vector<16x128xf32>
    %31 = tpu.matmul %28, %30, %cst_14 {dimension_numbers = #tpu.dot_dimension_numbers<[1], [0], [0], [1], [0, 0, 1, 1], [], []>} : vector<16x128xbf16>, vector<128x128xbf16>, vector<16x128xf32> -> vector<16x128xf32>
    %c0_15 = arith.constant 0 : index
    %c0_16 = arith.constant 0 : index
    %c0_17 = arith.constant 0 : index
    %32 = vector.load %arg6[%c0_15, %c0_16, %c0_17] : memref<2x1x128xf32, #tpu.memory_space<vmem>>, vector<1x1x128xf32>
    %33 = vector.shape_cast %32 : vector<1x1x128xf32> to vector<1x128xf32>
    %34 = vector.broadcast %33 : vector<1x128xf32> to vector<16x128xf32>
    %35 = arith.addf %31, %34 : vector<16x128xf32>
    %c0_18 = arith.constant 0 : index
    %c0_19 = arith.constant 0 : index
    %c0_20 = arith.constant 0 : index
    %36 = vector.load %arg7[%c0_18, %c0_19, %c0_20] : memref<2x128x128xbf16, #tpu.memory_space<vmem>>, vector<1x128x128xbf16>
    %37 = vector.shape_cast %36 : vector<1x128x128xbf16> to vector<128x128xbf16>
    %cst_21 = arith.constant dense<0.000000e+00> : vector<16x128xf32>
    %38 = tpu.matmul %28, %37, %cst_21 {dimension_numbers = #tpu.dot_dimension_numbers<[1], [0], [0], [1], [0, 0, 1, 1], [], []>} : vector<16x128xbf16>, vector<128x128xbf16>, vector<16x128xf32> -> vector<16x128xf32>
    %c0_22 = arith.constant 0 : index
    %c0_23 = arith.constant 0 : index
    %c0_24 = arith.constant 0 : index
    %39 = vector.load %arg8[%c0_22, %c0_23, %c0_24] : memref<2x1x128xf32, #tpu.memory_space<vmem>>, vector<1x1x128xf32>
    %40 = vector.shape_cast %39 : vector<1x1x128xf32> to vector<1x128xf32>
    %41 = vector.broadcast %40 : vector<1x128xf32> to vector<16x128xf32>
    %42 = arith.addf %38, %41 : vector<16x128xf32>
    %c0_25 = arith.constant 0 : index
    %c0_26 = arith.constant 0 : index
    %c0_27 = arith.constant 0 : index
    %43 = vector.load %arg9[%c0_25, %c0_26, %c0_27] : memref<2x128x128xbf16, #tpu.memory_space<vmem>>, vector<1x128x128xbf16>
    %44 = vector.shape_cast %43 : vector<1x128x128xbf16> to vector<128x128xbf16>
    %cst_28 = arith.constant dense<0.000000e+00> : vector<16x128xf32>
    %45 = tpu.matmul %28, %44, %cst_28 {dimension_numbers = #tpu.dot_dimension_numbers<[1], [0], [0], [1], [0, 0, 1, 1], [], []>} : vector<16x128xbf16>, vector<128x128xbf16>, vector<16x128xf32> -> vector<16x128xf32>
    %c0_29 = arith.constant 0 : index
    %c0_30 = arith.constant 0 : index
    %c0_31 = arith.constant 0 : index
    %46 = vector.load %arg10[%c0_29, %c0_30, %c0_31] : memref<2x1x128xf32, #tpu.memory_space<vmem>>, vector<1x1x128xf32>
    %47 = vector.shape_cast %46 : vector<1x1x128xf32> to vector<1x128xf32>
    %48 = vector.broadcast %47 : vector<1x128xf32> to vector<16x128xf32>
    %49 = arith.addf %45, %48 : vector<16x128xf32>
    %c0_32 = arith.constant 0 : index
    %c0_33 = arith.constant 0 : index
    %c0_34 = arith.constant 0 : index
    %50 = vector.load %arg2[%c0_32, %c0_33, %c0_34] : memref<2x1x8xf32, #tpu.memory_space<vmem>>, vector<1x1x8xf32>
    %51 = vector.shape_cast %50 : vector<1x1x8xf32> to vector<1x8xf32>
    %52 = vector.extract_strided_slice %35 {offsets = [0, 0], sizes = [8, 8], strides = [1, 1]} : vector<16x128xf32> to vector<8x8xf32>
    %53 = vector.extract_strided_slice %42 {offsets = [0, 0], sizes = [8, 8], strides = [1, 1]} : vector<16x128xf32> to vector<8x8xf32>
    %54 = vector.extract_strided_slice %49 {offsets = [0, 0], sizes = [8, 8], strides = [1, 1]} : vector<16x128xf32> to vector<8x8xf32>
    %55 = tpu.transpose %53, [1, 0] : vector<8x8xf32> -> vector<8x8xf32>
    %cst_35 = arith.constant dense<0.000000e+00> : vector<8x8xf32>
    %56 = tpu.matmul %52, %55, %cst_35 {dimension_numbers = #tpu.dot_dimension_numbers<[1], [0], [0], [1], [0, 0, 1, 1], [], []>} : vector<8x8xf32>, vector<8x8xf32>, vector<8x8xf32> -> vector<8x8xf32>
    %cst_36 = arith.constant 0.353553385 : f32
    %57 = vector.broadcast %cst_36 : f32 to vector<8x8xf32>
    %58 = arith.mulf %56, %57 : vector<8x8xf32>
    %59 = vector.broadcast %51 : vector<1x8xf32> to vector<8x8xf32>
    %60 = arith.addf %58, %59 : vector<8x8xf32>
    %cst_37 = arith.constant dense<0xFF800000> : vector<8xf32>
    %61 = vector.multi_reduction <maximumf>, %60, %cst_37 [1] : vector<8x8xf32> to vector<8xf32>
    %62 = vector.shape_cast %61 : vector<8xf32> to vector<8x1xf32>
    %63 = vector.broadcast %62 : vector<8x1xf32> to vector<8x8xf32>
    %64 = arith.subf %60, %63 : vector<8x8xf32>
    %65 = math.exp %64 : vector<8x8xf32>
    %cst_38 = arith.constant dense<0.000000e+00> : vector<8xf32>
    %66 = vector.multi_reduction <add>, %65, %cst_38 [1] : vector<8x8xf32> to vector<8xf32>
    %67 = vector.shape_cast %66 : vector<8xf32> to vector<8x1xf32>
    %68 = tpu.reciprocal %67 {approx = true} : vector<8x1xf32> -> vector<8x1xf32>
    %69 = vector.broadcast %68 : vector<8x1xf32> to vector<8x8xf32>
    %70 = arith.mulf %65, %69 : vector<8x8xf32>
    %cst_39 = arith.constant dense<0.000000e+00> : vector<8x8xf32>
    %71 = tpu.matmul %70, %54, %cst_39 {dimension_numbers = #tpu.dot_dimension_numbers<[1], [0], [0], [1], [0, 0, 1, 1], [], []>} : vector<8x8xf32>, vector<8x8xf32>, vector<8x8xf32> -> vector<8x8xf32>
    %72 = vector.extract_strided_slice %35 {offsets = [0, 8], sizes = [8, 8], strides = [1, 1]} : vector<16x128xf32> to vector<8x8xf32>
    %73 = vector.extract_strided_slice %42 {offsets = [0, 8], sizes = [8, 8], strides = [1, 1]} : vector<16x128xf32> to vector<8x8xf32>
    %74 = vector.extract_strided_slice %49 {offsets = [0, 8], sizes = [8, 8], strides = [1, 1]} : vector<16x128xf32> to vector<8x8xf32>
    %75 = tpu.transpose %73, [1, 0] : vector<8x8xf32> -> vector<8x8xf32>
    %cst_40 = arith.constant dense<0.000000e+00> : vector<8x8xf32>
    %76 = tpu.matmul %72, %75, %cst_40 {dimension_numbers = #tpu.dot_dimension_numbers<[1], [0], [0], [1], [0, 0, 1, 1], [], []>} : vector<8x8xf32>, vector<8x8xf32>, vector<8x8xf32> -> vector<8x8xf32>
    %cst_41 = arith.constant 0.353553385 : f32
    %77 = vector.broadcast %cst_41 : f32 to vector<8x8xf32>
    %78 = arith.mulf %76, %77 : vector<8x8xf32>
    %79 = vector.broadcast %51 : vector<1x8xf32> to vector<8x8xf32>
    %80 = arith.addf %78, %79 : vector<8x8xf32>
    %cst_42 = arith.constant dense<0xFF800000> : vector<8xf32>
    %81 = vector.multi_reduction <maximumf>, %80, %cst_42 [1] : vector<8x8xf32> to vector<8xf32>
    %82 = vector.shape_cast %81 : vector<8xf32> to vector<8x1xf32>
    %83 = vector.broadcast %82 : vector<8x1xf32> to vector<8x8xf32>
    %84 = arith.subf %80, %83 : vector<8x8xf32>
    %85 = math.exp %84 : vector<8x8xf32>
    %cst_43 = arith.constant dense<0.000000e+00> : vector<8xf32>
    %86 = vector.multi_reduction <add>, %85, %cst_43 [1] : vector<8x8xf32> to vector<8xf32>
    %87 = vector.shape_cast %86 : vector<8xf32> to vector<8x1xf32>
    %88 = tpu.reciprocal %87 {approx = true} : vector<8x1xf32> -> vector<8x1xf32>
    %89 = vector.broadcast %88 : vector<8x1xf32> to vector<8x8xf32>
    %90 = arith.mulf %85, %89 : vector<8x8xf32>
    %cst_44 = arith.constant dense<0.000000e+00> : vector<8x8xf32>
    %91 = tpu.matmul %90, %74, %cst_44 {dimension_numbers = #tpu.dot_dimension_numbers<[1], [0], [0], [1], [0, 0, 1, 1], [], []>} : vector<8x8xf32>, vector<8x8xf32>, vector<8x8xf32> -> vector<8x8xf32>
    %92 = vector.extract_strided_slice %35 {offsets = [0, 16], sizes = [8, 8], strides = [1, 1]} : vector<16x128xf32> to vector<8x8xf32>
    %93 = vector.extract_strided_slice %42 {offsets = [0, 16], sizes = [8, 8], strides = [1, 1]} : vector<16x128xf32> to vector<8x8xf32>
    %94 = vector.extract_strided_slice %49 {offsets = [0, 16], sizes = [8, 8], strides = [1, 1]} : vector<16x128xf32> to vector<8x8xf32>
    %95 = tpu.transpose %93, [1, 0] : vector<8x8xf32> -> vector<8x8xf32>
    %cst_45 = arith.constant dense<0.000000e+00> : vector<8x8xf32>
    %96 = tpu.matmul %92, %95, %cst_45 {dimension_numbers = #tpu.dot_dimension_numbers<[1], [0], [0], [1], [0, 0, 1, 1], [], []>} : vector<8x8xf32>, vector<8x8xf32>, vector<8x8xf32> -> vector<8x8xf32>
    %cst_46 = arith.constant 0.353553385 : f32
    %97 = vector.broadcast %cst_46 : f32 to vector<8x8xf32>
    %98 = arith.mulf %96, %97 : vector<8x8xf32>
    %99 = vector.broadcast %51 : vector<1x8xf32> to vector<8x8xf32>
    %100 = arith.addf %98, %99 : vector<8x8xf32>
    %cst_47 = arith.constant dense<0xFF800000> : vector<8xf32>
    %101 = vector.multi_reduction <maximumf>, %100, %cst_47 [1] : vector<8x8xf32> to vector<8xf32>
    %102 = vector.shape_cast %101 : vector<8xf32> to vector<8x1xf32>
    %103 = vector.broadcast %102 : vector<8x1xf32> to vector<8x8xf32>
    %104 = arith.subf %100, %103 : vector<8x8xf32>
    %105 = math.exp %104 : vector<8x8xf32>
    %cst_48 = arith.constant dense<0.000000e+00> : vector<8xf32>
    %106 = vector.multi_reduction <add>, %105, %cst_48 [1] : vector<8x8xf32> to vector<8xf32>
    %107 = vector.shape_cast %106 : vector<8xf32> to vector<8x1xf32>
    %108 = tpu.reciprocal %107 {approx = true} : vector<8x1xf32> -> vector<8x1xf32>
    %109 = vector.broadcast %108 : vector<8x1xf32> to vector<8x8xf32>
    %110 = arith.mulf %105, %109 : vector<8x8xf32>
    %cst_49 = arith.constant dense<0.000000e+00> : vector<8x8xf32>
    %111 = tpu.matmul %110, %94, %cst_49 {dimension_numbers = #tpu.dot_dimension_numbers<[1], [0], [0], [1], [0, 0, 1, 1], [], []>} : vector<8x8xf32>, vector<8x8xf32>, vector<8x8xf32> -> vector<8x8xf32>
    %112 = vector.extract_strided_slice %35 {offsets = [0, 24], sizes = [8, 8], strides = [1, 1]} : vector<16x128xf32> to vector<8x8xf32>
    %113 = vector.extract_strided_slice %42 {offsets = [0, 24], sizes = [8, 8], strides = [1, 1]} : vector<16x128xf32> to vector<8x8xf32>
    %114 = vector.extract_strided_slice %49 {offsets = [0, 24], sizes = [8, 8], strides = [1, 1]} : vector<16x128xf32> to vector<8x8xf32>
    %115 = tpu.transpose %113, [1, 0] : vector<8x8xf32> -> vector<8x8xf32>
    %cst_50 = arith.constant dense<0.000000e+00> : vector<8x8xf32>
    %116 = tpu.matmul %112, %115, %cst_50 {dimension_numbers = #tpu.dot_dimension_numbers<[1], [0], [0], [1], [0, 0, 1, 1], [], []>} : vector<8x8xf32>, vector<8x8xf32>, vector<8x8xf32> -> vector<8x8xf32>
    %cst_51 = arith.constant 0.353553385 : f32
    %117 = vector.broadcast %cst_51 : f32 to vector<8x8xf32>
    %118 = arith.mulf %116, %117 : vector<8x8xf32>
    %119 = vector.broadcast %51 : vector<1x8xf32> to vector<8x8xf32>
    %120 = arith.addf %118, %119 : vector<8x8xf32>
    %cst_52 = arith.constant dense<0xFF800000> : vector<8xf32>
    %121 = vector.multi_reduction <maximumf>, %120, %cst_52 [1] : vector<8x8xf32> to vector<8xf32>
    %122 = vector.shape_cast %121 : vector<8xf32> to vector<8x1xf32>
    %123 = vector.broadcast %122 : vector<8x1xf32> to vector<8x8xf32>
    %124 = arith.subf %120, %123 : vector<8x8xf32>
    %125 = math.exp %124 : vector<8x8xf32>
    %cst_53 = arith.constant dense<0.000000e+00> : vector<8xf32>
    %126 = vector.multi_reduction <add>, %125, %cst_53 [1] : vector<8x8xf32> to vector<8xf32>
    %127 = vector.shape_cast %126 : vector<8xf32> to vector<8x1xf32>
    %128 = tpu.reciprocal %127 {approx = true} : vector<8x1xf32> -> vector<8x1xf32>
    %129 = vector.broadcast %128 : vector<8x1xf32> to vector<8x8xf32>
    %130 = arith.mulf %125, %129 : vector<8x8xf32>
    %cst_54 = arith.constant dense<0.000000e+00> : vector<8x8xf32>
    %131 = tpu.matmul %130, %114, %cst_54 {dimension_numbers = #tpu.dot_dimension_numbers<[1], [0], [0], [1], [0, 0, 1, 1], [], []>} : vector<8x8xf32>, vector<8x8xf32>, vector<8x8xf32> -> vector<8x8xf32>
    %132 = tpu.concatenate %71, %91, %111, %131 in 1 : vector<8x8xf32>, vector<8x8xf32>, vector<8x8xf32>, vector<8x8xf32> -> vector<8x32xf32>
    %c1 = arith.constant 1 : index
    %c0_55 = arith.constant 0 : index
    %c0_56 = arith.constant 0 : index
    %133 = vector.load %arg2[%c1, %c0_55, %c0_56] : memref<2x1x8xf32, #tpu.memory_space<vmem>>, vector<1x1x8xf32>
    %134 = vector.shape_cast %133 : vector<1x1x8xf32> to vector<1x8xf32>
    %135 = vector.extract_strided_slice %35 {offsets = [8, 0], sizes = [8, 8], strides = [1, 1]} : vector<16x128xf32> to vector<8x8xf32>
    %136 = vector.extract_strided_slice %42 {offsets = [8, 0], sizes = [8, 8], strides = [1, 1]} : vector<16x128xf32> to vector<8x8xf32>
    %137 = vector.extract_strided_slice %49 {offsets = [8, 0], sizes = [8, 8], strides = [1, 1]} : vector<16x128xf32> to vector<8x8xf32>
    %138 = tpu.transpose %136, [1, 0] : vector<8x8xf32> -> vector<8x8xf32>
    %cst_57 = arith.constant dense<0.000000e+00> : vector<8x8xf32>
    %139 = tpu.matmul %135, %138, %cst_57 {dimension_numbers = #tpu.dot_dimension_numbers<[1], [0], [0], [1], [0, 0, 1, 1], [], []>} : vector<8x8xf32>, vector<8x8xf32>, vector<8x8xf32> -> vector<8x8xf32>
    %cst_58 = arith.constant 0.353553385 : f32
    %140 = vector.broadcast %cst_58 : f32 to vector<8x8xf32>
    %141 = arith.mulf %139, %140 : vector<8x8xf32>
    %142 = vector.broadcast %134 : vector<1x8xf32> to vector<8x8xf32>
    %143 = arith.addf %141, %142 : vector<8x8xf32>
    %cst_59 = arith.constant dense<0xFF800000> : vector<8xf32>
    %144 = vector.multi_reduction <maximumf>, %143, %cst_59 [1] : vector<8x8xf32> to vector<8xf32>
    %145 = vector.shape_cast %144 : vector<8xf32> to vector<8x1xf32>
    %146 = vector.broadcast %145 : vector<8x1xf32> to vector<8x8xf32>
    %147 = arith.subf %143, %146 : vector<8x8xf32>
    %148 = math.exp %147 : vector<8x8xf32>
    %cst_60 = arith.constant dense<0.000000e+00> : vector<8xf32>
    %149 = vector.multi_reduction <add>, %148, %cst_60 [1] : vector<8x8xf32> to vector<8xf32>
    %150 = vector.shape_cast %149 : vector<8xf32> to vector<8x1xf32>
    %151 = tpu.reciprocal %150 {approx = true} : vector<8x1xf32> -> vector<8x1xf32>
    %152 = vector.broadcast %151 : vector<8x1xf32> to vector<8x8xf32>
    %153 = arith.mulf %148, %152 : vector<8x8xf32>
    %cst_61 = arith.constant dense<0.000000e+00> : vector<8x8xf32>
    %154 = tpu.matmul %153, %137, %cst_61 {dimension_numbers = #tpu.dot_dimension_numbers<[1], [0], [0], [1], [0, 0, 1, 1], [], []>} : vector<8x8xf32>, vector<8x8xf32>, vector<8x8xf32> -> vector<8x8xf32>
    %155 = vector.extract_strided_slice %35 {offsets = [8, 8], sizes = [8, 8], strides = [1, 1]} : vector<16x128xf32> to vector<8x8xf32>
    %156 = vector.extract_strided_slice %42 {offsets = [8, 8], sizes = [8, 8], strides = [1, 1]} : vector<16x128xf32> to vector<8x8xf32>
    %157 = vector.extract_strided_slice %49 {offsets = [8, 8], sizes = [8, 8], strides = [1, 1]} : vector<16x128xf32> to vector<8x8xf32>
    %158 = tpu.transpose %156, [1, 0] : vector<8x8xf32> -> vector<8x8xf32>
    %cst_62 = arith.constant dense<0.000000e+00> : vector<8x8xf32>
    %159 = tpu.matmul %155, %158, %cst_62 {dimension_numbers = #tpu.dot_dimension_numbers<[1], [0], [0], [1], [0, 0, 1, 1], [], []>} : vector<8x8xf32>, vector<8x8xf32>, vector<8x8xf32> -> vector<8x8xf32>
    %cst_63 = arith.constant 0.353553385 : f32
    %160 = vector.broadcast %cst_63 : f32 to vector<8x8xf32>
    %161 = arith.mulf %159, %160 : vector<8x8xf32>
    %162 = vector.broadcast %134 : vector<1x8xf32> to vector<8x8xf32>
    %163 = arith.addf %161, %162 : vector<8x8xf32>
    %cst_64 = arith.constant dense<0xFF800000> : vector<8xf32>
    %164 = vector.multi_reduction <maximumf>, %163, %cst_64 [1] : vector<8x8xf32> to vector<8xf32>
    %165 = vector.shape_cast %164 : vector<8xf32> to vector<8x1xf32>
    %166 = vector.broadcast %165 : vector<8x1xf32> to vector<8x8xf32>
    %167 = arith.subf %163, %166 : vector<8x8xf32>
    %168 = math.exp %167 : vector<8x8xf32>
    %cst_65 = arith.constant dense<0.000000e+00> : vector<8xf32>
    %169 = vector.multi_reduction <add>, %168, %cst_65 [1] : vector<8x8xf32> to vector<8xf32>
    %170 = vector.shape_cast %169 : vector<8xf32> to vector<8x1xf32>
    %171 = tpu.reciprocal %170 {approx = true} : vector<8x1xf32> -> vector<8x1xf32>
    %172 = vector.broadcast %171 : vector<8x1xf32> to vector<8x8xf32>
    %173 = arith.mulf %168, %172 : vector<8x8xf32>
    %cst_66 = arith.constant dense<0.000000e+00> : vector<8x8xf32>
    %174 = tpu.matmul %173, %157, %cst_66 {dimension_numbers = #tpu.dot_dimension_numbers<[1], [0], [0], [1], [0, 0, 1, 1], [], []>} : vector<8x8xf32>, vector<8x8xf32>, vector<8x8xf32> -> vector<8x8xf32>
    %175 = vector.extract_strided_slice %35 {offsets = [8, 16], sizes = [8, 8], strides = [1, 1]} : vector<16x128xf32> to vector<8x8xf32>
    %176 = vector.extract_strided_slice %42 {offsets = [8, 16], sizes = [8, 8], strides = [1, 1]} : vector<16x128xf32> to vector<8x8xf32>
    %177 = vector.extract_strided_slice %49 {offsets = [8, 16], sizes = [8, 8], strides = [1, 1]} : vector<16x128xf32> to vector<8x8xf32>
    %178 = tpu.transpose %176, [1, 0] : vector<8x8xf32> -> vector<8x8xf32>
    %cst_67 = arith.constant dense<0.000000e+00> : vector<8x8xf32>
    %179 = tpu.matmul %175, %178, %cst_67 {dimension_numbers = #tpu.dot_dimension_numbers<[1], [0], [0], [1], [0, 0, 1, 1], [], []>} : vector<8x8xf32>, vector<8x8xf32>, vector<8x8xf32> -> vector<8x8xf32>
    %cst_68 = arith.constant 0.353553385 : f32
    %180 = vector.broadcast %cst_68 : f32 to vector<8x8xf32>
    %181 = arith.mulf %179, %180 : vector<8x8xf32>
    %182 = vector.broadcast %134 : vector<1x8xf32> to vector<8x8xf32>
    %183 = arith.addf %181, %182 : vector<8x8xf32>
    %cst_69 = arith.constant dense<0xFF800000> : vector<8xf32>
    %184 = vector.multi_reduction <maximumf>, %183, %cst_69 [1] : vector<8x8xf32> to vector<8xf32>
    %185 = vector.shape_cast %184 : vector<8xf32> to vector<8x1xf32>
    %186 = vector.broadcast %185 : vector<8x1xf32> to vector<8x8xf32>
    %187 = arith.subf %183, %186 : vector<8x8xf32>
    %188 = math.exp %187 : vector<8x8xf32>
    %cst_70 = arith.constant dense<0.000000e+00> : vector<8xf32>
    %189 = vector.multi_reduction <add>, %188, %cst_70 [1] : vector<8x8xf32> to vector<8xf32>
    %190 = vector.shape_cast %189 : vector<8xf32> to vector<8x1xf32>
    %191 = tpu.reciprocal %190 {approx = true} : vector<8x1xf32> -> vector<8x1xf32>
    %192 = vector.broadcast %191 : vector<8x1xf32> to vector<8x8xf32>
    %193 = arith.mulf %188, %192 : vector<8x8xf32>
    %cst_71 = arith.constant dense<0.000000e+00> : vector<8x8xf32>
    %194 = tpu.matmul %193, %177, %cst_71 {dimension_numbers = #tpu.dot_dimension_numbers<[1], [0], [0], [1], [0, 0, 1, 1], [], []>} : vector<8x8xf32>, vector<8x8xf32>, vector<8x8xf32> -> vector<8x8xf32>
    %195 = vector.extract_strided_slice %35 {offsets = [8, 24], sizes = [8, 8], strides = [1, 1]} : vector<16x128xf32> to vector<8x8xf32>
    %196 = vector.extract_strided_slice %42 {offsets = [8, 24], sizes = [8, 8], strides = [1, 1]} : vector<16x128xf32> to vector<8x8xf32>
    %197 = vector.extract_strided_slice %49 {offsets = [8, 24], sizes = [8, 8], strides = [1, 1]} : vector<16x128xf32> to vector<8x8xf32>
    %198 = tpu.transpose %196, [1, 0] : vector<8x8xf32> -> vector<8x8xf32>
    %cst_72 = arith.constant dense<0.000000e+00> : vector<8x8xf32>
    %199 = tpu.matmul %195, %198, %cst_72 {dimension_numbers = #tpu.dot_dimension_numbers<[1], [0], [0], [1], [0, 0, 1, 1], [], []>} : vector<8x8xf32>, vector<8x8xf32>, vector<8x8xf32> -> vector<8x8xf32>
    %cst_73 = arith.constant 0.353553385 : f32
    %200 = vector.broadcast %cst_73 : f32 to vector<8x8xf32>
    %201 = arith.mulf %199, %200 : vector<8x8xf32>
    %202 = vector.broadcast %134 : vector<1x8xf32> to vector<8x8xf32>
    %203 = arith.addf %201, %202 : vector<8x8xf32>
    %cst_74 = arith.constant dense<0xFF800000> : vector<8xf32>
    %204 = vector.multi_reduction <maximumf>, %203, %cst_74 [1] : vector<8x8xf32> to vector<8xf32>
    %205 = vector.shape_cast %204 : vector<8xf32> to vector<8x1xf32>
    %206 = vector.broadcast %205 : vector<8x1xf32> to vector<8x8xf32>
    %207 = arith.subf %203, %206 : vector<8x8xf32>
    %208 = math.exp %207 : vector<8x8xf32>
    %cst_75 = arith.constant dense<0.000000e+00> : vector<8xf32>
    %209 = vector.multi_reduction <add>, %208, %cst_75 [1] : vector<8x8xf32> to vector<8xf32>
    %210 = vector.shape_cast %209 : vector<8xf32> to vector<8x1xf32>
    %211 = tpu.reciprocal %210 {approx = true} : vector<8x1xf32> -> vector<8x1xf32>
    %212 = vector.broadcast %211 : vector<8x1xf32> to vector<8x8xf32>
    %213 = arith.mulf %208, %212 : vector<8x8xf32>
    %cst_76 = arith.constant dense<0.000000e+00> : vector<8x8xf32>
    %214 = tpu.matmul %213, %197, %cst_76 {dimension_numbers = #tpu.dot_dimension_numbers<[1], [0], [0], [1], [0, 0, 1, 1], [], []>} : vector<8x8xf32>, vector<8x8xf32>, vector<8x8xf32> -> vector<8x8xf32>
    %215 = tpu.concatenate %154, %174, %194, %214 in 1 : vector<8x8xf32>, vector<8x8xf32>, vector<8x8xf32>, vector<8x8xf32> -> vector<8x32xf32>
    %216 = tpu.concatenate %132, %215 in 0 : vector<8x32xf32>, vector<8x32xf32> -> vector<16x32xf32>
    %217 = arith.truncf %216 : vector<16x32xf32> to vector<16x32xbf16>
    %c0_77 = arith.constant 0 : index
    %c0_78 = arith.constant 0 : index
    %c0_79 = arith.constant 0 : index
    %218 = vector.load %arg11[%c0_77, %c0_78, %c0_79] : memref<2x32x128xbf16, #tpu.memory_space<vmem>>, vector<1x32x128xbf16>
    %219 = vector.shape_cast %218 : vector<1x32x128xbf16> to vector<32x128xbf16>
    %cst_80 = arith.constant dense<0.000000e+00> : vector<16x128xf32>
    %220 = tpu.matmul %217, %219, %cst_80 {dimension_numbers = #tpu.dot_dimension_numbers<[1], [0], [0], [1], [0, 0, 1, 1], [], []>} : vector<16x32xbf16>, vector<32x128xbf16>, vector<16x128xf32> -> vector<16x128xf32>
    %c0_81 = arith.constant 0 : index
    %c0_82 = arith.constant 0 : index
    %c0_83 = arith.constant 0 : index
    %221 = vector.load %arg12[%c0_81, %c0_82, %c0_83] : memref<2x1x128xf32, #tpu.memory_space<vmem>>, vector<1x1x128xf32>
    %222 = vector.shape_cast %221 : vector<1x1x128xf32> to vector<1x128xf32>
    %223 = vector.broadcast %222 : vector<1x128xf32> to vector<16x128xf32>
    %224 = arith.addf %220, %223 : vector<16x128xf32>
    %225 = arith.addf %27, %224 : vector<16x128xf32>
    %c0_84 = arith.constant 0 : index
    %c0_85 = arith.constant 0 : index
    %c0_86 = arith.constant 0 : index
    %226 = vector.load %arg13[%c0_84, %c0_85, %c0_86] : memref<2x1x128xf32, #tpu.memory_space<vmem>>, vector<1x1x128xf32>
    %227 = vector.shape_cast %226 : vector<1x1x128xf32> to vector<1x128xf32>
    %c0_87 = arith.constant 0 : index
    %c0_88 = arith.constant 0 : index
    %c0_89 = arith.constant 0 : index
    %228 = vector.load %arg14[%c0_87, %c0_88, %c0_89] : memref<2x1x128xf32, #tpu.memory_space<vmem>>, vector<1x1x128xf32>
    %229 = vector.shape_cast %228 : vector<1x1x128xf32> to vector<1x128xf32>
    %cst_90 = arith.constant dense<0.000000e+00> : vector<16xf32>
    %230 = vector.multi_reduction <add>, %225, %cst_90 [1] : vector<16x128xf32> to vector<16xf32>
    %231 = vector.shape_cast %230 : vector<16xf32> to vector<16x1xf32>
    %232 = arith.mulf %225, %225 : vector<16x128xf32>
    %cst_91 = arith.constant dense<0.000000e+00> : vector<16xf32>
    %233 = vector.multi_reduction <add>, %232, %cst_91 [1] : vector<16x128xf32> to vector<16xf32>
    %234 = vector.shape_cast %233 : vector<16xf32> to vector<16x1xf32>
    %cst_92 = arith.constant 3.200000e+01 : f32
    %235 = vector.broadcast %cst_92 : f32 to vector<16x1xf32>
    %236 = arith.divf %231, %235 : vector<16x1xf32>
    %cst_93 = arith.constant 3.200000e+01 : f32
    %237 = vector.broadcast %cst_93 : f32 to vector<16x1xf32>
    %238 = arith.divf %234, %237 : vector<16x1xf32>
    %239 = arith.mulf %236, %236 : vector<16x1xf32>
    %240 = arith.subf %238, %239 : vector<16x1xf32>
    %cst_94 = arith.constant 0.000000e+00 : f32
    %241 = vector.broadcast %cst_94 : f32 to vector<16x1xf32>
    %242 = arith.maximumf %240, %241 : vector<16x1xf32>
    %243 = vector.broadcast %236 : vector<16x1xf32> to vector<16x128xf32>
    %244 = arith.subf %225, %243 : vector<16x128xf32>
    %cst_95 = arith.constant 9.99999996E-13 : f32
    %245 = vector.broadcast %cst_95 : f32 to vector<16x1xf32>
    %246 = arith.addf %242, %245 : vector<16x1xf32>
    %247 = math.rsqrt %246 : vector<16x1xf32>
    %248 = vector.broadcast %247 : vector<16x1xf32> to vector<16x128xf32>
    %249 = arith.mulf %244, %248 : vector<16x128xf32>
    %250 = vector.broadcast %227 : vector<1x128xf32> to vector<16x128xf32>
    %251 = arith.mulf %249, %250 : vector<16x128xf32>
    %252 = vector.broadcast %229 : vector<1x128xf32> to vector<16x128xf32>
    %253 = arith.addf %251, %252 : vector<16x128xf32>
    %254 = arith.truncf %253 : vector<16x128xf32> to vector<16x128xbf16>
    %c0_96 = arith.constant 0 : index
    %c0_97 = arith.constant 0 : index
    %c0_98 = arith.constant 0 : index
    %255 = vector.load %arg15[%c0_96, %c0_97, %c0_98] : memref<2x128x128xbf16, #tpu.memory_space<vmem>>, vector<1x128x128xbf16>
    %256 = vector.shape_cast %255 : vector<1x128x128xbf16> to vector<128x128xbf16>
    %cst_99 = arith.constant dense<0.000000e+00> : vector<16x128xf32>
    %257 = tpu.matmul %254, %256, %cst_99 {dimension_numbers = #tpu.dot_dimension_numbers<[1], [0], [0], [1], [0, 0, 1, 1], [], []>} : vector<16x128xbf16>, vector<128x128xbf16>, vector<16x128xf32> -> vector<16x128xf32>
    %c0_100 = arith.constant 0 : index
    %c0_101 = arith.constant 0 : index
    %c0_102 = arith.constant 0 : index
    %258 = vector.load %arg16[%c0_100, %c0_101, %c0_102] : memref<2x1x128xf32, #tpu.memory_space<vmem>>, vector<1x1x128xf32>
    %259 = vector.shape_cast %258 : vector<1x1x128xf32> to vector<1x128xf32>
    %260 = vector.broadcast %259 : vector<1x128xf32> to vector<16x128xf32>
    %261 = arith.addf %257, %260 : vector<16x128xf32>
    %cst_103 = arith.constant 5.000000e-01 : f32
    %262 = vector.broadcast %cst_103 : f32 to vector<16x128xf32>
    %263 = arith.mulf %262, %261 : vector<16x128xf32>
    %cst_104 = arith.constant 4.471500e-02 : f32
    %264 = vector.broadcast %cst_104 : f32 to vector<16x128xf32>
    %265 = arith.mulf %264, %261 : vector<16x128xf32>
    %266 = arith.mulf %265, %261 : vector<16x128xf32>
    %267 = arith.mulf %266, %261 : vector<16x128xf32>
    %268 = arith.addf %261, %267 : vector<16x128xf32>
    %cst_105 = arith.constant 0.797884583 : f32
    %269 = vector.broadcast %cst_105 : f32 to vector<16x128xf32>
    %270 = arith.mulf %269, %268 : vector<16x128xf32>
    %271 = math.tanh %270 : vector<16x128xf32>
    %cst_106 = arith.constant 1.000000e+00 : f32
    %272 = vector.broadcast %cst_106 : f32 to vector<16x128xf32>
    %273 = arith.addf %272, %271 : vector<16x128xf32>
    %274 = arith.mulf %263, %273 : vector<16x128xf32>
    %275 = arith.truncf %274 : vector<16x128xf32> to vector<16x128xbf16>
    %c0_107 = arith.constant 0 : index
    %c0_108 = arith.constant 0 : index
    %c0_109 = arith.constant 0 : index
    %276 = vector.load %arg17[%c0_107, %c0_108, %c0_109] : memref<2x128x128xbf16, #tpu.memory_space<vmem>>, vector<1x128x128xbf16>
    %277 = vector.shape_cast %276 : vector<1x128x128xbf16> to vector<128x128xbf16>
    %cst_110 = arith.constant dense<0.000000e+00> : vector<16x128xf32>
    %278 = tpu.matmul %275, %277, %cst_110 {dimension_numbers = #tpu.dot_dimension_numbers<[1], [0], [0], [1], [0, 0, 1, 1], [], []>} : vector<16x128xbf16>, vector<128x128xbf16>, vector<16x128xf32> -> vector<16x128xf32>
    %c0_111 = arith.constant 0 : index
    %c0_112 = arith.constant 0 : index
    %c0_113 = arith.constant 0 : index
    %279 = vector.load %arg18[%c0_111, %c0_112, %c0_113] : memref<2x1x128xf32, #tpu.memory_space<vmem>>, vector<1x1x128xf32>
    %280 = vector.shape_cast %279 : vector<1x1x128xf32> to vector<1x128xf32>
    %281 = vector.broadcast %280 : vector<1x128xf32> to vector<16x128xf32>
    %282 = arith.addf %278, %281 : vector<16x128xf32>
    %283 = arith.addf %253, %282 : vector<16x128xf32>
    %c0_114 = arith.constant 0 : index
    %c0_115 = arith.constant 0 : index
    %c0_116 = arith.constant 0 : index
    %284 = vector.load %arg19[%c0_114, %c0_115, %c0_116] : memref<2x1x128xf32, #tpu.memory_space<vmem>>, vector<1x1x128xf32>
    %285 = vector.shape_cast %284 : vector<1x1x128xf32> to vector<1x128xf32>
    %c0_117 = arith.constant 0 : index
    %c0_118 = arith.constant 0 : index
    %c0_119 = arith.constant 0 : index
    %286 = vector.load %arg20[%c0_117, %c0_118, %c0_119] : memref<2x1x128xf32, #tpu.memory_space<vmem>>, vector<1x1x128xf32>
    %287 = vector.shape_cast %286 : vector<1x1x128xf32> to vector<1x128xf32>
    %cst_120 = arith.constant dense<0.000000e+00> : vector<16xf32>
    %288 = vector.multi_reduction <add>, %283, %cst_120 [1] : vector<16x128xf32> to vector<16xf32>
    %289 = vector.shape_cast %288 : vector<16xf32> to vector<16x1xf32>
    %290 = arith.mulf %283, %283 : vector<16x128xf32>
    %cst_121 = arith.constant dense<0.000000e+00> : vector<16xf32>
    %291 = vector.multi_reduction <add>, %290, %cst_121 [1] : vector<16x128xf32> to vector<16xf32>
    %292 = vector.shape_cast %291 : vector<16xf32> to vector<16x1xf32>
    %cst_122 = arith.constant 3.200000e+01 : f32
    %293 = vector.broadcast %cst_122 : f32 to vector<16x1xf32>
    %294 = arith.divf %289, %293 : vector<16x1xf32>
    %cst_123 = arith.constant 3.200000e+01 : f32
    %295 = vector.broadcast %cst_123 : f32 to vector<16x1xf32>
    %296 = arith.divf %292, %295 : vector<16x1xf32>
    %297 = arith.mulf %294, %294 : vector<16x1xf32>
    %298 = arith.subf %296, %297 : vector<16x1xf32>
    %cst_124 = arith.constant 0.000000e+00 : f32
    %299 = vector.broadcast %cst_124 : f32 to vector<16x1xf32>
    %300 = arith.maximumf %298, %299 : vector<16x1xf32>
    %301 = vector.broadcast %294 : vector<16x1xf32> to vector<16x128xf32>
    %302 = arith.subf %283, %301 : vector<16x128xf32>
    %cst_125 = arith.constant 9.99999996E-13 : f32
    %303 = vector.broadcast %cst_125 : f32 to vector<16x1xf32>
    %304 = arith.addf %300, %303 : vector<16x1xf32>
    %305 = math.rsqrt %304 : vector<16x1xf32>
    %306 = vector.broadcast %305 : vector<16x1xf32> to vector<16x128xf32>
    %307 = arith.mulf %302, %306 : vector<16x128xf32>
    %308 = vector.broadcast %285 : vector<1x128xf32> to vector<16x128xf32>
    %309 = arith.mulf %307, %308 : vector<16x128xf32>
    %310 = vector.broadcast %287 : vector<1x128xf32> to vector<16x128xf32>
    %311 = arith.addf %309, %310 : vector<16x128xf32>
    %312 = arith.truncf %311 : vector<16x128xf32> to vector<16x128xbf16>
    %c1_126 = arith.constant 1 : index
    %c0_127 = arith.constant 0 : index
    %c0_128 = arith.constant 0 : index
    %313 = vector.load %arg5[%c1_126, %c0_127, %c0_128] : memref<2x128x128xbf16, #tpu.memory_space<vmem>>, vector<1x128x128xbf16>
    %314 = vector.shape_cast %313 : vector<1x128x128xbf16> to vector<128x128xbf16>
    %cst_129 = arith.constant dense<0.000000e+00> : vector<16x128xf32>
    %315 = tpu.matmul %312, %314, %cst_129 {dimension_numbers = #tpu.dot_dimension_numbers<[1], [0], [0], [1], [0, 0, 1, 1], [], []>} : vector<16x128xbf16>, vector<128x128xbf16>, vector<16x128xf32> -> vector<16x128xf32>
    %c1_130 = arith.constant 1 : index
    %c0_131 = arith.constant 0 : index
    %c0_132 = arith.constant 0 : index
    %316 = vector.load %arg6[%c1_130, %c0_131, %c0_132] : memref<2x1x128xf32, #tpu.memory_space<vmem>>, vector<1x1x128xf32>
    %317 = vector.shape_cast %316 : vector<1x1x128xf32> to vector<1x128xf32>
    %318 = vector.broadcast %317 : vector<1x128xf32> to vector<16x128xf32>
    %319 = arith.addf %315, %318 : vector<16x128xf32>
    %c1_133 = arith.constant 1 : index
    %c0_134 = arith.constant 0 : index
    %c0_135 = arith.constant 0 : index
    %320 = vector.load %arg7[%c1_133, %c0_134, %c0_135] : memref<2x128x128xbf16, #tpu.memory_space<vmem>>, vector<1x128x128xbf16>
    %321 = vector.shape_cast %320 : vector<1x128x128xbf16> to vector<128x128xbf16>
    %cst_136 = arith.constant dense<0.000000e+00> : vector<16x128xf32>
    %322 = tpu.matmul %312, %321, %cst_136 {dimension_numbers = #tpu.dot_dimension_numbers<[1], [0], [0], [1], [0, 0, 1, 1], [], []>} : vector<16x128xbf16>, vector<128x128xbf16>, vector<16x128xf32> -> vector<16x128xf32>
    %c1_137 = arith.constant 1 : index
    %c0_138 = arith.constant 0 : index
    %c0_139 = arith.constant 0 : index
    %323 = vector.load %arg8[%c1_137, %c0_138, %c0_139] : memref<2x1x128xf32, #tpu.memory_space<vmem>>, vector<1x1x128xf32>
    %324 = vector.shape_cast %323 : vector<1x1x128xf32> to vector<1x128xf32>
    %325 = vector.broadcast %324 : vector<1x128xf32> to vector<16x128xf32>
    %326 = arith.addf %322, %325 : vector<16x128xf32>
    %c1_140 = arith.constant 1 : index
    %c0_141 = arith.constant 0 : index
    %c0_142 = arith.constant 0 : index
    %327 = vector.load %arg9[%c1_140, %c0_141, %c0_142] : memref<2x128x128xbf16, #tpu.memory_space<vmem>>, vector<1x128x128xbf16>
    %328 = vector.shape_cast %327 : vector<1x128x128xbf16> to vector<128x128xbf16>
    %cst_143 = arith.constant dense<0.000000e+00> : vector<16x128xf32>
    %329 = tpu.matmul %312, %328, %cst_143 {dimension_numbers = #tpu.dot_dimension_numbers<[1], [0], [0], [1], [0, 0, 1, 1], [], []>} : vector<16x128xbf16>, vector<128x128xbf16>, vector<16x128xf32> -> vector<16x128xf32>
    %c1_144 = arith.constant 1 : index
    %c0_145 = arith.constant 0 : index
    %c0_146 = arith.constant 0 : index
    %330 = vector.load %arg10[%c1_144, %c0_145, %c0_146] : memref<2x1x128xf32, #tpu.memory_space<vmem>>, vector<1x1x128xf32>
    %331 = vector.shape_cast %330 : vector<1x1x128xf32> to vector<1x128xf32>
    %332 = vector.broadcast %331 : vector<1x128xf32> to vector<16x128xf32>
    %333 = arith.addf %329, %332 : vector<16x128xf32>
    %c0_147 = arith.constant 0 : index
    %c0_148 = arith.constant 0 : index
    %c0_149 = arith.constant 0 : index
    %334 = vector.load %arg2[%c0_147, %c0_148, %c0_149] : memref<2x1x8xf32, #tpu.memory_space<vmem>>, vector<1x1x8xf32>
    %335 = vector.shape_cast %334 : vector<1x1x8xf32> to vector<1x8xf32>
    %336 = vector.extract_strided_slice %319 {offsets = [0, 0], sizes = [8, 8], strides = [1, 1]} : vector<16x128xf32> to vector<8x8xf32>
    %337 = vector.extract_strided_slice %326 {offsets = [0, 0], sizes = [8, 8], strides = [1, 1]} : vector<16x128xf32> to vector<8x8xf32>
    %338 = vector.extract_strided_slice %333 {offsets = [0, 0], sizes = [8, 8], strides = [1, 1]} : vector<16x128xf32> to vector<8x8xf32>
    %339 = tpu.transpose %337, [1, 0] : vector<8x8xf32> -> vector<8x8xf32>
    %cst_150 = arith.constant dense<0.000000e+00> : vector<8x8xf32>
    %340 = tpu.matmul %336, %339, %cst_150 {dimension_numbers = #tpu.dot_dimension_numbers<[1], [0], [0], [1], [0, 0, 1, 1], [], []>} : vector<8x8xf32>, vector<8x8xf32>, vector<8x8xf32> -> vector<8x8xf32>
    %cst_151 = arith.constant 0.353553385 : f32
    %341 = vector.broadcast %cst_151 : f32 to vector<8x8xf32>
    %342 = arith.mulf %340, %341 : vector<8x8xf32>
    %343 = vector.broadcast %335 : vector<1x8xf32> to vector<8x8xf32>
    %344 = arith.addf %342, %343 : vector<8x8xf32>
    %cst_152 = arith.constant dense<0xFF800000> : vector<8xf32>
    %345 = vector.multi_reduction <maximumf>, %344, %cst_152 [1] : vector<8x8xf32> to vector<8xf32>
    %346 = vector.shape_cast %345 : vector<8xf32> to vector<8x1xf32>
    %347 = vector.broadcast %346 : vector<8x1xf32> to vector<8x8xf32>
    %348 = arith.subf %344, %347 : vector<8x8xf32>
    %349 = math.exp %348 : vector<8x8xf32>
    %cst_153 = arith.constant dense<0.000000e+00> : vector<8xf32>
    %350 = vector.multi_reduction <add>, %349, %cst_153 [1] : vector<8x8xf32> to vector<8xf32>
    %351 = vector.shape_cast %350 : vector<8xf32> to vector<8x1xf32>
    %352 = tpu.reciprocal %351 {approx = true} : vector<8x1xf32> -> vector<8x1xf32>
    %353 = vector.broadcast %352 : vector<8x1xf32> to vector<8x8xf32>
    %354 = arith.mulf %349, %353 : vector<8x8xf32>
    %cst_154 = arith.constant dense<0.000000e+00> : vector<8x8xf32>
    %355 = tpu.matmul %354, %338, %cst_154 {dimension_numbers = #tpu.dot_dimension_numbers<[1], [0], [0], [1], [0, 0, 1, 1], [], []>} : vector<8x8xf32>, vector<8x8xf32>, vector<8x8xf32> -> vector<8x8xf32>
    %356 = vector.extract_strided_slice %319 {offsets = [0, 8], sizes = [8, 8], strides = [1, 1]} : vector<16x128xf32> to vector<8x8xf32>
    %357 = vector.extract_strided_slice %326 {offsets = [0, 8], sizes = [8, 8], strides = [1, 1]} : vector<16x128xf32> to vector<8x8xf32>
    %358 = vector.extract_strided_slice %333 {offsets = [0, 8], sizes = [8, 8], strides = [1, 1]} : vector<16x128xf32> to vector<8x8xf32>
    %359 = tpu.transpose %357, [1, 0] : vector<8x8xf32> -> vector<8x8xf32>
    %cst_155 = arith.constant dense<0.000000e+00> : vector<8x8xf32>
    %360 = tpu.matmul %356, %359, %cst_155 {dimension_numbers = #tpu.dot_dimension_numbers<[1], [0], [0], [1], [0, 0, 1, 1], [], []>} : vector<8x8xf32>, vector<8x8xf32>, vector<8x8xf32> -> vector<8x8xf32>
    %cst_156 = arith.constant 0.353553385 : f32
    %361 = vector.broadcast %cst_156 : f32 to vector<8x8xf32>
    %362 = arith.mulf %360, %361 : vector<8x8xf32>
    %363 = vector.broadcast %335 : vector<1x8xf32> to vector<8x8xf32>
    %364 = arith.addf %362, %363 : vector<8x8xf32>
    %cst_157 = arith.constant dense<0xFF800000> : vector<8xf32>
    %365 = vector.multi_reduction <maximumf>, %364, %cst_157 [1] : vector<8x8xf32> to vector<8xf32>
    %366 = vector.shape_cast %365 : vector<8xf32> to vector<8x1xf32>
    %367 = vector.broadcast %366 : vector<8x1xf32> to vector<8x8xf32>
    %368 = arith.subf %364, %367 : vector<8x8xf32>
    %369 = math.exp %368 : vector<8x8xf32>
    %cst_158 = arith.constant dense<0.000000e+00> : vector<8xf32>
    %370 = vector.multi_reduction <add>, %369, %cst_158 [1] : vector<8x8xf32> to vector<8xf32>
    %371 = vector.shape_cast %370 : vector<8xf32> to vector<8x1xf32>
    %372 = tpu.reciprocal %371 {approx = true} : vector<8x1xf32> -> vector<8x1xf32>
    %373 = vector.broadcast %372 : vector<8x1xf32> to vector<8x8xf32>
    %374 = arith.mulf %369, %373 : vector<8x8xf32>
    %cst_159 = arith.constant dense<0.000000e+00> : vector<8x8xf32>
    %375 = tpu.matmul %374, %358, %cst_159 {dimension_numbers = #tpu.dot_dimension_numbers<[1], [0], [0], [1], [0, 0, 1, 1], [], []>} : vector<8x8xf32>, vector<8x8xf32>, vector<8x8xf32> -> vector<8x8xf32>
    %376 = vector.extract_strided_slice %319 {offsets = [0, 16], sizes = [8, 8], strides = [1, 1]} : vector<16x128xf32> to vector<8x8xf32>
    %377 = vector.extract_strided_slice %326 {offsets = [0, 16], sizes = [8, 8], strides = [1, 1]} : vector<16x128xf32> to vector<8x8xf32>
    %378 = vector.extract_strided_slice %333 {offsets = [0, 16], sizes = [8, 8], strides = [1, 1]} : vector<16x128xf32> to vector<8x8xf32>
    %379 = tpu.transpose %377, [1, 0] : vector<8x8xf32> -> vector<8x8xf32>
    %cst_160 = arith.constant dense<0.000000e+00> : vector<8x8xf32>
    %380 = tpu.matmul %376, %379, %cst_160 {dimension_numbers = #tpu.dot_dimension_numbers<[1], [0], [0], [1], [0, 0, 1, 1], [], []>} : vector<8x8xf32>, vector<8x8xf32>, vector<8x8xf32> -> vector<8x8xf32>
    %cst_161 = arith.constant 0.353553385 : f32
    %381 = vector.broadcast %cst_161 : f32 to vector<8x8xf32>
    %382 = arith.mulf %380, %381 : vector<8x8xf32>
    %383 = vector.broadcast %335 : vector<1x8xf32> to vector<8x8xf32>
    %384 = arith.addf %382, %383 : vector<8x8xf32>
    %cst_162 = arith.constant dense<0xFF800000> : vector<8xf32>
    %385 = vector.multi_reduction <maximumf>, %384, %cst_162 [1] : vector<8x8xf32> to vector<8xf32>
    %386 = vector.shape_cast %385 : vector<8xf32> to vector<8x1xf32>
    %387 = vector.broadcast %386 : vector<8x1xf32> to vector<8x8xf32>
    %388 = arith.subf %384, %387 : vector<8x8xf32>
    %389 = math.exp %388 : vector<8x8xf32>
    %cst_163 = arith.constant dense<0.000000e+00> : vector<8xf32>
    %390 = vector.multi_reduction <add>, %389, %cst_163 [1] : vector<8x8xf32> to vector<8xf32>
    %391 = vector.shape_cast %390 : vector<8xf32> to vector<8x1xf32>
    %392 = tpu.reciprocal %391 {approx = true} : vector<8x1xf32> -> vector<8x1xf32>
    %393 = vector.broadcast %392 : vector<8x1xf32> to vector<8x8xf32>
    %394 = arith.mulf %389, %393 : vector<8x8xf32>
    %cst_164 = arith.constant dense<0.000000e+00> : vector<8x8xf32>
    %395 = tpu.matmul %394, %378, %cst_164 {dimension_numbers = #tpu.dot_dimension_numbers<[1], [0], [0], [1], [0, 0, 1, 1], [], []>} : vector<8x8xf32>, vector<8x8xf32>, vector<8x8xf32> -> vector<8x8xf32>
    %396 = vector.extract_strided_slice %319 {offsets = [0, 24], sizes = [8, 8], strides = [1, 1]} : vector<16x128xf32> to vector<8x8xf32>
    %397 = vector.extract_strided_slice %326 {offsets = [0, 24], sizes = [8, 8], strides = [1, 1]} : vector<16x128xf32> to vector<8x8xf32>
    %398 = vector.extract_strided_slice %333 {offsets = [0, 24], sizes = [8, 8], strides = [1, 1]} : vector<16x128xf32> to vector<8x8xf32>
    %399 = tpu.transpose %397, [1, 0] : vector<8x8xf32> -> vector<8x8xf32>
    %cst_165 = arith.constant dense<0.000000e+00> : vector<8x8xf32>
    %400 = tpu.matmul %396, %399, %cst_165 {dimension_numbers = #tpu.dot_dimension_numbers<[1], [0], [0], [1], [0, 0, 1, 1], [], []>} : vector<8x8xf32>, vector<8x8xf32>, vector<8x8xf32> -> vector<8x8xf32>
    %cst_166 = arith.constant 0.353553385 : f32
    %401 = vector.broadcast %cst_166 : f32 to vector<8x8xf32>
    %402 = arith.mulf %400, %401 : vector<8x8xf32>
    %403 = vector.broadcast %335 : vector<1x8xf32> to vector<8x8xf32>
    %404 = arith.addf %402, %403 : vector<8x8xf32>
    %cst_167 = arith.constant dense<0xFF800000> : vector<8xf32>
    %405 = vector.multi_reduction <maximumf>, %404, %cst_167 [1] : vector<8x8xf32> to vector<8xf32>
    %406 = vector.shape_cast %405 : vector<8xf32> to vector<8x1xf32>
    %407 = vector.broadcast %406 : vector<8x1xf32> to vector<8x8xf32>
    %408 = arith.subf %404, %407 : vector<8x8xf32>
    %409 = math.exp %408 : vector<8x8xf32>
    %cst_168 = arith.constant dense<0.000000e+00> : vector<8xf32>
    %410 = vector.multi_reduction <add>, %409, %cst_168 [1] : vector<8x8xf32> to vector<8xf32>
    %411 = vector.shape_cast %410 : vector<8xf32> to vector<8x1xf32>
    %412 = tpu.reciprocal %411 {approx = true} : vector<8x1xf32> -> vector<8x1xf32>
    %413 = vector.broadcast %412 : vector<8x1xf32> to vector<8x8xf32>
    %414 = arith.mulf %409, %413 : vector<8x8xf32>
    %cst_169 = arith.constant dense<0.000000e+00> : vector<8x8xf32>
    %415 = tpu.matmul %414, %398, %cst_169 {dimension_numbers = #tpu.dot_dimension_numbers<[1], [0], [0], [1], [0, 0, 1, 1], [], []>} : vector<8x8xf32>, vector<8x8xf32>, vector<8x8xf32> -> vector<8x8xf32>
    %416 = tpu.concatenate %355, %375, %395, %415 in 1 : vector<8x8xf32>, vector<8x8xf32>, vector<8x8xf32>, vector<8x8xf32> -> vector<8x32xf32>
    %c1_170 = arith.constant 1 : index
    %c0_171 = arith.constant 0 : index
    %c0_172 = arith.constant 0 : index
    %417 = vector.load %arg2[%c1_170, %c0_171, %c0_172] : memref<2x1x8xf32, #tpu.memory_space<vmem>>, vector<1x1x8xf32>
    %418 = vector.shape_cast %417 : vector<1x1x8xf32> to vector<1x8xf32>
    %419 = vector.extract_strided_slice %319 {offsets = [8, 0], sizes = [8, 8], strides = [1, 1]} : vector<16x128xf32> to vector<8x8xf32>
    %420 = vector.extract_strided_slice %326 {offsets = [8, 0], sizes = [8, 8], strides = [1, 1]} : vector<16x128xf32> to vector<8x8xf32>
    %421 = vector.extract_strided_slice %333 {offsets = [8, 0], sizes = [8, 8], strides = [1, 1]} : vector<16x128xf32> to vector<8x8xf32>
    %422 = tpu.transpose %420, [1, 0] : vector<8x8xf32> -> vector<8x8xf32>
    %cst_173 = arith.constant dense<0.000000e+00> : vector<8x8xf32>
    %423 = tpu.matmul %419, %422, %cst_173 {dimension_numbers = #tpu.dot_dimension_numbers<[1], [0], [0], [1], [0, 0, 1, 1], [], []>} : vector<8x8xf32>, vector<8x8xf32>, vector<8x8xf32> -> vector<8x8xf32>
    %cst_174 = arith.constant 0.353553385 : f32
    %424 = vector.broadcast %cst_174 : f32 to vector<8x8xf32>
    %425 = arith.mulf %423, %424 : vector<8x8xf32>
    %426 = vector.broadcast %418 : vector<1x8xf32> to vector<8x8xf32>
    %427 = arith.addf %425, %426 : vector<8x8xf32>
    %cst_175 = arith.constant dense<0xFF800000> : vector<8xf32>
    %428 = vector.multi_reduction <maximumf>, %427, %cst_175 [1] : vector<8x8xf32> to vector<8xf32>
    %429 = vector.shape_cast %428 : vector<8xf32> to vector<8x1xf32>
    %430 = vector.broadcast %429 : vector<8x1xf32> to vector<8x8xf32>
    %431 = arith.subf %427, %430 : vector<8x8xf32>
    %432 = math.exp %431 : vector<8x8xf32>
    %cst_176 = arith.constant dense<0.000000e+00> : vector<8xf32>
    %433 = vector.multi_reduction <add>, %432, %cst_176 [1] : vector<8x8xf32> to vector<8xf32>
    %434 = vector.shape_cast %433 : vector<8xf32> to vector<8x1xf32>
    %435 = tpu.reciprocal %434 {approx = true} : vector<8x1xf32> -> vector<8x1xf32>
    %436 = vector.broadcast %435 : vector<8x1xf32> to vector<8x8xf32>
    %437 = arith.mulf %432, %436 : vector<8x8xf32>
    %cst_177 = arith.constant dense<0.000000e+00> : vector<8x8xf32>
    %438 = tpu.matmul %437, %421, %cst_177 {dimension_numbers = #tpu.dot_dimension_numbers<[1], [0], [0], [1], [0, 0, 1, 1], [], []>} : vector<8x8xf32>, vector<8x8xf32>, vector<8x8xf32> -> vector<8x8xf32>
    %439 = vector.extract_strided_slice %319 {offsets = [8, 8], sizes = [8, 8], strides = [1, 1]} : vector<16x128xf32> to vector<8x8xf32>
    %440 = vector.extract_strided_slice %326 {offsets = [8, 8], sizes = [8, 8], strides = [1, 1]} : vector<16x128xf32> to vector<8x8xf32>
    %441 = vector.extract_strided_slice %333 {offsets = [8, 8], sizes = [8, 8], strides = [1, 1]} : vector<16x128xf32> to vector<8x8xf32>
    %442 = tpu.transpose %440, [1, 0] : vector<8x8xf32> -> vector<8x8xf32>
    %cst_178 = arith.constant dense<0.000000e+00> : vector<8x8xf32>
    %443 = tpu.matmul %439, %442, %cst_178 {dimension_numbers = #tpu.dot_dimension_numbers<[1], [0], [0], [1], [0, 0, 1, 1], [], []>} : vector<8x8xf32>, vector<8x8xf32>, vector<8x8xf32> -> vector<8x8xf32>
    %cst_179 = arith.constant 0.353553385 : f32
    %444 = vector.broadcast %cst_179 : f32 to vector<8x8xf32>
    %445 = arith.mulf %443, %444 : vector<8x8xf32>
    %446 = vector.broadcast %418 : vector<1x8xf32> to vector<8x8xf32>
    %447 = arith.addf %445, %446 : vector<8x8xf32>
    %cst_180 = arith.constant dense<0xFF800000> : vector<8xf32>
    %448 = vector.multi_reduction <maximumf>, %447, %cst_180 [1] : vector<8x8xf32> to vector<8xf32>
    %449 = vector.shape_cast %448 : vector<8xf32> to vector<8x1xf32>
    %450 = vector.broadcast %449 : vector<8x1xf32> to vector<8x8xf32>
    %451 = arith.subf %447, %450 : vector<8x8xf32>
    %452 = math.exp %451 : vector<8x8xf32>
    %cst_181 = arith.constant dense<0.000000e+00> : vector<8xf32>
    %453 = vector.multi_reduction <add>, %452, %cst_181 [1] : vector<8x8xf32> to vector<8xf32>
    %454 = vector.shape_cast %453 : vector<8xf32> to vector<8x1xf32>
    %455 = tpu.reciprocal %454 {approx = true} : vector<8x1xf32> -> vector<8x1xf32>
    %456 = vector.broadcast %455 : vector<8x1xf32> to vector<8x8xf32>
    %457 = arith.mulf %452, %456 : vector<8x8xf32>
    %cst_182 = arith.constant dense<0.000000e+00> : vector<8x8xf32>
    %458 = tpu.matmul %457, %441, %cst_182 {dimension_numbers = #tpu.dot_dimension_numbers<[1], [0], [0], [1], [0, 0, 1, 1], [], []>} : vector<8x8xf32>, vector<8x8xf32>, vector<8x8xf32> -> vector<8x8xf32>
    %459 = vector.extract_strided_slice %319 {offsets = [8, 16], sizes = [8, 8], strides = [1, 1]} : vector<16x128xf32> to vector<8x8xf32>
    %460 = vector.extract_strided_slice %326 {offsets = [8, 16], sizes = [8, 8], strides = [1, 1]} : vector<16x128xf32> to vector<8x8xf32>
    %461 = vector.extract_strided_slice %333 {offsets = [8, 16], sizes = [8, 8], strides = [1, 1]} : vector<16x128xf32> to vector<8x8xf32>
    %462 = tpu.transpose %460, [1, 0] : vector<8x8xf32> -> vector<8x8xf32>
    %cst_183 = arith.constant dense<0.000000e+00> : vector<8x8xf32>
    %463 = tpu.matmul %459, %462, %cst_183 {dimension_numbers = #tpu.dot_dimension_numbers<[1], [0], [0], [1], [0, 0, 1, 1], [], []>} : vector<8x8xf32>, vector<8x8xf32>, vector<8x8xf32> -> vector<8x8xf32>
    %cst_184 = arith.constant 0.353553385 : f32
    %464 = vector.broadcast %cst_184 : f32 to vector<8x8xf32>
    %465 = arith.mulf %463, %464 : vector<8x8xf32>
    %466 = vector.broadcast %418 : vector<1x8xf32> to vector<8x8xf32>
    %467 = arith.addf %465, %466 : vector<8x8xf32>
    %cst_185 = arith.constant dense<0xFF800000> : vector<8xf32>
    %468 = vector.multi_reduction <maximumf>, %467, %cst_185 [1] : vector<8x8xf32> to vector<8xf32>
    %469 = vector.shape_cast %468 : vector<8xf32> to vector<8x1xf32>
    %470 = vector.broadcast %469 : vector<8x1xf32> to vector<8x8xf32>
    %471 = arith.subf %467, %470 : vector<8x8xf32>
    %472 = math.exp %471 : vector<8x8xf32>
    %cst_186 = arith.constant dense<0.000000e+00> : vector<8xf32>
    %473 = vector.multi_reduction <add>, %472, %cst_186 [1] : vector<8x8xf32> to vector<8xf32>
    %474 = vector.shape_cast %473 : vector<8xf32> to vector<8x1xf32>
    %475 = tpu.reciprocal %474 {approx = true} : vector<8x1xf32> -> vector<8x1xf32>
    %476 = vector.broadcast %475 : vector<8x1xf32> to vector<8x8xf32>
    %477 = arith.mulf %472, %476 : vector<8x8xf32>
    %cst_187 = arith.constant dense<0.000000e+00> : vector<8x8xf32>
    %478 = tpu.matmul %477, %461, %cst_187 {dimension_numbers = #tpu.dot_dimension_numbers<[1], [0], [0], [1], [0, 0, 1, 1], [], []>} : vector<8x8xf32>, vector<8x8xf32>, vector<8x8xf32> -> vector<8x8xf32>
    %479 = vector.extract_strided_slice %319 {offsets = [8, 24], sizes = [8, 8], strides = [1, 1]} : vector<16x128xf32> to vector<8x8xf32>
    %480 = vector.extract_strided_slice %326 {offsets = [8, 24], sizes = [8, 8], strides = [1, 1]} : vector<16x128xf32> to vector<8x8xf32>
    %481 = vector.extract_strided_slice %333 {offsets = [8, 24], sizes = [8, 8], strides = [1, 1]} : vector<16x128xf32> to vector<8x8xf32>
    %482 = tpu.transpose %480, [1, 0] : vector<8x8xf32> -> vector<8x8xf32>
    %cst_188 = arith.constant dense<0.000000e+00> : vector<8x8xf32>
    %483 = tpu.matmul %479, %482, %cst_188 {dimension_numbers = #tpu.dot_dimension_numbers<[1], [0], [0], [1], [0, 0, 1, 1], [], []>} : vector<8x8xf32>, vector<8x8xf32>, vector<8x8xf32> -> vector<8x8xf32>
    %cst_189 = arith.constant 0.353553385 : f32
    %484 = vector.broadcast %cst_189 : f32 to vector<8x8xf32>
    %485 = arith.mulf %483, %484 : vector<8x8xf32>
    %486 = vector.broadcast %418 : vector<1x8xf32> to vector<8x8xf32>
    %487 = arith.addf %485, %486 : vector<8x8xf32>
    %cst_190 = arith.constant dense<0xFF800000> : vector<8xf32>
    %488 = vector.multi_reduction <maximumf>, %487, %cst_190 [1] : vector<8x8xf32> to vector<8xf32>
    %489 = vector.shape_cast %488 : vector<8xf32> to vector<8x1xf32>
    %490 = vector.broadcast %489 : vector<8x1xf32> to vector<8x8xf32>
    %491 = arith.subf %487, %490 : vector<8x8xf32>
    %492 = math.exp %491 : vector<8x8xf32>
    %cst_191 = arith.constant dense<0.000000e+00> : vector<8xf32>
    %493 = vector.multi_reduction <add>, %492, %cst_191 [1] : vector<8x8xf32> to vector<8xf32>
    %494 = vector.shape_cast %493 : vector<8xf32> to vector<8x1xf32>
    %495 = tpu.reciprocal %494 {approx = true} : vector<8x1xf32> -> vector<8x1xf32>
    %496 = vector.broadcast %495 : vector<8x1xf32> to vector<8x8xf32>
    %497 = arith.mulf %492, %496 : vector<8x8xf32>
    %cst_192 = arith.constant dense<0.000000e+00> : vector<8x8xf32>
    %498 = tpu.matmul %497, %481, %cst_192 {dimension_numbers = #tpu.dot_dimension_numbers<[1], [0], [0], [1], [0, 0, 1, 1], [], []>} : vector<8x8xf32>, vector<8x8xf32>, vector<8x8xf32> -> vector<8x8xf32>
    %499 = tpu.concatenate %438, %458, %478, %498 in 1 : vector<8x8xf32>, vector<8x8xf32>, vector<8x8xf32>, vector<8x8xf32> -> vector<8x32xf32>
    %500 = tpu.concatenate %416, %499 in 0 : vector<8x32xf32>, vector<8x32xf32> -> vector<16x32xf32>
    %501 = arith.truncf %500 : vector<16x32xf32> to vector<16x32xbf16>
    %c1_193 = arith.constant 1 : index
    %c0_194 = arith.constant 0 : index
    %c0_195 = arith.constant 0 : index
    %502 = vector.load %arg11[%c1_193, %c0_194, %c0_195] : memref<2x32x128xbf16, #tpu.memory_space<vmem>>, vector<1x32x128xbf16>
    %503 = vector.shape_cast %502 : vector<1x32x128xbf16> to vector<32x128xbf16>
    %cst_196 = arith.constant dense<0.000000e+00> : vector<16x128xf32>
    %504 = tpu.matmul %501, %503, %cst_196 {dimension_numbers = #tpu.dot_dimension_numbers<[1], [0], [0], [1], [0, 0, 1, 1], [], []>} : vector<16x32xbf16>, vector<32x128xbf16>, vector<16x128xf32> -> vector<16x128xf32>
    %c1_197 = arith.constant 1 : index
    %c0_198 = arith.constant 0 : index
    %c0_199 = arith.constant 0 : index
    %505 = vector.load %arg12[%c1_197, %c0_198, %c0_199] : memref<2x1x128xf32, #tpu.memory_space<vmem>>, vector<1x1x128xf32>
    %506 = vector.shape_cast %505 : vector<1x1x128xf32> to vector<1x128xf32>
    %507 = vector.broadcast %506 : vector<1x128xf32> to vector<16x128xf32>
    %508 = arith.addf %504, %507 : vector<16x128xf32>
    %509 = arith.addf %311, %508 : vector<16x128xf32>
    %c1_200 = arith.constant 1 : index
    %c0_201 = arith.constant 0 : index
    %c0_202 = arith.constant 0 : index
    %510 = vector.load %arg13[%c1_200, %c0_201, %c0_202] : memref<2x1x128xf32, #tpu.memory_space<vmem>>, vector<1x1x128xf32>
    %511 = vector.shape_cast %510 : vector<1x1x128xf32> to vector<1x128xf32>
    %c1_203 = arith.constant 1 : index
    %c0_204 = arith.constant 0 : index
    %c0_205 = arith.constant 0 : index
    %512 = vector.load %arg14[%c1_203, %c0_204, %c0_205] : memref<2x1x128xf32, #tpu.memory_space<vmem>>, vector<1x1x128xf32>
    %513 = vector.shape_cast %512 : vector<1x1x128xf32> to vector<1x128xf32>
    %cst_206 = arith.constant dense<0.000000e+00> : vector<16xf32>
    %514 = vector.multi_reduction <add>, %509, %cst_206 [1] : vector<16x128xf32> to vector<16xf32>
    %515 = vector.shape_cast %514 : vector<16xf32> to vector<16x1xf32>
    %516 = arith.mulf %509, %509 : vector<16x128xf32>
    %cst_207 = arith.constant dense<0.000000e+00> : vector<16xf32>
    %517 = vector.multi_reduction <add>, %516, %cst_207 [1] : vector<16x128xf32> to vector<16xf32>
    %518 = vector.shape_cast %517 : vector<16xf32> to vector<16x1xf32>
    %cst_208 = arith.constant 3.200000e+01 : f32
    %519 = vector.broadcast %cst_208 : f32 to vector<16x1xf32>
    %520 = arith.divf %515, %519 : vector<16x1xf32>
    %cst_209 = arith.constant 3.200000e+01 : f32
    %521 = vector.broadcast %cst_209 : f32 to vector<16x1xf32>
    %522 = arith.divf %518, %521 : vector<16x1xf32>
    %523 = arith.mulf %520, %520 : vector<16x1xf32>
    %524 = arith.subf %522, %523 : vector<16x1xf32>
    %cst_210 = arith.constant 0.000000e+00 : f32
    %525 = vector.broadcast %cst_210 : f32 to vector<16x1xf32>
    %526 = arith.maximumf %524, %525 : vector<16x1xf32>
    %527 = vector.broadcast %520 : vector<16x1xf32> to vector<16x128xf32>
    %528 = arith.subf %509, %527 : vector<16x128xf32>
    %cst_211 = arith.constant 9.99999996E-13 : f32
    %529 = vector.broadcast %cst_211 : f32 to vector<16x1xf32>
    %530 = arith.addf %526, %529 : vector<16x1xf32>
    %531 = math.rsqrt %530 : vector<16x1xf32>
    %532 = vector.broadcast %531 : vector<16x1xf32> to vector<16x128xf32>
    %533 = arith.mulf %528, %532 : vector<16x128xf32>
    %534 = vector.broadcast %511 : vector<1x128xf32> to vector<16x128xf32>
    %535 = arith.mulf %533, %534 : vector<16x128xf32>
    %536 = vector.broadcast %513 : vector<1x128xf32> to vector<16x128xf32>
    %537 = arith.addf %535, %536 : vector<16x128xf32>
    %538 = arith.truncf %537 : vector<16x128xf32> to vector<16x128xbf16>
    %c1_212 = arith.constant 1 : index
    %c0_213 = arith.constant 0 : index
    %c0_214 = arith.constant 0 : index
    %539 = vector.load %arg15[%c1_212, %c0_213, %c0_214] : memref<2x128x128xbf16, #tpu.memory_space<vmem>>, vector<1x128x128xbf16>
    %540 = vector.shape_cast %539 : vector<1x128x128xbf16> to vector<128x128xbf16>
    %cst_215 = arith.constant dense<0.000000e+00> : vector<16x128xf32>
    %541 = tpu.matmul %538, %540, %cst_215 {dimension_numbers = #tpu.dot_dimension_numbers<[1], [0], [0], [1], [0, 0, 1, 1], [], []>} : vector<16x128xbf16>, vector<128x128xbf16>, vector<16x128xf32> -> vector<16x128xf32>
    %c1_216 = arith.constant 1 : index
    %c0_217 = arith.constant 0 : index
    %c0_218 = arith.constant 0 : index
    %542 = vector.load %arg16[%c1_216, %c0_217, %c0_218] : memref<2x1x128xf32, #tpu.memory_space<vmem>>, vector<1x1x128xf32>
    %543 = vector.shape_cast %542 : vector<1x1x128xf32> to vector<1x128xf32>
    %544 = vector.broadcast %543 : vector<1x128xf32> to vector<16x128xf32>
    %545 = arith.addf %541, %544 : vector<16x128xf32>
    %cst_219 = arith.constant 5.000000e-01 : f32
    %546 = vector.broadcast %cst_219 : f32 to vector<16x128xf32>
    %547 = arith.mulf %546, %545 : vector<16x128xf32>
    %cst_220 = arith.constant 4.471500e-02 : f32
    %548 = vector.broadcast %cst_220 : f32 to vector<16x128xf32>
    %549 = arith.mulf %548, %545 : vector<16x128xf32>
    %550 = arith.mulf %549, %545 : vector<16x128xf32>
    %551 = arith.mulf %550, %545 : vector<16x128xf32>
    %552 = arith.addf %545, %551 : vector<16x128xf32>
    %cst_221 = arith.constant 0.797884583 : f32
    %553 = vector.broadcast %cst_221 : f32 to vector<16x128xf32>
    %554 = arith.mulf %553, %552 : vector<16x128xf32>
    %555 = math.tanh %554 : vector<16x128xf32>
    %cst_222 = arith.constant 1.000000e+00 : f32
    %556 = vector.broadcast %cst_222 : f32 to vector<16x128xf32>
    %557 = arith.addf %556, %555 : vector<16x128xf32>
    %558 = arith.mulf %547, %557 : vector<16x128xf32>
    %559 = arith.truncf %558 : vector<16x128xf32> to vector<16x128xbf16>
    %c1_223 = arith.constant 1 : index
    %c0_224 = arith.constant 0 : index
    %c0_225 = arith.constant 0 : index
    %560 = vector.load %arg17[%c1_223, %c0_224, %c0_225] : memref<2x128x128xbf16, #tpu.memory_space<vmem>>, vector<1x128x128xbf16>
    %561 = vector.shape_cast %560 : vector<1x128x128xbf16> to vector<128x128xbf16>
    %cst_226 = arith.constant dense<0.000000e+00> : vector<16x128xf32>
    %562 = tpu.matmul %559, %561, %cst_226 {dimension_numbers = #tpu.dot_dimension_numbers<[1], [0], [0], [1], [0, 0, 1, 1], [], []>} : vector<16x128xbf16>, vector<128x128xbf16>, vector<16x128xf32> -> vector<16x128xf32>
    %c1_227 = arith.constant 1 : index
    %c0_228 = arith.constant 0 : index
    %c0_229 = arith.constant 0 : index
    %563 = vector.load %arg18[%c1_227, %c0_228, %c0_229] : memref<2x1x128xf32, #tpu.memory_space<vmem>>, vector<1x1x128xf32>
    %564 = vector.shape_cast %563 : vector<1x1x128xf32> to vector<1x128xf32>
    %565 = vector.broadcast %564 : vector<1x128xf32> to vector<16x128xf32>
    %566 = arith.addf %562, %565 : vector<16x128xf32>
    %567 = arith.addf %537, %566 : vector<16x128xf32>
    %c1_230 = arith.constant 1 : index
    %c0_231 = arith.constant 0 : index
    %c0_232 = arith.constant 0 : index
    %568 = vector.load %arg19[%c1_230, %c0_231, %c0_232] : memref<2x1x128xf32, #tpu.memory_space<vmem>>, vector<1x1x128xf32>
    %569 = vector.shape_cast %568 : vector<1x1x128xf32> to vector<1x128xf32>
    %c1_233 = arith.constant 1 : index
    %c0_234 = arith.constant 0 : index
    %c0_235 = arith.constant 0 : index
    %570 = vector.load %arg20[%c1_233, %c0_234, %c0_235] : memref<2x1x128xf32, #tpu.memory_space<vmem>>, vector<1x1x128xf32>
    %571 = vector.shape_cast %570 : vector<1x1x128xf32> to vector<1x128xf32>
    %cst_236 = arith.constant dense<0.000000e+00> : vector<16xf32>
    %572 = vector.multi_reduction <add>, %567, %cst_236 [1] : vector<16x128xf32> to vector<16xf32>
    %573 = vector.shape_cast %572 : vector<16xf32> to vector<16x1xf32>
    %574 = arith.mulf %567, %567 : vector<16x128xf32>
    %cst_237 = arith.constant dense<0.000000e+00> : vector<16xf32>
    %575 = vector.multi_reduction <add>, %574, %cst_237 [1] : vector<16x128xf32> to vector<16xf32>
    %576 = vector.shape_cast %575 : vector<16xf32> to vector<16x1xf32>
    %cst_238 = arith.constant 3.200000e+01 : f32
    %577 = vector.broadcast %cst_238 : f32 to vector<16x1xf32>
    %578 = arith.divf %573, %577 : vector<16x1xf32>
    %cst_239 = arith.constant 3.200000e+01 : f32
    %579 = vector.broadcast %cst_239 : f32 to vector<16x1xf32>
    %580 = arith.divf %576, %579 : vector<16x1xf32>
    %581 = arith.mulf %578, %578 : vector<16x1xf32>
    %582 = arith.subf %580, %581 : vector<16x1xf32>
    %cst_240 = arith.constant 0.000000e+00 : f32
    %583 = vector.broadcast %cst_240 : f32 to vector<16x1xf32>
    %584 = arith.maximumf %582, %583 : vector<16x1xf32>
    %585 = vector.broadcast %578 : vector<16x1xf32> to vector<16x128xf32>
    %586 = arith.subf %567, %585 : vector<16x128xf32>
    %cst_241 = arith.constant 9.99999996E-13 : f32
    %587 = vector.broadcast %cst_241 : f32 to vector<16x1xf32>
    %588 = arith.addf %584, %587 : vector<16x1xf32>
    %589 = math.rsqrt %588 : vector<16x1xf32>
    %590 = vector.broadcast %589 : vector<16x1xf32> to vector<16x128xf32>
    %591 = arith.mulf %586, %590 : vector<16x128xf32>
    %592 = vector.broadcast %569 : vector<1x128xf32> to vector<16x128xf32>
    %593 = arith.mulf %591, %592 : vector<16x128xf32>
    %594 = vector.broadcast %571 : vector<1x128xf32> to vector<16x128xf32>
    %595 = arith.addf %593, %594 : vector<16x128xf32>
    %596 = arith.truncf %595 : vector<16x128xf32> to vector<16x128xbf16>
    %c0_242 = arith.constant 0 : index
    %c0_243 = arith.constant 0 : index
    %597 = vector.load %arg21[%c0_242, %c0_243] : memref<128x128xbf16, #tpu.memory_space<vmem>>, vector<128x128xbf16>
    %cst_244 = arith.constant dense<0.000000e+00> : vector<16x128xf32>
    %598 = tpu.matmul %596, %597, %cst_244 {dimension_numbers = #tpu.dot_dimension_numbers<[1], [0], [0], [1], [0, 0, 1, 1], [], []>} : vector<16x128xbf16>, vector<128x128xbf16>, vector<16x128xf32> -> vector<16x128xf32>
    %c0_245 = arith.constant 0 : index
    %c0_246 = arith.constant 0 : index
    %599 = vector.load %arg22[%c0_245, %c0_246] : memref<1x128xf32, #tpu.memory_space<vmem>>, vector<1x128xf32>
    %600 = vector.broadcast %599 : vector<1x128xf32> to vector<16x128xf32>
    %601 = arith.addf %598, %600 : vector<16x128xf32>
    %cst_247 = arith.constant 5.000000e-01 : f32
    %602 = vector.broadcast %cst_247 : f32 to vector<16x128xf32>
    %603 = arith.mulf %602, %601 : vector<16x128xf32>
    %cst_248 = arith.constant 4.471500e-02 : f32
    %604 = vector.broadcast %cst_248 : f32 to vector<16x128xf32>
    %605 = arith.mulf %604, %601 : vector<16x128xf32>
    %606 = arith.mulf %605, %601 : vector<16x128xf32>
    %607 = arith.mulf %606, %601 : vector<16x128xf32>
    %608 = arith.addf %601, %607 : vector<16x128xf32>
    %cst_249 = arith.constant 0.797884583 : f32
    %609 = vector.broadcast %cst_249 : f32 to vector<16x128xf32>
    %610 = arith.mulf %609, %608 : vector<16x128xf32>
    %611 = math.tanh %610 : vector<16x128xf32>
    %cst_250 = arith.constant 1.000000e+00 : f32
    %612 = vector.broadcast %cst_250 : f32 to vector<16x128xf32>
    %613 = arith.addf %612, %611 : vector<16x128xf32>
    %614 = arith.mulf %603, %613 : vector<16x128xf32>
    %c0_251 = arith.constant 0 : index
    %c0_252 = arith.constant 0 : index
    %615 = vector.load %arg23[%c0_251, %c0_252] : memref<1x128xf32, #tpu.memory_space<vmem>>, vector<1x128xf32>
    %c0_253 = arith.constant 0 : index
    %c0_254 = arith.constant 0 : index
    %616 = vector.load %arg24[%c0_253, %c0_254] : memref<1x128xf32, #tpu.memory_space<vmem>>, vector<1x128xf32>
    %cst_255 = arith.constant dense<0.000000e+00> : vector<16xf32>
    %617 = vector.multi_reduction <add>, %614, %cst_255 [1] : vector<16x128xf32> to vector<16xf32>
    %618 = vector.shape_cast %617 : vector<16xf32> to vector<16x1xf32>
    %619 = arith.mulf %614, %614 : vector<16x128xf32>
    %cst_256 = arith.constant dense<0.000000e+00> : vector<16xf32>
    %620 = vector.multi_reduction <add>, %619, %cst_256 [1] : vector<16x128xf32> to vector<16xf32>
    %621 = vector.shape_cast %620 : vector<16xf32> to vector<16x1xf32>
    %cst_257 = arith.constant 3.200000e+01 : f32
    %622 = vector.broadcast %cst_257 : f32 to vector<16x1xf32>
    %623 = arith.divf %618, %622 : vector<16x1xf32>
    %cst_258 = arith.constant 3.200000e+01 : f32
    %624 = vector.broadcast %cst_258 : f32 to vector<16x1xf32>
    %625 = arith.divf %621, %624 : vector<16x1xf32>
    %626 = arith.mulf %623, %623 : vector<16x1xf32>
    %627 = arith.subf %625, %626 : vector<16x1xf32>
    %cst_259 = arith.constant 0.000000e+00 : f32
    %628 = vector.broadcast %cst_259 : f32 to vector<16x1xf32>
    %629 = arith.maximumf %627, %628 : vector<16x1xf32>
    %630 = vector.broadcast %623 : vector<16x1xf32> to vector<16x128xf32>
    %631 = arith.subf %614, %630 : vector<16x128xf32>
    %cst_260 = arith.constant 9.99999996E-13 : f32
    %632 = vector.broadcast %cst_260 : f32 to vector<16x1xf32>
    %633 = arith.addf %629, %632 : vector<16x1xf32>
    %634 = math.rsqrt %633 : vector<16x1xf32>
    %635 = vector.broadcast %634 : vector<16x1xf32> to vector<16x128xf32>
    %636 = arith.mulf %631, %635 : vector<16x128xf32>
    %637 = vector.broadcast %615 : vector<1x128xf32> to vector<16x128xf32>
    %638 = arith.mulf %636, %637 : vector<16x128xf32>
    %639 = vector.broadcast %616 : vector<1x128xf32> to vector<16x128xf32>
    %640 = arith.addf %638, %639 : vector<16x128xf32>
    %641 = arith.truncf %640 : vector<16x128xf32> to vector<16x128xbf16>
    %c0_261 = arith.constant 0 : index
    %c0_262 = arith.constant 0 : index
    %642 = vector.load %arg25[%c0_261, %c0_262] : memref<128x128xbf16, #tpu.memory_space<vmem>>, vector<128x128xbf16>
    %cst_263 = arith.constant dense<0.000000e+00> : vector<16x128xf32>
    %643 = tpu.matmul %641, %642, %cst_263 {dimension_numbers = #tpu.dot_dimension_numbers<[1], [0], [0], [1], [0, 0, 1, 1], [], []>} : vector<16x128xbf16>, vector<128x128xbf16>, vector<16x128xf32> -> vector<16x128xf32>
    %644 = vector.shape_cast %643 : vector<16x128xf32> to vector<2x8x128xf32>
    %c0_264 = arith.constant 0 : index
    %c0_265 = arith.constant 0 : index
    %c0_266 = arith.constant 0 : index
    %645 = vector.load %arg28[%c0_264, %c0_265, %c0_266] : memref<2x8x128xf32, #tpu.memory_space<vmem>>, vector<2x8x128xf32>
    tpu.vector_store %arg28[%c0_264, %c0_265, %c0_266], %644 {strides = array<i32>} : memref<2x8x128xf32, #tpu.memory_space<vmem>>, vector<2x8x128xf32>,
    %646 = arith.truncf %595 : vector<16x128xf32> to vector<16x128xbf16>
    %c0_267 = arith.constant 0 : index
    %c0_268 = arith.constant 0 : index
    %647 = vector.load %arg26[%c0_267, %c0_268] : memref<128x128xbf16, #tpu.memory_space<vmem>>, vector<128x128xbf16>
    %cst_269 = arith.constant dense<0.000000e+00> : vector<16x128xf32>
    %648 = tpu.matmul %646, %647, %cst_269 {dimension_numbers = #tpu.dot_dimension_numbers<[1], [0], [0], [1], [0, 0, 1, 1], [], []>} : vector<16x128xbf16>, vector<128x128xbf16>, vector<16x128xf32> -> vector<16x128xf32>
    %c0_270 = arith.constant 0 : index
    %c0_271 = arith.constant 0 : index
    %649 = vector.load %arg27[%c0_270, %c0_271] : memref<1x128xf32, #tpu.memory_space<vmem>>, vector<1x128xf32>
    %650 = vector.broadcast %649 : vector<1x128xf32> to vector<16x128xf32>
    %651 = arith.addf %648, %650 : vector<16x128xf32>
    %652 = vector.extract_strided_slice %651 {offsets = [0, 0], sizes = [1, 128], strides = [1, 1]} : vector<16x128xf32> to vector<1x128xf32>
    %c0_272 = arith.constant 0 : index
    %c0_273 = arith.constant 0 : index
    %c0_274 = arith.constant 0 : index
    %653 = vector.load %arg29[%c0_272, %c0_273, %c0_274] : memref<2x1x128xf32, #tpu.memory_space<vmem>>, vector<1x1x128xf32>
    %654 = vector.shape_cast %653 : vector<1x1x128xf32> to vector<1x128xf32>
    %655 = vector.shape_cast %652 : vector<1x128xf32> to vector<1x1x128xf32>
    tpu.vector_store %arg29[%c0_272, %c0_273, %c0_274], %655 {strides = array<i32>} : memref<2x1x128xf32, #tpu.memory_space<vmem>>, vector<1x1x128xf32>,
    %656 = vector.extract_strided_slice %651 {offsets = [8, 0], sizes = [1, 128], strides = [1, 1]} : vector<16x128xf32> to vector<1x128xf32>
    %c1_275 = arith.constant 1 : index
    %c0_276 = arith.constant 0 : index
    %c0_277 = arith.constant 0 : index
    %657 = vector.load %arg29[%c1_275, %c0_276, %c0_277] : memref<2x1x128xf32, #tpu.memory_space<vmem>>, vector<1x1x128xf32>
    %658 = vector.shape_cast %657 : vector<1x1x128xf32> to vector<1x128xf32>
    %659 = vector.shape_cast %656 : vector<1x128xf32> to vector<1x1x128xf32>
    tpu.vector_store %arg29[%c1_275, %c0_276, %c0_277], %659 {strides = array<i32>} : memref<2x1x128xf32, #tpu.memory_space<vmem>>, vector<1x1x128xf32>,
    return
  }
  func.func @transform_0(%arg0: i32) -> (i32, i32, i32) {
    %c0_i32 = arith.constant 0 : i32
    %c0_i32_0 = arith.constant 0 : i32
    %c0_i32_1 = arith.constant 0 : i32
    return %arg0, %c0_i32, %c0_i32_0 : i32, i32, i32
  }
  func.func @transform_1(%arg0: i32) -> (i32, i32, i32) {
    %c0_i32 = arith.constant 0 : i32
    %c0_i32_0 = arith.constant 0 : i32
    %c0_i32_1 = arith.constant 0 : i32
    return %arg0, %c0_i32, %c0_i32_0 : i32, i32, i32
  }
  func.func @transform_2(%arg0: i32) -> (i32, i32) {
    %c0_i32 = arith.constant 0 : i32
    %c0_i32_0 = arith.constant 0 : i32
    %c0_i32_1 = arith.constant 0 : i32
    return %c0_i32, %c0_i32_0 : i32, i32
  }
  func.func @transform_3(%arg0: i32) -> (i32, i32) {
    %c0_i32 = arith.constant 0 : i32
    %c0_i32_0 = arith.constant 0 : i32
    %c0_i32_1 = arith.constant 0 : i32
    return %c0_i32, %c0_i32_0 : i32, i32
  }
  func.func @transform_4(%arg0: i32) -> (i32, i32, i32) {
    %c0_i32 = arith.constant 0 : i32
    %c0_i32_0 = arith.constant 0 : i32
    %c0_i32_1 = arith.constant 0 : i32
    %c0_i32_2 = arith.constant 0 : i32
    return %c0_i32, %c0_i32_0, %c0_i32_1 : i32, i32, i32
  }
  func.func @transform_5(%arg0: i32) -> (i32, i32, i32) {
    %c0_i32 = arith.constant 0 : i32
    %c0_i32_0 = arith.constant 0 : i32
    %c0_i32_1 = arith.constant 0 : i32
    %c0_i32_2 = arith.constant 0 : i32
    return %c0_i32, %c0_i32_0, %c0_i32_1 : i32, i32, i32
  }
  func.func @transform_6(%arg0: i32) -> (i32, i32, i32) {
    %c0_i32 = arith.constant 0 : i32
    %c0_i32_0 = arith.constant 0 : i32
    %c0_i32_1 = arith.constant 0 : i32
    %c0_i32_2 = arith.constant 0 : i32
    return %c0_i32, %c0_i32_0, %c0_i32_1 : i32, i32, i32
  }
  func.func @transform_7(%arg0: i32) -> (i32, i32, i32) {
    %c0_i32 = arith.constant 0 : i32
    %c0_i32_0 = arith.constant 0 : i32
    %c0_i32_1 = arith.constant 0 : i32
    %c0_i32_2 = arith.constant 0 : i32
    return %c0_i32, %c0_i32_0, %c0_i32_1 : i32, i32, i32
  }
  func.func @transform_8(%arg0: i32) -> (i32, i32, i32) {
    %c0_i32 = arith.constant 0 : i32
    %c0_i32_0 = arith.constant 0 : i32
    %c0_i32_1 = arith.constant 0 : i32
    %c0_i32_2 = arith.constant 0 : i32
    return %c0_i32, %c0_i32_0, %c0_i32_1 : i32, i32, i32
  }
  func.func @transform_9(%arg0: i32) -> (i32, i32, i32) {
    %c0_i32 = arith.constant 0 : i32
    %c0_i32_0 = arith.constant 0 : i32
    %c0_i32_1 = arith.constant 0 : i32
    %c0_i32_2 = arith.constant 0 : i32
    return %c0_i32, %c0_i32_0, %c0_i32_1 : i32, i32, i32
  }
  func.func @transform_10(%arg0: i32) -> (i32, i32, i32) {
    %c0_i32 = arith.constant 0 : i32
    %c0_i32_0 = arith.constant 0 : i32
    %c0_i32_1 = arith.constant 0 : i32
    %c0_i32_2 = arith.constant 0 : i32
    return %c0_i32, %c0_i32_0, %c0_i32_1 : i32, i32, i32
  }
  func.func @transform_11(%arg0: i32) -> (i32, i32, i32) {
    %c0_i32 = arith.constant 0 : i32
    %c0_i32_0 = arith.constant 0 : i32
    %c0_i32_1 = arith.constant 0 : i32
    %c0_i32_2 = arith.constant 0 : i32
    return %c0_i32, %c0_i32_0, %c0_i32_1 : i32, i32, i32
  }
  func.func @transform_12(%arg0: i32) -> (i32, i32, i32) {
    %c0_i32 = arith.constant 0 : i32
    %c0_i32_0 = arith.constant 0 : i32
    %c0_i32_1 = arith.constant 0 : i32
    %c0_i32_2 = arith.constant 0 : i32
    return %c0_i32, %c0_i32_0, %c0_i32_1 : i32, i32, i32
  }
  func.func @transform_13(%arg0: i32) -> (i32, i32, i32) {
    %c0_i32 = arith.constant 0 : i32
    %c0_i32_0 = arith.constant 0 : i32
    %c0_i32_1 = arith.constant 0 : i32
    %c0_i32_2 = arith.constant 0 : i32
    return %c0_i32, %c0_i32_0, %c0_i32_1 : i32, i32, i32
  }
  func.func @transform_14(%arg0: i32) -> (i32, i32, i32) {
    %c0_i32 = arith.constant 0 : i32
    %c0_i32_0 = arith.constant 0 : i32
    %c0_i32_1 = arith.constant 0 : i32
    %c0_i32_2 = arith.constant 0 : i32
    return %c0_i32, %c0_i32_0, %c0_i32_1 : i32, i32, i32
  }
  func.func @transform_15(%arg0: i32) -> (i32, i32, i32) {
    %c0_i32 = arith.constant 0 : i32
    %c0_i32_0 = arith.constant 0 : i32
    %c0_i32_1 = arith.constant 0 : i32
    %c0_i32_2 = arith.constant 0 : i32
    return %c0_i32, %c0_i32_0, %c0_i32_1 : i32, i32, i32
  }
  func.func @transform_16(%arg0: i32) -> (i32, i32, i32) {
    %c0_i32 = arith.constant 0 : i32
    %c0_i32_0 = arith.constant 0 : i32
    %c0_i32_1 = arith.constant 0 : i32
    %c0_i32_2 = arith.constant 0 : i32
    return %c0_i32, %c0_i32_0, %c0_i32_1 : i32, i32, i32
  }
  func.func @transform_17(%arg0: i32) -> (i32, i32, i32) {
    %c0_i32 = arith.constant 0 : i32
    %c0_i32_0 = arith.constant 0 : i32
    %c0_i32_1 = arith.constant 0 : i32
    %c0_i32_2 = arith.constant 0 : i32
    return %c0_i32, %c0_i32_0, %c0_i32_1 : i32, i32, i32
  }
  func.func @transform_18(%arg0: i32) -> (i32, i32, i32) {
    %c0_i32 = arith.constant 0 : i32
    %c0_i32_0 = arith.constant 0 : i32
    %c0_i32_1 = arith.constant 0 : i32
    %c0_i32_2 = arith.constant 0 : i32
    return %c0_i32, %c0_i32_0, %c0_i32_1 : i32, i32, i32
  }
  func.func @transform_19(%arg0: i32) -> (i32, i32, i32) {
    %c0_i32 = arith.constant 0 : i32
    %c0_i32_0 = arith.constant 0 : i32
    %c0_i32_1 = arith.constant 0 : i32
    %c0_i32_2 = arith.constant 0 : i32
    return %c0_i32, %c0_i32_0, %c0_i32_1 : i32, i32, i32
  }
  func.func @transform_20(%arg0: i32) -> (i32, i32) {
    %c0_i32 = arith.constant 0 : i32
    %c0_i32_0 = arith.constant 0 : i32
    %c0_i32_1 = arith.constant 0 : i32
    return %c0_i32, %c0_i32_0 : i32, i32
  }
  func.func @transform_21(%arg0: i32) -> (i32, i32) {
    %c0_i32 = arith.constant 0 : i32
    %c0_i32_0 = arith.constant 0 : i32
    %c0_i32_1 = arith.constant 0 : i32
    return %c0_i32, %c0_i32_0 : i32, i32
  }
  func.func @transform_22(%arg0: i32) -> (i32, i32) {
    %c0_i32 = arith.constant 0 : i32
    %c0_i32_0 = arith.constant 0 : i32
    %c0_i32_1 = arith.constant 0 : i32
    return %c0_i32, %c0_i32_0 : i32, i32
  }
  func.func @transform_23(%arg0: i32) -> (i32, i32) {
    %c0_i32 = arith.constant 0 : i32
    %c0_i32_0 = arith.constant 0 : i32
    %c0_i32_1 = arith.constant 0 : i32
    return %c0_i32, %c0_i32_0 : i32, i32
  }
  func.func @transform_24(%arg0: i32) -> (i32, i32) {
    %c0_i32 = arith.constant 0 : i32
    %c0_i32_0 = arith.constant 0 : i32
    %c0_i32_1 = arith.constant 0 : i32
    return %c0_i32, %c0_i32_0 : i32, i32
  }
  func.func @transform_25(%arg0: i32) -> (i32, i32) {
    %c0_i32 = arith.constant 0 : i32
    %c0_i32_0 = arith.constant 0 : i32
    %c0_i32_1 = arith.constant 0 : i32
    return %c0_i32, %c0_i32_0 : i32, i32
  }
  func.func @transform_26(%arg0: i32) -> (i32, i32) {
    %c0_i32 = arith.constant 0 : i32
    %c0_i32_0 = arith.constant 0 : i32
    %c0_i32_1 = arith.constant 0 : i32
    return %c0_i32, %c0_i32_0 : i32, i32
  }
  func.func @transform_27(%arg0: i32) -> (i32, i32, i32) {
    %c0_i32 = arith.constant 0 : i32
    %c0_i32_0 = arith.constant 0 : i32
    %c0_i32_1 = arith.constant 0 : i32
    return %arg0, %c0_i32, %c0_i32_0 : i32, i32, i32
  }
  func.func @transform_28(%arg0: i32) -> (i32, i32, i32) {
    %c0_i32 = arith.constant 0 : i32
    %c0_i32_0 = arith.constant 0 : i32
    %c0_i32_1 = arith.constant 0 : i32
    return %arg0, %c0_i32, %c0_i32_0 : i32, i32, i32
  }
}

</mosaic_0001>

<bundles_post_ra>
// kernel: bert_forward.1
= control target key start
LH: loop header
LB: loop body
LE: loop exit
PB: predicated region body
PF: predicated region fallthrough
CT: control target
= control target key end

     0   :  { %s7257_s0 = inlined_call_operand.vmem [shape: f32[2,8,128], index: 0, kind: input, shape index: {}]   ;;  %s7258_s1 = inlined_call_operand.vmem [shape: f32[2,1,8], index: 1, kind: input, shape index: {}]   ;;  %s7259_s2 = inlined_call_operand.vmem [shape: f32[1,128], index: 2, kind: input, shape index: {}, may-alias: {2,22}]   ;;  %s7260_s3 = inlined_call_operand.vmem [shape: f32[1,128], index: 3, kind: input, shape index: {}, may-alias: {3,21,23,26}]   ;;  %s7261_s4 = inlined_call_operand.vmem [shape: bf16[2,128,128], index: 4, kind: input, shape index: {}]   ;;  %s7262_s5 = inlined_call_operand.vmem [shape: f32[2,1,128], index: 5, kind: input, shape index: {}, may-alias: {5,7,9,11,13,15,17,19}]   ;;  %s7263_s6 = inlined_call_operand.vmem [shape: bf16[2,128,128], index: 6, kind: input, shape index: {}]   ;;  %s7264_s7 = inlined_call_operand.vmem [shape: f32[2,1,128], index: 7, kind: input, shape index: {}, may-alias: {5,7,9,11,13,15,17,19}]   ;;  %s7265_s8 = inlined_call_operand.vmem [shape: bf16[2,128,128], index: 8, kind: input, shape index: {}]   ;;  %s7266_s9 = inlined_call_operand.vmem [shape: f32[2,1,128], index: 9, kind: input, shape index: {}, may-alias: {5,7,9,11,13,15,17,19}]   ;;  %s7267_s10 = inlined_call_operand.vmem [shape: bf16[2,32,128], index: 10, kind: input, shape index: {}]   ;;  %s7268_s11 = inlined_call_operand.vmem [shape: f32[2,1,128], index: 11, kind: input, shape index: {}, may-alias: {5,7,9,11,13,15,17,19}]   ;;  %s7269_s12 = inlined_call_operand.vmem [shape: f32[2,1,128], index: 12, kind: input, shape index: {}, may-alias: {12,18}]   ;;  %s7270_s13 = inlined_call_operand.vmem [shape: f32[2,1,128], index: 13, kind: input, shape index: {}, may-alias: {5,7,9,11,13,15,17,19}]   ;;  %s7271_s14 = inlined_call_operand.hbm [shape: bf16[2,128,128], index: 14, kind: input, shape index: {}]   ;;  %s7272_s15 = inlined_call_operand.vmem [shape: f32[2,1,128], index: 15, kind: input, shape index: {}, may-alias: {5,7,9,11,13,15,17,19}]   ;;  %s7273_s16 = inlined_call_operand.hbm [shape: bf16[2,128,128], index: 16, kind: input, shape index: {}]   ;;  %s7274_s17 = inlined_call_operand.vmem [shape: f32[2,1,128], index: 17, kind: input, shape index: {}, may-alias: {5,7,9,11,13,15,17,19}]   ;;  %s7275_s18 = inlined_call_operand.vmem [shape: f32[2,1,128], index: 18, kind: input, shape index: {}, may-alias: {12,18}]   ;;  %s7276_s19 = inlined_call_operand.vmem [shape: f32[2,1,128], index: 19, kind: input, shape index: {}, may-alias: {5,7,9,11,13,15,17,19}]   ;;  %s7277_s20 = inlined_call_operand.hbm [shape: bf16[128,128], index: 20, kind: input, shape index: {}]   ;;  %s7278_s21 = inlined_call_operand.vmem [shape: f32[1,128], index: 21, kind: input, shape index: {}, may-alias: {3,21,23,26}]   ;;  %s7279_s22 = inlined_call_operand.vmem [shape: f32[1,128], index: 22, kind: input, shape index: {}, may-alias: {2,22}]   ;;  %s7280_s23 = inlined_call_operand.vmem [shape: f32[1,128], index: 23, kind: input, shape index: {}, may-alias: {3,21,23,26}]   ;;  %s7281_s24 = inlined_call_operand.hbm [shape: bf16[128,128], index: 24, kind: input, shape index: {}]   ;;  %s7282_s25 = inlined_call_operand.hbm [shape: bf16[128,128], index: 25, kind: input, shape index: {}]   ;;  %s7283_s26 = inlined_call_operand.vmem [shape: f32[1,128], index: 26, kind: input, shape index: {}, may-alias: {3,21,23,26}]   ;;  %s7284_s27 = inlined_call_operand.hbm [shape: f32[2,8,128], index: 27, kind: output, shape index: {0}]   ;;  %s7285_s28 = inlined_call_operand.hbm [shape: f32[2,1,128], index: 28, kind: output, shape index: {1}]  }
   0x1   :  { %7304 = sst [smem:[#allocation19_spill]] %s7257_s0 }
   0x2   :  { %7305 = sst [smem:[#allocation20_spill]] %s7258_s1 }
   0x3   :  { %7306 = sst [smem:[#allocation21_spill]] %s7259_s2 }
   0x4   :  { %7307 = sst [smem:[#allocation22_spill]] %s7260_s3 }
   0x5   :  { %7308 = sst [smem:[#allocation23_spill]] %s7261_s4 }
   0x6   :  { %7309 = sst [smem:[#allocation24_spill]] %s7262_s5 }
   0x7   :  { %7310 = sst [smem:[#allocation25_spill]] %s7263_s6 }
   0x8   :  { %7311 = sst [smem:[#allocation26_spill]] %s7264_s7 }
   0x9   :  { %7312 = sst [smem:[#allocation27_spill]] %s7265_s8 }
   0xa   :  { %7313 = sst [smem:[#allocation28_spill]] %s7266_s9 }
   0xb   :  { %7314 = sst [smem:[#allocation29_spill]] %s7267_s10 }
   0xc   :  { %7315 = sst [smem:[#allocation30_spill]] %s7268_s11 }
   0xd   :  { %7316 = sst [smem:[#allocation31_spill]] %s7269_s12 }
   0xe   :  { %34 = vsyncpa [#allocation3], 0 }
   0xf   :  { %35 = vsyncpa [#allocation6], 0 }
  0x10   :  { %36 = vsyncpa [#allocation9], 0 }
  0x11   :  { %37 = vsyncpa [#allocation4], 0 }
  0x12   :  { %38 = vsyncpa [#allocation13], 0  ;;  %s6179_s8 = smov [#allocation5]   ;;  %s6180_s9 = smov [#allocation8]  }
  0x13   :  { %s86_s5 = sshll.u32 %s6179_s8, 4  ;;  %s122_s30 = sshll.u32 %s6180_s9, 4  ;;  %s87_s5 = int_to_ptr.vmem [resolvable:$true] %s86_s5  ;;  %s6343_s30 = int_to_ptr.vmem [resolvable:$true] %s122_s30 }
  0x14   :  { %s6015_s10 = scalar_lea.hbm %s7273_s16, 2048 }
  0x15   :  { %p6016_p0 = scmp.ne.s32.totalorder %s7273_s16, %s6015_s10  ;;  %p6019_p1 = scmp.lt.u32.totalorder %s6015_s10, %s7273_s16 }
  0x17   :  { %p6021_p2 = pnand %p6019_p1, %p6016_p0 }
  0x19   :  { %6024 = shalt.err (!%p6021_p2)
}
  0x1a   :  { %s6025_s7 = scalar_lea.vmem %s87_s5, 2048  ;;  %p6030_p4 = scmp.lt.s32.totalorder %s87_s5, %s87_s5 }
  0x1b   :  { %p6026_p3 = scmp.ne.s32.totalorder %s87_s5, %s6025_s7  ;;  %p6031_p5 = scmp.lt.s32.totalorder %s6025_s7, %s6025_s7 }
  0x1d   :  { %p6032_p6 = por %p6031_p5, %p6030_p4 }
  0x1f   :  { %p6033_p7 = pnand %p6032_p6, %p6026_p3 }
  0x21   :  { %6036 = shalt.err (!%p6033_p7)
}
  0x22   :  { %s6181_s12 = smov 64   ;;  %s6182_s1 = smov 4  }
  0x23   :  { %92 = dma.hbm_to_vmem [thread:$0]  %s7273_s16, 2048, %s87_s5, [#allocation6], %s6181_s12, %s6181_s12, %s6182_s1  }
  0x24   :  { %s6037_s6 = scalar_lea.hbm %s7281_s24, 1024 }
  0x25   :  { %p6038_p8 = scmp.ne.s32.totalorder %s7281_s24, %s6037_s6  ;;  %p6041_p9 = scmp.lt.u32.totalorder %s6037_s6, %s7281_s24 }
  0x27   :  { %p6043_p10 = pnand %p6041_p9, %p6038_p8 }
  0x29   :  { %6046 = shalt.err (!%p6043_p10)
}
  0x2a   :  { %s6047_s2 = scalar_lea.vmem %s6343_s30, 1024  ;;  %p6052_p12 = scmp.lt.s32.totalorder %s6343_s30, %s6343_s30 }
  0x2b   :  { %p6048_p11 = scmp.ne.s32.totalorder %s6343_s30, %s6047_s2  ;;  %p6053_p13 = scmp.lt.s32.totalorder %s6047_s2, %s6047_s2 }
  0x2d   :  { %p6054_p0 = por %p6053_p13, %p6052_p12 }
  0x2f   :  { %p6055_p1 = pnand %p6054_p0, %p6048_p11 }
  0x31   :  { %6058 = shalt.err (!%p6055_p1)
}
  0x32   :  { %128 = dma.hbm_to_vmem [thread:$0]  %s7281_s24, 1024, %s6343_s30, [#allocation9], %s6181_s12, %s6181_s12, %s6182_s1  }
  0x33   :  { %s6183_s7 = smov [#allocation2]   ;;  %s6184_s8 = smov [#allocation7]  }
  0x34   :  { %s72_s4 = sshll.u32 %s6183_s7, 4  ;;  %s104_s9 = sshll.u32 %s6184_s8, 4  ;;  %s73_s4 = int_to_ptr.vmem [resolvable:$true] %s72_s4  ;;  %s6380_s9 = int_to_ptr.vmem [resolvable:$true] %s104_s9 }
  0x35   :  { %s6059_s10 = scalar_lea.hbm %s7271_s14, 2048 }
  0x36   :  { %p6060_p2 = scmp.ne.s32.totalorder %s7271_s14, %s6059_s10  ;;  %p6063_p3 = scmp.lt.u32.totalorder %s6059_s10, %s7271_s14 }
  0x38   :  { %p6065_p4 = pnand %p6063_p3, %p6060_p2 }
  0x3a   :  { %6068 = shalt.err (!%p6065_p4)
}
  0x3b   :  { %s6069_s24 = scalar_lea.vmem %s73_s4, 2048  ;;  %p6074_p6 = scmp.lt.s32.totalorder %s73_s4, %s73_s4 }
  0x3c   :  { %p6070_p5 = scmp.ne.s32.totalorder %s73_s4, %s6069_s24  ;;  %p6075_p7 = scmp.lt.s32.totalorder %s6069_s24, %s6069_s24 }
  0x3e   :  { %p6076_p8 = por %p6075_p7, %p6074_p6 }
  0x40   :  { %p6077_p9 = pnand %p6076_p8, %p6070_p5 }
  0x42   :  { %6080 = shalt.err (!%p6077_p9)
}
  0x43   :  { %78 = dma.hbm_to_vmem [thread:$0]  %s7271_s14, 2048, %s73_s4, [#allocation3], %s6181_s12, %s6181_s12, %s6182_s1  }
  0x44   :  { %s6081_s8 = scalar_lea.hbm %s7277_s20, 1024 }
  0x45   :  { %p6082_p10 = scmp.ne.s32.totalorder %s7277_s20, %s6081_s8  ;;  %p6085_p11 = scmp.lt.u32.totalorder %s6081_s8, %s7277_s20 }
  0x47   :  { %p6087_p12 = pnand %p6085_p11, %p6082_p10 }
  0x49   :  { %6090 = shalt.err (!%p6087_p12)
}
  0x4a   :  { %s6091_s11 = scalar_lea.vmem %s6380_s9, 1024  ;;  %p6096_p0 = scmp.lt.s32.totalorder %s6380_s9, %s6380_s9 }
  0x4b   :  { %p6092_p13 = scmp.ne.s32.totalorder %s6380_s9, %s6091_s11  ;;  %p6097_p1 = scmp.lt.s32.totalorder %s6091_s11, %s6091_s11 }
  0x4d   :  { %p6098_p2 = por %p6097_p1, %p6096_p0 }
  0x4f   :  { %p6099_p3 = pnand %p6098_p2, %p6092_p13 }
  0x51   :  { %6102 = shalt.err (!%p6099_p3)
}
  0x52   :  { %110 = dma.hbm_to_vmem [thread:$0]  %s7277_s20, 1024, %s6380_s9, [#allocation6], %s6181_s12, %s6181_s12, %s6182_s1  }
  0x53   :  { %s6185_s29 = smov [#allocation10]   ;;  %s6103_s16 = scalar_lea.hbm %s7282_s25, 1024 }
  0x54   :  { %s134_s2 = sshll.u32 %s6185_s29, 4  ;;  %p6104_p4 = scmp.ne.s32.totalorder %s7282_s25, %s6103_s16  ;;  %s135_s2 = int_to_ptr.vmem [resolvable:$true] %s134_s2 }
  0x55   :  { %p6107_p5 = scmp.lt.u32.totalorder %s6103_s16, %s7282_s25 }
  0x57   :  { %p6109_p6 = pnand %p6107_p5, %p6104_p4 }
  0x59   :  { %6112 = shalt.err (!%p6109_p6)
}
  0x5a   :  { %s6113_s6 = scalar_lea.vmem %s135_s2, 1024  ;;  %p6118_p8 = scmp.lt.s32.totalorder %s135_s2, %s135_s2 }
  0x5b   :  { %p6114_p7 = scmp.ne.s32.totalorder %s135_s2, %s6113_s6  ;;  %p6119_p9 = scmp.lt.s32.totalorder %s6113_s6, %s6113_s6 }
  0x5d   :  { %p6120_p10 = por %p6119_p9, %p6118_p8 }
  0x5f   :  { %p6121_p11 = pnand %p6120_p10, %p6114_p7 }
  0x61   :  { %6124 = shalt.err (!%p6121_p11)
}
  0x62   :  { %140 = dma.hbm_to_vmem [thread:$0]  %s7282_s25, 1024, %s135_s2, [#allocation9], %s6181_s12, %s6181_s12, %s6182_s1  }
  0x63   :  { %6169 = dma.done.wait [#allocation3], 2048  }
  0x64   :  { %6170 = vsyncadd [#allocation3], 4294965248 }
  0x65   :  { %6171 = dma.done.wait [#allocation6], 3072  }
  0x66   :  { %6172 = vsyncadd [#allocation6], 4294964224 }
  0x67   :  { %6173 = dma.done.wait [#allocation9], 2048  }
  0x68   :  { %6174 = vsyncadd [#allocation9], 4294965248  ;;  %s7317_s11 = sld [smem:[#allocation19_spill]]  ;;  %s7318_s1 = sld [smem:[#allocation23_spill]]  ;;  %v6186_v5 = vmov 0.0   ;;  %vm6187_vm0 = vmmov 0  }
  0x69   :  { %5320 = vmatprep.subr.bf16.mxu0 %v6186_v5  ;;  %5340 = vmatprep.subr.bf16.mxu1 %v6186_v5  ;;  %s7319_s24 = sld [smem:[#allocation25_spill]]  ;;  %s7320_s14 = sld [smem:[#allocation21_spill]]  ;;  %vm546_vm1 = vcmask 64512   ;;  %vm1230_vm2 = vcmask 130048   ;;  %vm1232_vm3 = vcmask 195584   ;;  %vm1945_vm4 = vcmask 261120  }
  0x6a   :  { %5336 = vmatprep.mubr.msk.bf16.mxu0 %vm6187_vm0, %v6186_v5  ;;  %5356 = vmatprep.mubr.msk.bf16.mxu1 %vm6187_vm0, %v6186_v5  ;;  %s7321_s12 = sld [smem:[#allocation22_spill]]  ;;  %s7322_s30 = sld [smem:[#allocation27_spill]] }
  0x6b   :  { %s7323_s2 = sld [smem:[#allocation26_spill]]  ;;  %s7324_s7 = sld [smem:[#allocation24_spill]] }
  0x6c   :  { %s7325_s6 = sld [smem:[#allocation28_spill]]  ;;  %s6188_s0 = smov 120  }
  0x6d   :  { %s7326_s10 = sld [smem:[#allocation20_spill]]  ;;  %s7327_s16 = sld [smem:[#allocation29_spill]] }
  0x6e   :  { %v6435_v0 = vld [vmem:[%s7317_s11] sm:$0xff]  ;;  %v6440_v1 = vld [vmem:[%s7317_s11 + $0x8] sm:$0xff]  ;;  %v5809_v9 = vld [vmem:[%s7318_s1 + $0x10] sm:$0xff]   ;;  %s6189_s11 = smov 112   ;;  %s7300_s3 = smov 8  }
  0x6f   :  { %163 = vadd.xlane.f32.xlu0 %v6435_v0  ;;  %v167_v2 = vmul.f32 %v6435_v0, %v6435_v0  ;;  %v168_v3 = vmul.f32 %v6440_v1, %v6440_v1  ;;  %v5805_v4 = vld [vmem:[%s7318_s1] sm:$0xff]   ;;  %v5807_v7 = vld [vmem:[%s7318_s1 + $0x8] sm:$0xff]   ;;  %v5810_v10 = vld [vmem:[%s7319_s24 + $0x10] sm:$0xff]   ;;  %s7298_s20 = smov 16   ;;  %s7297_s9 = smov 24  }
  0x70   :  { %v5806_v6 = vld [vmem:[%s7319_s24] sm:$0xff]   ;;  %5321 = vmatpush3.bf16.msra.mxu0 %v5805_v4  ;;  %v5808_v8 = vld [vmem:[%s7319_s24 + $0x8] sm:$0xff]   ;;  %v5811_v11 = vld [vmem:[%s7318_s1 + $0x18] sm:$0xff]   ;;  %s7329_s8 = sld [smem:[#allocation31_spill]] }
  0x71   :  { %169 = vadd.xlane.f32.xlu1 %v167_v2  ;;  %5341 = vmatpush3.bf16.msra.mxu1 %v5806_v6  ;;  %v5812_v12 = vld [vmem:[%s7319_s24 + $0x18] sm:$0xff]   ;;  %v5813_v13 = vld [vmem:[%s7318_s1 + $0x20] sm:$0xff]   ;;  %v5815_v15 = vld [vmem:[%s7318_s1 + $0x28] sm:$0xff]  }
  0x72   :  { %5322 = vmatprep.subr.bf16.mxu0 %v6186_v5  ;;  %5342 = vmatprep.subr.bf16.mxu1 %v6186_v5  ;;  %v5814_v14 = vld [vmem:[%s7319_s24 + $0x20] sm:$0xff]   ;;  %v5816_v16 = vld [vmem:[%s7319_s24 + $0x28] sm:$0xff]   ;;  %v5817_v17 = vld [vmem:[%s7318_s1 + $0x30] sm:$0xff]  }
  0x73   :  { %165 = vadd.xlane.f32.xlu0 %v6440_v1  ;;  %v5818_v18 = vld [vmem:[%s7319_s24 + $0x30] sm:$0xff]   ;;  %v5819_v19 = vld [vmem:[%s7318_s1 + $0x38] sm:$0xff]   ;;  %v4884_v40 = vld [vmem:[%s7320_s14] ss:$0 sm:$0xff]  ;;  %s7302_s14 = smov 104  }
  0x74   :  { %5323 = vmatpush3.bf16.msra.mxu0 %v5807_v7  ;;  %v5820_v20 = vld [vmem:[%s7319_s24 + $0x38] sm:$0xff]   ;;  %v4885_v45 = vld [vmem:[%s7321_s12] ss:$0 sm:$0xff]  ;;  %v5822_v51 = vld [vmem:[%s7322_s30 + $0x8] sm:$0xff]   ;;  %s7328_s12 = sld [smem:[#allocation30_spill]] }
  0x75   :  { %171 = vadd.xlane.f32.xlu1 %v168_v3  ;;  %5343 = vmatpush3.bf16.msra.mxu1 %v5808_v8  ;;  %v5821_v49 = vld [vmem:[%s7322_s30] sm:$0xff]   ;;  %v5823_v52 = vld [vmem:[%s7322_s30 + $0x10] sm:$0xff]   ;;  %v5824_v53 = vld [vmem:[%s7322_s30 + $0x18] sm:$0xff]  }
  0x76   :  { %5324 = vmatprep.subr.bf16.mxu0 %v6186_v5  ;;  %5344 = vmatprep.subr.bf16.mxu1 %v6186_v5  ;;  %v5825_v54 = vld [vmem:[%s7322_s30 + $0x20] sm:$0xff]   ;;  %v5826_v55 = vld [vmem:[%s7322_s30 + $0x28] sm:$0xff]   ;;  %v5827_v56 = vld [vmem:[%s7322_s30 + $0x30] sm:$0xff]  }
  0x77   :  { %v5828_v57 = vld [vmem:[%s7322_s30 + $0x38] sm:$0xff]   ;;  %v4895_v58 = vld [vmem:[%s7323_s2] ss:$0 sm:$0xff] }
  0x78   :  { %5325 = vmatpush3.bf16.msra.mxu0 %v5809_v9  ;;  %v4886_v61 = vld [vmem:[%s7324_s7] ss:$0 sm:$0xff] }
  0x79   :  { %5345 = vmatpush3.bf16.msra.mxu1 %v5810_v10  ;;  %5326 = vmatprep.subr.bf16.mxu0 %v6186_v5  ;;  %v4904_v9 = vld [vmem:[%s7325_s6] ss:$0 sm:$0xff] }
  0x7a   :  { %5346 = vmatprep.subr.bf16.mxu1 %v6186_v5 }
  0x7c   :  { %5327 = vmatpush3.bf16.msra.mxu0 %v5811_v11 }
  0x7d   :  { %5347 = vmatpush3.bf16.msra.mxu1 %v5812_v12  ;;  %5328 = vmatprep.subr.bf16.mxu0 %v6186_v5 }
  0x7e   :  { %5348 = vmatprep.subr.bf16.mxu1 %v6186_v5 }
  0x80   :  { %5329 = vmatpush3.bf16.msra.mxu0 %v5813_v13 }
  0x81   :  { %5349 = vmatpush3.bf16.msra.mxu1 %v5814_v14  ;;  %5330 = vmatprep.subr.bf16.mxu0 %v6186_v5 }
  0x82   :  { %5350 = vmatprep.subr.bf16.mxu1 %v6186_v5 }
  0x84   :  { %5331 = vmatpush3.bf16.msra.mxu0 %v5815_v15 }
  0x85   :  { %5351 = vmatpush3.bf16.msra.mxu1 %v5816_v16  ;;  %5332 = vmatprep.subr.bf16.mxu0 %v6186_v5 }
  0x86   :  { %5352 = vmatprep.subr.bf16.mxu1 %v6186_v5 }
  0x88   :  { %5333 = vmatpush3.bf16.msra.mxu0 %v5817_v17  ;;  %v6603_v17 = vld [vmem:[%s7326_s10] ss:$0 sm:$0xff] }
  0x89   :  { %5353 = vmatpush3.bf16.msra.mxu1 %v5818_v18  ;;  %5334 = vmatprep.subr.bf16.mxu0 %v6186_v5 }
  0x8a   :  { %5354 = vmatprep.subr.bf16.mxu1 %v6186_v5 }
  0x8c   :  { %5335 = vmatpush3.bf16.msra.mxu0 %v5819_v19 }
  0x8d   :  { %5355 = vmatpush3.bf16.msra.mxu1 %v5820_v20  ;;  %5360 = vmatprep.subr.bf16.mxu0 %v6186_v5 }
  0x8e   :  { %5395 = vmatprep.subr.mxu1 %v6186_v5 }
  0xfc   :  { %v164_v21 = vpop.xlane.xlu0 %163 }
  0xfd   :  { %v174_v22 = vmul.f32 0.03125, %v164_v21 }
  0xfe   :  { %v170_v23 = vpop.xlane.xlu1 %169 }
  0xff   :  { %v178_v24 = vmul.f32 %v174_v22, %v174_v22  ;;  %v176_v25 = vmul.f32 0.03125, %v170_v23  ;;  %v184_v37 = vsub.f32 %v6435_v0, %v174_v22 }
 0x100   :  { %v166_v26 = vpop.xlane.xlu0 %165 }
 0x101   :  { %v180_v27 = vsub.f32 %v176_v25, %v178_v24  ;;  %v175_v28 = vmul.f32 0.03125, %v166_v26 }
 0x102   :  { %v172_v29 = vpop.xlane.xlu1 %171 }
 0x103   :  { %v182_v30 = vmax.f32 %v180_v27, 0.0  ;;  %v179_v31 = vmul.f32 %v175_v28, %v175_v28  ;;  %v177_v32 = vmul.f32 0.03125, %v172_v29  ;;  %v185_v41 = vsub.f32 %v6440_v1, %v175_v28 }
 0x105   :  { %v186_v33 = vadd.f32 1e-12, %v182_v30  ;;  %v181_v34 = vsub.f32 %v177_v32, %v179_v31 }
 0x107   :  { %5913 = vrsqrt.f32 %v186_v33  ;;  %v183_v35 = vmax.f32 %v181_v34, 0.0 }
 0x109   :  { %v187_v36 = vadd.f32 1e-12, %v183_v35 }
 0x10b   :  { %5915 = vrsqrt.f32 %v187_v36 }
 0x111   :  { %v5914_v38 = vpop.eup %5913 }
 0x112   :  { %v190_v39 = vmul.f32 %v5914_v38, %v184_v37 }
 0x114   :  { %v198_v44 = vmul.f32 %v4884_v40, %v190_v39 }
 0x115   :  { %v5916_v42 = vpop.eup %5915 }
 0x116   :  { %v191_v43 = vmul.f32 %v5916_v42, %v185_v41  ;;  %v6526_v47 = vadd.f32 %v4885_v45, %v198_v44 }
 0x118   :  { %v199_v46 = vmul.f32 %v4884_v40, %v191_v43 }
 0x11a   :  { %v6528_v48 = vadd.f32 %v4885_v45, %v199_v46 }
 0x11c   :  { %v208_v50 = vpack.c.bf16 %v6528_v48, %v6526_v47 }
 0x11e   :  { %5337 = vmatmul.mubr.bf16.vlgmr.msra.gmra.mrb[0].mxu0 %v208_v50  ;;  %5357 = vmatmul.mubr.bf16.vlgmr.msra.gmra.mrb[0].mxu1 %v208_v50 }
 0x11f   :  { %5361 = vmatpush3.bf16.msra.mxu0 %v5821_v49  ;;  %5376 = vmatprep.mubr.msk.bf16.mxu0 %vm6187_vm0, %v6186_v5 }
 0x120   :  { %5362 = vmatprep.subr.bf16.mxu0 %v6186_v5  ;;  %5397 = vmatprep.mubr.msk.f32.mxu1 %vm6187_vm0, %v6186_v5 }
 0x123   :  { %5363 = vmatpush3.bf16.msra.mxu0 %v5822_v51 }
 0x124   :  { %5364 = vmatprep.subr.bf16.mxu0 %v6186_v5 }
 0x127   :  { %5365 = vmatpush3.bf16.msra.mxu0 %v5823_v52 }
 0x128   :  { %5366 = vmatprep.subr.bf16.mxu0 %v6186_v5 }
 0x12b   :  { %5367 = vmatpush3.bf16.msra.mxu0 %v5824_v53 }
 0x12c   :  { %5368 = vmatprep.subr.bf16.mxu0 %v6186_v5 }
 0x12f   :  { %5369 = vmatpush3.bf16.msra.mxu0 %v5825_v54 }
 0x130   :  { %5370 = vmatprep.subr.bf16.mxu0 %v6186_v5 }
 0x133   :  { %5371 = vmatpush3.bf16.msra.mxu0 %v5826_v55 }
 0x134   :  { %5372 = vmatprep.subr.bf16.mxu0 %v6186_v5 }
 0x137   :  { %5373 = vmatpush3.bf16.msra.mxu0 %v5827_v56 }
 0x138   :  { %5374 = vmatprep.subr.bf16.mxu0 %v6186_v5 }
 0x13b   :  { %5375 = vmatpush3.bf16.msra.mxu0 %v5828_v57 }
 0x13c   :  { %5380 = vmatprep.subr.mxu0 %v6186_v5 }
 0x13e   :  { %5377 = vmatmul.mubr.bf16.vlgmr.msra.gmra.mrb[4].mxu0 %v208_v50 }
 0x13f   :  { %5382 = vmatprep.mubr.msk.f32.mxu0 %vm6187_vm0, %v6186_v5 }
 0x1f1   :  { %v314_v59 = vpop.f32.mrb[0].mxu0  ;;  %v426_v60 = vpop.f32.mrb[0].mxu1 }
 0x1f2   :  { %v6576_v62 = vadd.f32 %v4895_v58, %v426_v60  ;;  %v5338_v63 = vpop.f32.mrb[1].mxu0  ;;  %v5358_v0 = vpop.f32.mrb[1].mxu1  ;;  %v6584_v8 = vadd.f32 %v4886_v61, %v314_v59 }
 0x1f3   :  { %v317_v1 = vpop.f32.mrb[2].mxu0  ;;  %v429_v2 = vpop.f32.mrb[2].mxu1  ;;  %v6664_v63 = vld [vmem:[%s7326_s10 + $0x1] ss:$0 sm:$0xff] }
 0x1f4   :  { %v6578_v3 = vadd.f32 %v4886_v61, %v317_v1  ;;  %v6580_v4 = vadd.f32 %v4895_v58, %v429_v2  ;;  %v5339_v6 = vpop.f32.mrb[3].mxu0  ;;  %v5359_v7 = vpop.f32.mrb[3].mxu1  ;;  %5381 = vmatpush3.xpose.msk.msra.mxu0 %vm546_vm1, %v6576_v62 }
 0x1f5   :  { %5385 = vmatprep.subr.mxu0 %v6186_v5 }
 0x1f7   :  { %5383 = vmatmul.mubr.msk.f32.vlgmr.msra.gmra.mrb[8].mxu0 %vm546_vm1, %v6584_v8 }
 0x1f8   :  { %5387 = vmatprep.mubr.msk.f32.mxu0 %vm6187_vm0, %v6186_v5 }
 0x211   :  { %v538_v10 = vpop.f32.mrb[4].mxu0 }
 0x212   :  { %v6594_v11 = vadd.f32 %v4904_v9, %v538_v10  ;;  %v5378_v12 = vpop.f32.mrb[5].mxu0 }
 0x213   :  { %v541_v13 = vpop.f32.mrb[6].mxu0 }
 0x214   :  { %v6596_v14 = vadd.f32 %v4904_v9, %v541_v13  ;;  %v5379_v15 = vpop.f32.mrb[7].mxu0  ;;  %5386 = vmatpush3.msra.mxu0 %v6594_v11 }
 0x215   :  { %5390 = vmatprep.subr.mxu0 %v6186_v5 }
 0x2ca   :  { %v619_v16 = vpop.f32.mrb[8].mxu0 }
 0x2cb   :  { %v623_v18 = vmul.f32 0.35355338, %v619_v16  ;;  %v5384_v19 = vpop.f32.mrb[9].mxu0 }
 0x2cd   :  { %v630_v20 = vadd.f32 %v6603_v17, %v623_v18 }
 0x2cf   :  { %v631_v21 = vsel %vm546_vm1, %v630_v20, -inf }
 0x2d0   :  { %632 = vmax.xlane.f32.xlu0 %v631_v21 }
 0x2e6   :  { %717 = vrot.lane.b32.xlu0 %v6576_v62, %s6188_s0 }
 0x35d   :  { %v633_v22 = vpop.xlane.xlu0 %632 }
 0x35e   :  { %v634_v23 = vsub.f32 %v630_v20, %v633_v22 }
 0x360   :  { %v635_v24 = vmul.f32 1.442695, %v634_v23 }
 0x361   :  { %v718_v30 = vpop.permute.xlu0 %717 }
 0x362   :  { %5917 = vpow2.f32 %v635_v24 }
 0x36c   :  { %v5918_v25 = vpop.eup %5917 }
 0x36d   :  { %v637_v26 = vsel %vm546_vm1, %v5918_v25, 0.0 }
 0x36e   :  { %638 = vadd.xlane.f32.xlu1 %v637_v26 }
 0x37f   :  { %715 = vrot.lane.b32.xlu1 %v6584_v8, %s6188_s0 }
 0x3fb   :  { %v639_v27 = vpop.xlane.xlu1 %638 }
 0x3fc   :  { %5919 = vrcp.f32 %v639_v27 }
 0x3ff   :  { %v716_v31 = vpop.permute.xlu1 %715 }
 0x406   :  { %v5920_v28 = vpop.eup %5919 }
 0x407   :  { %v641_v29 = vmul.f32 %v5920_v28, %v5918_v25 }
 0x409   :  { %5388 = vmatmul.mubr.msk.f32.vlgmr.msra.gmra.mrb[10].mxu0 %vm546_vm1, %v641_v29 }
 0x40a   :  { %5391 = vmatpush3.xpose.msk.msra.mxu0 %vm546_vm1, %v718_v30  ;;  %5392 = vmatprep.mubr.msk.f32.mxu0 %vm6187_vm0, %v6186_v5 }
 0x40b   :  { %5420 = vmatprep.subr.mxu0 %v6186_v5 }
 0x40d   :  { %5393 = vmatmul.mubr.msk.f32.vlgmr.msra.gmra.mrb[12].mxu0 %vm546_vm1, %v716_v31 }
 0x40e   :  { %5421 = vmatpush3.xpose.msk.msra.mxu0 %vm546_vm1, %v6580_v4  ;;  %5422 = vmatprep.mubr.msk.f32.mxu0 %vm6187_vm0, %v6186_v5 }
 0x40f   :  { %5430 = vmatprep.subr.mxu0 %v6186_v5 }
 0x411   :  { %5423 = vmatmul.mubr.msk.f32.vlgmr.msra.gmra.mrb[14].mxu0 %vm546_vm1, %v6578_v3 }
 0x412   :  { %5432 = vmatprep.mubr.msk.f32.mxu0 %vm6187_vm0, %v6186_v5 }
 0x4dc   :  { %v6627_v32 = vpop.f32.mrb[10].mxu0 }
 0x4dd   :  { %v5389_v33 = vpop.f32.mrb[11].mxu0 }
 0x4e0   :  { %v789_v34 = vpop.f32.mrb[12].mxu0 }
 0x4e1   :  { %v793_v35 = vmul.f32 0.35355338, %v789_v34  ;;  %v5394_v36 = vpop.f32.mrb[13].mxu0 }
 0x4e3   :  { %v794_v37 = vadd.f32 %v6603_v17, %v793_v35 }
 0x4e4   :  { %v1308_v38 = vpop.f32.mrb[14].mxu0 }
 0x4e5   :  { %v5424_v39 = vpop.f32.mrb[15].mxu0  ;;  %v795_v40 = vsel %vm546_vm1, %v794_v37, -inf  ;;  %v1312_v61 = vmul.f32 0.35355338, %v1308_v38 }
 0x4e6   :  { %796 = vmax.xlane.f32.xlu1 %v795_v40 }
 0x4f7   :  { %885 = vrot.lane.b32.xlu1 %v6576_v62, %s6189_s11 }
 0x4fb   :  { %883 = vrot.lane.b32.xlu1 %v6584_v8, %s6189_s11 }
 0x573   :  { %v797_v41 = vpop.xlane.xlu1 %796 }
 0x574   :  { %v798_v42 = vsub.f32 %v794_v37, %v797_v41 }
 0x576   :  { %v799_v43 = vmul.f32 1.442695, %v798_v42 }
 0x577   :  { %v886_v51 = vpop.permute.xlu1 %885 }
 0x578   :  { %5921 = vpow2.f32 %v799_v43 }
 0x57b   :  { %v884_v53 = vpop.permute.xlu1 %883 }
 0x582   :  { %v5922_v44 = vpop.eup %5921 }
 0x583   :  { %v801_v45 = vsel %vm546_vm1, %v5922_v44, 0.0 }
 0x584   :  { %802 = vadd.xlane.f32.xlu0 %v801_v45 }
 0x59a   :  { %807 = vrot.lane.b32.xlu0 %v6594_v11, %s6188_s0 }
 0x611   :  { %v803_v46 = vpop.xlane.xlu0 %802 }
 0x612   :  { %5923 = vrcp.f32 %v803_v46 }
 0x615   :  { %v808_v49 = vpop.permute.xlu0 %807 }
 0x616   :  { %5396 = vmatpush3.msra.mxu1 %v808_v49 }
 0x617   :  { %5400 = vmatprep.subr.mxu1 %v6186_v5 }
 0x61c   :  { %v5924_v50 = vpop.eup %5923 }
 0x61d   :  { %v805_v52 = vmul.f32 %v5924_v50, %v5922_v44 }
 0x61f   :  { %5398 = vmatmul.mubr.msk.f32.vlgmr.msra.gmra.mrb[4].mxu1 %vm546_vm1, %v805_v52 }
 0x620   :  { %5401 = vmatpush3.xpose.msk.msra.mxu1 %vm546_vm1, %v886_v51  ;;  %5402 = vmatprep.mubr.msk.f32.mxu1 %vm6187_vm0, %v6186_v5 }
 0x621   :  { %5405 = vmatprep.subr.mxu1 %v6186_v5 }
 0x623   :  { %5403 = vmatmul.mubr.msk.f32.vlgmr.msra.gmra.mrb[6].mxu1 %vm546_vm1, %v884_v53 }
 0x624   :  { %5407 = vmatprep.mubr.msk.f32.mxu1 %vm6187_vm0, %v6186_v5 }
 0x6f2   :  { %v6647_v54 = vpop.f32.mrb[4].mxu1 }
 0x6f3   :  { %v5399_v55 = vpop.f32.mrb[5].mxu1 }
 0x6f6   :  { %v957_v56 = vpop.f32.mrb[6].mxu1 }
 0x6f7   :  { %v961_v57 = vmul.f32 0.35355338, %v957_v56  ;;  %v5404_v58 = vpop.f32.mrb[7].mxu1 }
 0x6f9   :  { %v962_v59 = vadd.f32 %v6603_v17, %v961_v57 }
 0x6fb   :  { %v963_v60 = vsel %vm546_vm1, %v962_v59, -inf }
 0x6fc   :  { %964 = vmax.xlane.f32.xlu1 %v963_v60 }
 0x70d   :  { %1052 = vrot.lane.b32.xlu1 %v6576_v62, %s7302_s14  ;;  %v1319_v62 = vadd.f32 %v6664_v63, %v1312_v61 }
 0x70f   :  { %v1320_v0 = vsel %vm546_vm1, %v1319_v62, -inf }
 0x711   :  { %1050 = vrot.lane.b32.xlu1 %v6584_v8, %s7302_s14 }
 0x715   :  { %1404 = vrot.lane.b32.xlu1 %v6578_v3, %s6188_s0 }
 0x719   :  { %1572 = vrot.lane.b32.xlu1 %v6578_v3, %s6189_s11 }
 0x71d   :  { %1739 = vrot.lane.b32.xlu1 %v6578_v3, %s7302_s14 }
 0x741   :  { %1321 = vmax.xlane.f32.xlu1 %v1320_v0 }
 0x789   :  { %v965_v1 = vpop.xlane.xlu1 %964 }
 0x78a   :  { %v966_v2 = vsub.f32 %v962_v59, %v965_v1 }
 0x78c   :  { %v967_v6 = vmul.f32 1.442695, %v966_v2 }
 0x78d   :  { %v1053_v3 = vpop.permute.xlu1 %1052 }
 0x78e   :  { %5925 = vpow2.f32 %v967_v6 }
 0x791   :  { %v1051_v10 = vpop.permute.xlu1 %1050 }
 0x795   :  { %v1405_v13 = vpop.permute.xlu1 %1404 }
 0x798   :  { %v5926_v7 = vpop.eup %5925 }
 0x799   :  { %v969_v8 = vsel %vm546_vm1, %v5926_v7, 0.0 }
 0x79a   :  { %970 = vadd.xlane.f32.xlu0 %v969_v8 }
 0x7b0   :  { %974 = vrot.lane.b32.xlu0 %v6594_v11, %s6189_s11 }
 0x7b4   :  { %1406 = vrot.lane.b32.xlu0 %v6580_v4, %s6188_s0 }
 0x7b8   :  { %1574 = vrot.lane.b32.xlu0 %v6580_v4, %s6189_s11 }
 0x7bc   :  { %1741 = vrot.lane.b32.xlu0 %v6580_v4, %s7302_s14  ;;  %v1573_v4 = vpop.permute.xlu1 %1572 }
 0x7c0   :  { %v1740_v21 = vpop.permute.xlu1 %1739 }
 0x7ce   :  { %v1322_v25 = vpop.xlane.xlu1 %1321 }
 0x7cf   :  { %v1323_v29 = vsub.f32 %v1319_v62, %v1322_v25 }
 0x7d1   :  { %v1324_v38 = vmul.f32 1.442695, %v1323_v29 }
 0x827   :  { %v971_v9 = vpop.xlane.xlu0 %970 }
 0x828   :  { %5927 = vrcp.f32 %v971_v9 }
 0x829   :  { %5929 = vpow2.f32 %v1324_v38 }
 0x82b   :  { %v975_v12 = vpop.permute.xlu0 %974 }
 0x82c   :  { %5406 = vmatpush3.msra.mxu1 %v975_v12 }
 0x82d   :  { %5410 = vmatprep.subr.mxu1 %v6186_v5 }
 0x82f   :  { %v1407_v15 = vpop.permute.xlu0 %1406 }
 0x830   :  { %5431 = vmatpush3.xpose.msk.msra.mxu0 %vm546_vm1, %v1407_v15 }
 0x831   :  { %5440 = vmatprep.subr.mxu0 %v6186_v5 }
 0x832   :  { %v5928_v16 = vpop.eup %5927 }
 0x833   :  { %v973_v18 = vmul.f32 %v5928_v16, %v5926_v7  ;;  %v1575_v19 = vpop.permute.xlu0 %1574  ;;  %5433 = vmatmul.mubr.msk.f32.vlgmr.msra.gmra.mrb[16].mxu0 %vm546_vm1, %v1405_v13  ;;  %v5930_v49 = vpop.eup %5929 }
 0x834   :  { %5441 = vmatpush3.xpose.msk.msra.mxu0 %vm546_vm1, %v1575_v19  ;;  %5442 = vmatprep.mubr.msk.f32.mxu0 %vm6187_vm0, %v6186_v5  ;;  %v1326_v50 = vsel %vm546_vm1, %v5930_v49, 0.0 }
 0x835   :  { %5408 = vmatmul.mubr.msk.f32.vlgmr.msra.gmra.mrb[8].mxu1 %vm546_vm1, %v973_v18  ;;  %5450 = vmatprep.subr.mxu0 %v6186_v5 }
 0x836   :  { %5411 = vmatpush3.xpose.msk.msra.mxu1 %vm546_vm1, %v1053_v3  ;;  %5412 = vmatprep.mubr.msk.f32.mxu1 %vm6187_vm0, %v6186_v5 }
 0x837   :  { %v1742_v20 = vpop.permute.xlu0 %1741  ;;  %5443 = vmatmul.mubr.msk.f32.vlgmr.msra.gmra.mrb[18].mxu0 %vm546_vm1, %v1573_v4  ;;  %5415 = vmatprep.subr.mxu1 %v6186_v5 }
 0x838   :  { %5451 = vmatpush3.xpose.msk.msra.mxu0 %vm546_vm1, %v1742_v20  ;;  %5452 = vmatprep.mubr.msk.f32.mxu0 %vm6187_vm0, %v6186_v5 }
 0x839   :  { %5413 = vmatmul.mubr.msk.f32.vlgmr.msra.gmra.mrb[10].mxu1 %vm546_vm1, %v1051_v10  ;;  %5460 = vmatprep.subr.bf16.mxu0 %v6186_v5 }
 0x83a   :  { %5417 = vmatprep.mubr.msk.f32.mxu1 %vm6187_vm0, %v6186_v5 }
 0x83b   :  { %5453 = vmatmul.mubr.msk.f32.vlgmr.msra.gmra.mrb[20].mxu0 %vm546_vm1, %v1740_v21 }
 0x83c   :  { %5464 = vmatprep.mubr.msk.bf16.mxu0 %vm6187_vm0, %v6186_v5 }
 0x906   :  { %v1478_v22 = vpop.f32.mrb[16].mxu0 }
 0x907   :  { %v5434_v23 = vpop.f32.mrb[17].mxu0  ;;  %v1482_v31 = vmul.f32 0.35355338, %v1478_v22 }
 0x908   :  { %v6701_v24 = vpop.f32.mrb[8].mxu1 }
 0x909   :  { %v5409_v26 = vpop.f32.mrb[9].mxu1  ;;  %v1483_v41 = vadd.f32 %v6664_v63, %v1482_v31 }
 0x90a   :  { %v1646_v27 = vpop.f32.mrb[18].mxu0 }
 0x90b   :  { %v5444_v28 = vpop.f32.mrb[19].mxu0  ;;  %v1650_v39 = vmul.f32 0.35355338, %v1646_v27  ;;  %v1484_v43 = vsel %vm546_vm1, %v1483_v41, -inf }
 0x90c   :  { %v1124_v30 = vpop.f32.mrb[10].mxu1 }
 0x90d   :  { %v1128_v33 = vmul.f32 0.35355338, %v1124_v30  ;;  %v5414_v34 = vpop.f32.mrb[11].mxu1  ;;  %v1651_v44 = vadd.f32 %v6664_v63, %v1650_v39 }
 0x90e   :  { %v1813_v35 = vpop.f32.mrb[20].mxu0 }
 0x90f   :  { %v5454_v36 = vpop.f32.mrb[21].mxu0  ;;  %v1129_v37 = vadd.f32 %v6603_v17, %v1128_v33  ;;  %v1817_v42 = vmul.f32 0.35355338, %v1813_v35  ;;  %v1652_v45 = vsel %vm546_vm1, %v1651_v44, -inf  ;;  %v5829_v33 = vld [vmem:[%s7327_s16] sm:$0xff]  }
 0x910   :  { %5461 = vmatpush3.bf16.msra.mxu0 %v5829_v33  ;;  %v5830_v36 = vld [vmem:[%s7327_s16 + $0x8] sm:$0xff]  }
 0x911   :  { %v1130_v40 = vsel %vm546_vm1, %v1129_v37, -inf  ;;  %v1818_v46 = vadd.f32 %v6664_v63, %v1817_v42  ;;  %5462 = vmatprep.subr.bf16.mxu0 %v6186_v5 }
 0x912   :  { %1131 = vmax.xlane.f32.xlu0 %v1130_v40 }
 0x913   :  { %v1819_v17 = vsel %vm546_vm1, %v1818_v46, -inf }
 0x914   :  { %5463 = vmatpush3.bf16.msra.mxu0 %v5830_v36 }
 0x915   :  { %5488 = vmatprep.subr.bf16.mxu0 %v6186_v5 }
 0x916   :  { %1485 = vmax.xlane.f32.xlu0 %v1484_v43 }
 0x91a   :  { %1653 = vmax.xlane.f32.xlu0 %v1652_v45 }
 0x91e   :  { %1820 = vmax.xlane.f32.xlu0 %v1819_v17 }
 0x922   :  { %1327 = vadd.xlane.f32.xlu0 %v1326_v50 }
 0x99f   :  { %v1132_v51 = vpop.xlane.xlu0 %1131 }
 0x9a0   :  { %v1133_v58 = vsub.f32 %v1129_v37, %v1132_v51 }
 0x9a2   :  { %v1134_v63 = vmul.f32 1.442695, %v1133_v58 }
 0x9a3   :  { %v1486_v52 = vpop.xlane.xlu0 %1485 }
 0x9a4   :  { %v1487_v53 = vsub.f32 %v1483_v41, %v1486_v52 }
 0x9a6   :  { %v1488_v55 = vmul.f32 1.442695, %v1487_v53 }
 0x9a7   :  { %v1654_v56 = vpop.xlane.xlu0 %1653 }
 0x9a8   :  { %5931 = vpow2.f32 %v1488_v55  ;;  %v1655_v57 = vsub.f32 %v1651_v44, %v1654_v56 }
 0x9aa   :  { %v1656_v59 = vmul.f32 1.442695, %v1655_v57 }
 0x9ab   :  { %v1821_v60 = vpop.xlane.xlu0 %1820 }
 0x9ac   :  { %5933 = vpow2.f32 %v1656_v59  ;;  %v1822_v61 = vsub.f32 %v1818_v46, %v1821_v60 }
 0x9ae   :  { %v1823_v62 = vmul.f32 1.442695, %v1822_v61 }
 0x9af   :  { %v1328_v10 = vpop.xlane.xlu0 %1327 }
 0x9b0   :  { %5935 = vpow2.f32 %v1823_v62 }
 0x9b1   :  { %5937 = vpow2.f32 %v1134_v63 }
 0x9b2   :  { %v5932_v0 = vpop.eup %5931 }
 0x9b3   :  { %v1490_v1 = vsel %vm546_vm1, %v5932_v0, 0.0 }
 0x9b4   :  { %1491 = vadd.xlane.f32.xlu1 %v1490_v1 }
 0x9b6   :  { %v5934_v2 = vpop.eup %5933 }
 0x9b7   :  { %v1658_v6 = vsel %vm546_vm1, %v5934_v2, 0.0 }
 0x9b8   :  { %1659 = vadd.xlane.f32.xlu0 %v1658_v6 }
 0x9ba   :  { %v5936_v7 = vpop.eup %5935 }
 0x9bb   :  { %v1825_v8 = vsel %vm546_vm1, %v5936_v7, 0.0  ;;  %v5938_v3 = vpop.eup %5937 }
 0x9bc   :  { %1826 = vadd.xlane.f32.xlu1 %v1825_v8  ;;  %v1136_v9 = vsel %vm546_vm1, %v5938_v3, 0.0 }
 0x9c0   :  { %1137 = vadd.xlane.f32.xlu1 %v1136_v9 }
 0x9ce   :  { %1141 = vrot.lane.b32.xlu0 %v6594_v11, %s7302_s14 }
 0x9d1   :  { %1496 = vrot.lane.b32.xlu1 %v6596_v14, %s6188_s0 }
 0x9d5   :  { %1663 = vrot.lane.b32.xlu1 %v6596_v14, %s6189_s11 }
 0x9d9   :  { %1830 = vrot.lane.b32.xlu1 %v6596_v14, %s7302_s14 }
 0xa41   :  { %v1492_v12 = vpop.xlane.xlu1 %1491 }
 0xa45   :  { %v1660_v13 = vpop.xlane.xlu0 %1659 }
 0xa49   :  { %v1827_v15 = vpop.xlane.xlu1 %1826  ;;  %v1142_v16 = vpop.permute.xlu0 %1141 }
 0xa4a   :  { %5416 = vmatpush3.msra.mxu1 %v1142_v16  ;;  %v5837_v16 = vld [vmem:[#allocation2 + $0x30] sm:$0xff]  }
 0xa4b   :  { %5425 = vmatprep.subr.mxu1 %v6186_v5 }
 0xa4d   :  { %v1138_v18 = vpop.xlane.xlu1 %1137 }
 0xa4e   :  { %5939 = vrcp.f32 %v1138_v18  ;;  %v5838_v18 = vld [vmem:[#allocation2 + $0x38] sm:$0xff]  }
 0xa4f   :  { %5941 = vrcp.f32 %v1328_v10  ;;  %v5831_v10 = vld [vmem:[#allocation2] sm:$0xff]  }
 0xa50   :  { %5943 = vrcp.f32 %v1492_v12  ;;  %v5832_v12 = vld [vmem:[#allocation2 + $0x8] sm:$0xff]  }
 0xa51   :  { %5945 = vrcp.f32 %v1660_v13  ;;  %v1497_v20 = vpop.permute.xlu1 %1496  ;;  %v5833_v13 = vld [vmem:[#allocation2 + $0x10] sm:$0xff]  }
 0xa52   :  { %5947 = vrcp.f32 %v1827_v15  ;;  %v5836_v15 = vld [vmem:[#allocation2 + $0x28] sm:$0xff]  }
 0xa55   :  { %v1664_v25 = vpop.permute.xlu1 %1663 }
 0xa58   :  { %v5940_v11 = vpop.eup %5939 }
 0xa59   :  { %v1140_v19 = vmul.f32 %v5940_v11, %v5938_v3  ;;  %v5942_v4 = vpop.eup %5941  ;;  %v1831_v28 = vpop.permute.xlu1 %1830 }
 0xa5a   :  { %v1330_v21 = vmul.f32 %v5942_v4, %v5930_v49  ;;  %v5944_v22 = vpop.eup %5943 }
 0xa5b   :  { %5418 = vmatmul.mubr.msk.f32.vlgmr.msra.gmra.mrb[12].mxu1 %vm546_vm1, %v1140_v19  ;;  %v1494_v23 = vmul.f32 %v5944_v22, %v5932_v0  ;;  %v5946_v26 = vpop.eup %5945 }
 0xa5c   :  { %5426 = vmatpush3.msra.mxu1 %v6596_v14  ;;  %5427 = vmatprep.mubr.msk.f32.mxu1 %vm6187_vm0, %v6186_v5  ;;  %v1662_v14 = vmul.f32 %v5946_v26, %v5934_v2  ;;  %v5948_v27 = vpop.eup %5947 }
 0xa5d   :  { %5435 = vmatprep.subr.mxu1 %v6186_v5  ;;  %v1829_v29 = vmul.f32 %v5948_v27, %v5936_v7 }
 0xa5f   :  { %5428 = vmatmul.mubr.msk.f32.vlgmr.msra.gmra.mrb[14].mxu1 %vm546_vm1, %v1330_v21 }
 0xa60   :  { %5436 = vmatpush3.msra.mxu1 %v1497_v20  ;;  %5437 = vmatprep.mubr.msk.f32.mxu1 %vm6187_vm0, %v6186_v5 }
 0xa61   :  { %5445 = vmatprep.subr.mxu1 %v6186_v5 }
 0xa63   :  { %5438 = vmatmul.mubr.msk.f32.vlgmr.msra.gmra.mrb[16].mxu1 %vm546_vm1, %v1494_v23 }
 0xa64   :  { %5446 = vmatpush3.msra.mxu1 %v1664_v25  ;;  %5447 = vmatprep.mubr.msk.f32.mxu1 %vm6187_vm0, %v6186_v5 }
 0xa65   :  { %5455 = vmatprep.subr.mxu1 %v6186_v5 }
 0xa67   :  { %5448 = vmatmul.mubr.msk.f32.vlgmr.msra.gmra.mrb[18].mxu1 %vm546_vm1, %v1662_v14 }
 0xa68   :  { %5456 = vmatpush3.msra.mxu1 %v1831_v28  ;;  %5457 = vmatprep.mubr.msk.f32.mxu1 %vm6187_vm0, %v6186_v5 }
 0xa69   :  { %5468 = vmatprep.subr.bf16.mxu1 %v6186_v5 }
 0xa6b   :  { %5458 = vmatmul.mubr.msk.f32.vlgmr.msra.gmra.mrb[20].mxu1 %vm546_vm1, %v1829_v29 }
 0xa6c   :  { %5484 = vmatprep.mubr.msk.bf16.mxu1 %vm6187_vm0, %v6186_v5  ;;  %5469 = vmatpush3.bf16.msra.mxu1 %v5831_v10 }
 0xa6d   :  { %5470 = vmatprep.subr.bf16.mxu1 %v6186_v5 }
 0xa70   :  { %5471 = vmatpush3.bf16.msra.mxu1 %v5832_v12 }
 0xa71   :  { %5472 = vmatprep.subr.bf16.mxu1 %v6186_v5 }
 0xa74   :  { %5473 = vmatpush3.bf16.msra.mxu1 %v5833_v13 }
 0xa75   :  { %5474 = vmatprep.subr.bf16.mxu1 %v6186_v5 }
 0xb2e   :  { %v1213_v30 = vpop.f32.mrb[12].mxu1 }
 0xb2f   :  { %v5419_v31 = vpop.f32.mrb[13].mxu1 }
 0xb32   :  { %v1400_v34 = vpop.f32.mrb[14].mxu1 }
 0xb33   :  { %v5429_v35 = vpop.f32.mrb[15].mxu1 }
 0xb36   :  { %v1568_v37 = vpop.f32.mrb[16].mxu1 }
 0xb37   :  { %v5775_v38 = vpack.i.bf16 %v1568_v37, %v6647_v54  ;;  %v5439_v39 = vpop.f32.mrb[17].mxu1  ;;  %v4944_v37 = vld [vmem:[%s7329_s8] ss:$0 sm:$0xff] }
 0xb39   :  { %5776 = vrot.lane.b32.xlu0 %v5775_v38, %s7300_s3 }
 0xb3a   :  { %v1735_v40 = vpop.f32.mrb[18].mxu1 }
 0xb3b   :  { %v5780_v41 = vpack.i.bf16 %v1735_v40, %v6701_v24  ;;  %v5449_v42 = vpop.f32.mrb[19].mxu1 }
 0xb3c   :  { %v4945_v42 = vld [vmem:[%s7270_s13] ss:$0 sm:$0xff] }
 0xb3d   :  { %5781 = vrot.lane.b32.xlu1 %v5780_v41, %s7298_s20  ;;  %s7331_s20 = smov 8  }
 0xb3e   :  { %v1902_v43 = vpop.f32.mrb[20].mxu1 }
 0xb3f   :  { %v5785_v44 = vpack.i.bf16 %v1902_v43, %v1213_v30  ;;  %v5459_v45 = vpop.f32.mrb[21].mxu1 }
 0xb41   :  { %5786 = vrot.lane.b32.xlu0 %v5785_v44, %s7297_s9  ;;  %s7332_s9 = smov 16  }
 0xbab   :  { %v5777_v54 = vpop.permute.xlu0 %5776 }
 0xbac   :  { %v5779_v17 = vunpack.i.h.bf16 %v5777_v54  ;;  %v5778_v49 = vunpack.i.l.bf16 %v5777_v54 }
 0xbae   :  { %v1918_v24 = vsel %vm546_vm1, %v1400_v34, %v5779_v17  ;;  %v1229_v53 = vsel %vm546_vm1, %v6627_v32, %v5778_v49  ;;  %v4940_v32 = vld [vmem:[%s7328_s12] ss:$0 sm:$0xff]  ;;  %v5840_v17 = vld [vmem:[#allocation5 + $0x8] sm:$0xff]   ;;  %v5841_v49 = vld [vmem:[#allocation5 + $0x10] sm:$0xff]  }
 0xbaf   :  { %v5782_v46 = vpop.permute.xlu1 %5781 }
 0xbb0   :  { %v5784_v50 = vunpack.i.h.bf16 %v5782_v46  ;;  %v5783_v51 = vunpack.i.l.bf16 %v5782_v46  ;;  %v5839_v46 = vld [vmem:[#allocation5] sm:$0xff]  }
 0xbb2   :  { %v1919_v57 = vsel %vm1230_vm2, %v1918_v24, %v5784_v50  ;;  %v1231_v58 = vsel %vm1230_vm2, %v1229_v53, %v5783_v51  ;;  %v5842_v50 = vld [vmem:[#allocation5 + $0x18] sm:$0xff]   ;;  %v5843_v51 = vld [vmem:[#allocation5 + $0x20] sm:$0xff]   ;;  %v5845_v24 = vld [vmem:[#allocation5 + $0x30] sm:$0xff]  }
 0xbb3   :  { %v5787_v52 = vpop.permute.xlu0 %5786  ;;  %v5846_v53 = vld [vmem:[#allocation5 + $0x38] sm:$0xff]  }
 0xbb4   :  { %v5789_v55 = vunpack.i.h.bf16 %v5787_v52  ;;  %v5788_v56 = vunpack.i.l.bf16 %v5787_v52  ;;  %v5844_v52 = vld [vmem:[#allocation5 + $0x28] sm:$0xff]  }
 0xbb6   :  { %v1920_v59 = vsel %vm1232_vm3, %v1919_v57, %v5789_v55  ;;  %v1233_v60 = vsel %vm1232_vm3, %v1231_v58, %v5788_v56  ;;  %v4946_v55 = vld [vmem:[%s7272_s15] ss:$0 sm:$0xff] }
 0xbb7   :  { %v1921_v61 = vpack.c.bf16 %v1920_v59, %v1233_v60 }
 0xbb9   :  { %5465 = vmatmul.mubr.msk.bf16.vlgmr.msra.gmra.mrb[24].mxu0 %vm1945_vm4, %v1921_v61 }
 0xbba   :  { %5504 = vmatprep.mubr.msk.bf16.mxu0 %vm6187_vm0, %v6186_v5  ;;  %5489 = vmatpush3.bf16.msra.mxu0 %v5839_v46 }
 0xbbb   :  { %5490 = vmatprep.subr.bf16.mxu0 %v6186_v5 }
 0xbbe   :  { %5491 = vmatpush3.bf16.msra.mxu0 %v5840_v17 }
 0xbbf   :  { %5492 = vmatprep.subr.bf16.mxu0 %v6186_v5 }
 0xbc2   :  { %5493 = vmatpush3.bf16.msra.mxu0 %v5841_v49 }
 0xbc3   :  { %5494 = vmatprep.subr.bf16.mxu0 %v6186_v5 }
 0xbc6   :  { %5495 = vmatpush3.bf16.msra.mxu0 %v5842_v50 }
 0xbc7   :  { %5496 = vmatprep.subr.bf16.mxu0 %v6186_v5 }
 0xbca   :  { %5497 = vmatpush3.bf16.msra.mxu0 %v5843_v51 }
 0xbcb   :  { %5498 = vmatprep.subr.bf16.mxu0 %v6186_v5 }
 0xbce   :  { %5499 = vmatpush3.bf16.msra.mxu0 %v5844_v52 }
 0xbcf   :  { %5500 = vmatprep.subr.bf16.mxu0 %v6186_v5 }
 0xbd2   :  { %5501 = vmatpush3.bf16.msra.mxu0 %v5845_v24 }
 0xbd3   :  { %5502 = vmatprep.subr.bf16.mxu0 %v6186_v5 }
 0xbd6   :  { %5503 = vmatpush3.bf16.msra.mxu0 %v5846_v53 }
 0xbd7   :  { %5528 = vmatprep.subr.bf16.mxu0 %v6186_v5 }
 0xc8c   :  { %v1983_v63 = vpop.f32.mrb[24].mxu0 }
 0xc8d   :  { %v1984_v62 = vadd.f32 %v4940_v32, %v1983_v63  ;;  %v5466_v0 = vpop.f32.mrb[25].mxu0 }
 0xc8e   :  { %v1986_v1 = vpop.f32.mrb[26].mxu0 }
 0xc8f   :  { %v1990_v2 = vadd.f32 %v1984_v62, %v6526_v47  ;;  %v1987_v6 = vadd.f32 %v4940_v32, %v1986_v1  ;;  %v5467_v7 = vpop.f32.mrb[27].mxu0  ;;  %v5834_v47 = vld [vmem:[#allocation2 + $0x18] sm:$0xff]  }
 0xc90   :  { %5475 = vmatpush3.bf16.msra.mxu1 %v5834_v47 }
 0xc91   :  { %v1991_v8 = vadd.f32 %v1987_v6, %v6528_v48  ;;  %1994 = vadd.xlane.f32.xlu1 %v1990_v2  ;;  %v1998_v3 = vmul.f32 %v1990_v2, %v1990_v2  ;;  %v5835_v48 = vld [vmem:[#allocation2 + $0x20] sm:$0xff]   ;;  %5476 = vmatprep.subr.bf16.mxu1 %v6186_v5 }
 0xc93   :  { %1996 = vadd.xlane.f32.xlu0 %v1991_v8  ;;  %v1999_v9 = vmul.f32 %v1991_v8, %v1991_v8 }
 0xc94   :  { %5477 = vmatpush3.bf16.msra.mxu1 %v5835_v48 }
 0xc95   :  { %5478 = vmatprep.subr.bf16.mxu1 %v6186_v5 }
 0xc97   :  { %2000 = vadd.xlane.f32.xlu0 %v1998_v3 }
 0xc98   :  { %5479 = vmatpush3.bf16.msra.mxu1 %v5836_v15 }
 0xc99   :  { %5480 = vmatprep.subr.bf16.mxu1 %v6186_v5 }
 0xc9b   :  { %2002 = vadd.xlane.f32.xlu0 %v1999_v9 }
 0xc9c   :  { %5481 = vmatpush3.bf16.msra.mxu1 %v5837_v16 }
 0xc9d   :  { %5482 = vmatprep.subr.bf16.mxu1 %v6186_v5 }
 0xca0   :  { %5483 = vmatpush3.bf16.msra.mxu1 %v5838_v18 }
 0xca1   :  { %5508 = vmatprep.subr.bf16.mxu1 %v6186_v5 }
 0xd1e   :  { %v1995_v11 = vpop.xlane.xlu1 %1994 }
 0xd1f   :  { %v2004_v4 = vmul.f32 0.03125, %v1995_v11  ;;  %v4955_v11 = vld [vmem:[%s7274_s17] ss:$0 sm:$0xff] }
 0xd20   :  { %v1997_v19 = vpop.xlane.xlu0 %1996 }
 0xd21   :  { %v2008_v21 = vmul.f32 %v2004_v4, %v2004_v4  ;;  %v2005_v22 = vmul.f32 0.03125, %v1997_v19  ;;  %v2014_v34 = vsub.f32 %v1990_v2, %v2004_v4 }
 0xd23   :  { %v2009_v14 = vmul.f32 %v2005_v22, %v2005_v22  ;;  %v2015_v38 = vsub.f32 %v1991_v8, %v2005_v22 }
 0xd24   :  { %v2001_v20 = vpop.xlane.xlu0 %2000 }
 0xd25   :  { %v2006_v23 = vmul.f32 0.03125, %v2001_v20 }
 0xd27   :  { %v2010_v25 = vsub.f32 %v2006_v23, %v2008_v21 }
 0xd28   :  { %v2003_v26 = vpop.xlane.xlu0 %2002 }
 0xd29   :  { %v2012_v27 = vmax.f32 %v2010_v25, 0.0  ;;  %v2007_v28 = vmul.f32 0.03125, %v2003_v26 }
 0xd2b   :  { %v2016_v29 = vadd.f32 1e-12, %v2012_v27  ;;  %v2011_v30 = vsub.f32 %v2007_v28, %v2009_v14  ;;  %v5847_v28 = vld [vmem:[%s7318_s1 + $0x40] sm:$0xff]  }
 0xd2d   :  { %5949 = vrsqrt.f32 %v2016_v29  ;;  %v2013_v31 = vmax.f32 %v2011_v30, 0.0  ;;  %v5848_v29 = vld [vmem:[%s7319_s24 + $0x40] sm:$0xff]   ;;  %v5849_v30 = vld [vmem:[%s7318_s1 + $0x48] sm:$0xff]  }
 0xd2f   :  { %v2017_v33 = vadd.f32 1e-12, %v2013_v31  ;;  %v5850_v31 = vld [vmem:[%s7319_s24 + $0x48] sm:$0xff]  }
 0xd31   :  { %5951 = vrsqrt.f32 %v2017_v33  ;;  %v5851_v33 = vld [vmem:[%s7318_s1 + $0x50] sm:$0xff]  }
 0xd37   :  { %v5950_v35 = vpop.eup %5949 }
 0xd38   :  { %v2020_v36 = vmul.f32 %v5950_v35, %v2014_v34  ;;  %v5852_v34 = vld [vmem:[%s7319_s24 + $0x50] sm:$0xff]   ;;  %v5853_v35 = vld [vmem:[%s7318_s1 + $0x58] sm:$0xff]  }
 0xd3a   :  { %v2028_v41 = vmul.f32 %v4944_v37, %v2020_v36  ;;  %v5854_v36 = vld [vmem:[%s7319_s24 + $0x58] sm:$0xff]  }
 0xd3b   :  { %v5952_v39 = vpop.eup %5951 }
 0xd3c   :  { %v2021_v40 = vmul.f32 %v5952_v39, %v2015_v38  ;;  %v6787_v44 = vadd.f32 %v4945_v42, %v2028_v41  ;;  %v5856_v38 = vld [vmem:[%s7319_s24 + $0x60] sm:$0xff]   ;;  %v5857_v39 = vld [vmem:[%s7318_s1 + $0x68] sm:$0xff]   ;;  %v5859_v41 = vld [vmem:[%s7318_s1 + $0x70] sm:$0xff]  }
 0xd3e   :  { %v2029_v43 = vmul.f32 %v4944_v37, %v2021_v40  ;;  %v5855_v37 = vld [vmem:[%s7318_s1 + $0x60] sm:$0xff]   ;;  %v5858_v40 = vld [vmem:[%s7319_s24 + $0x68] sm:$0xff]  }
 0xd40   :  { %v6789_v45 = vadd.f32 %v4945_v42, %v2029_v43  ;;  %v5860_v42 = vld [vmem:[%s7319_s24 + $0x70] sm:$0xff]   ;;  %v5861_v43 = vld [vmem:[%s7318_s1 + $0x78] sm:$0xff]   ;;  %s7333_s1 = smov 24  }
 0xd42   :  { %v2038_v54 = vpack.c.bf16 %v6789_v45, %v6787_v44 }
 0xd44   :  { %5485 = vmatmul.mubr.bf16.vlgmr.msra.gmra.mrb[24].mxu1 %v2038_v54 }
 0xd45   :  { %5524 = vmatprep.mubr.msk.bf16.mxu1 %vm6187_vm0, %v6186_v5  ;;  %5509 = vmatpush3.bf16.msra.mxu1 %v5847_v28 }
 0xd46   :  { %5510 = vmatprep.subr.bf16.mxu1 %v6186_v5 }
 0xd49   :  { %5511 = vmatpush3.bf16.msra.mxu1 %v5849_v30 }
 0xd4a   :  { %5512 = vmatprep.subr.bf16.mxu1 %v6186_v5 }
 0xd4d   :  { %5513 = vmatpush3.bf16.msra.mxu1 %v5851_v33  ;;  %v5035_v33 = vld [vmem:[%s7325_s6 + $0x1] ss:$0 sm:$0xff]  ;;  %s7330_s6 = smov 104  }
 0xd4e   :  { %5514 = vmatprep.subr.bf16.mxu1 %v6186_v5 }
 0xd51   :  { %5515 = vmatpush3.bf16.msra.mxu1 %v5853_v35 }
 0xd52   :  { %5516 = vmatprep.subr.bf16.mxu1 %v6186_v5 }
 0xd55   :  { %5517 = vmatpush3.bf16.msra.mxu1 %v5855_v37 }
 0xd56   :  { %5518 = vmatprep.subr.bf16.mxu1 %v6186_v5 }
 0xd59   :  { %5519 = vmatpush3.bf16.msra.mxu1 %v5857_v39 }
 0xd5a   :  { %5520 = vmatprep.subr.bf16.mxu1 %v6186_v5 }
 0xd5d   :  { %5521 = vmatpush3.bf16.msra.mxu1 %v5859_v41 }
 0xd5e   :  { %5522 = vmatprep.subr.bf16.mxu1 %v6186_v5 }
 0xd61   :  { %5523 = vmatpush3.bf16.msra.mxu1 %v5861_v43  ;;  %v6972_v43 = vld [vmem:[%s7326_s10] ss:$0 sm:$0xff] }
 0xd62   :  { %5548 = vmatprep.subr.bf16.mxu1 %v6186_v5 }
 0xe17   :  { %v2144_v56 = vpop.f32.mrb[24].mxu1 }
 0xe18   :  { %v2145_v57 = vadd.f32 %v4946_v55, %v2144_v56  ;;  %v5486_v58 = vpop.f32.mrb[25].mxu1 }
 0xe19   :  { %v2147_v59 = vpop.f32.mrb[26].mxu1 }
 0xe1a   :  { %v2153_v60 = vmul.f32 0.044715, %v2145_v57  ;;  %v2148_v61 = vadd.f32 %v4946_v55, %v2147_v59  ;;  %v5487_v32 = vpop.f32.mrb[27].mxu1  ;;  %v2151_v13 = vmul.f32 0.5, %v2145_v57 }
 0xe1c   :  { %v2155_v63 = vmul.f32 %v2153_v60, %v2145_v57  ;;  %v2154_v62 = vmul.f32 0.044715, %v2148_v61  ;;  %v2152_v47 = vmul.f32 0.5, %v2148_v61 }
 0xe1e   :  { %v2157_v0 = vmul.f32 %v2155_v63, %v2145_v57  ;;  %v2156_v1 = vmul.f32 %v2154_v62, %v2148_v61  ;;  %v4964_v63 = vld [vmem:[%s7275_s18] ss:$0 sm:$0xff] }
 0xe20   :  { %v2159_v2 = vadd.f32 %v2157_v0, %v2145_v57  ;;  %v2158_v6 = vmul.f32 %v2156_v1, %v2148_v61 }
 0xe22   :  { %v2161_v7 = vmul.f32 0.7978846, %v2159_v2  ;;  %v2160_v8 = vadd.f32 %v2158_v6, %v2148_v61 }
 0xe24   :  { %5953 = vtanh.f32 %v2161_v7  ;;  %v2162_v3 = vmul.f32 0.7978846, %v2160_v8  ;;  %v4965_v7 = vld [vmem:[%s7276_s19] ss:$0 sm:$0xff] }
 0xe26   :  { %5955 = vtanh.f32 %v2162_v3 }
 0xe2e   :  { %v5954_v9 = vpop.eup %5953 }
 0xe2f   :  { %v2165_v10 = vadd.f32 1.0, %v5954_v9 }
 0xe30   :  { %v5956_v12 = vpop.eup %5955 }
 0xe31   :  { %v2166_v48 = vadd.f32 1.0, %v5956_v12  ;;  %v2167_v15 = vmul.f32 %v2165_v10, %v2151_v13  ;;  %v5863_v10 = vld [vmem:[%s7322_s30 + $0x40] sm:$0xff]   ;;  %v5864_v13 = vld [vmem:[%s7322_s30 + $0x48] sm:$0xff]  }
 0xe33   :  { %v2168_v16 = vmul.f32 %v2166_v48, %v2152_v47  ;;  %v5865_v47 = vld [vmem:[%s7322_s30 + $0x50] sm:$0xff]   ;;  %v5866_v48 = vld [vmem:[%s7322_s30 + $0x58] sm:$0xff]  }
 0xe35   :  { %v2169_v18 = vpack.c.bf16 %v2168_v16, %v2167_v15  ;;  %v5867_v15 = vld [vmem:[%s7322_s30 + $0x60] sm:$0xff]   ;;  %v5868_v16 = vld [vmem:[%s7322_s30 + $0x68] sm:$0xff]  }
 0xe37   :  { %5505 = vmatmul.mubr.bf16.vlgmr.msra.gmra.mrb[28].mxu0 %v2169_v18  ;;  %v5869_v18 = vld [vmem:[%s7322_s30 + $0x70] sm:$0xff]  }
 0xe38   :  { %5544 = vmatprep.mubr.msk.bf16.mxu0 %vm6187_vm0, %v6186_v5  ;;  %5529 = vmatpush3.bf16.msra.mxu0 %v5848_v29 }
 0xe39   :  { %5530 = vmatprep.subr.bf16.mxu0 %v6186_v5 }
 0xe3c   :  { %5531 = vmatpush3.bf16.msra.mxu0 %v5850_v31 }
 0xe3d   :  { %5532 = vmatprep.subr.bf16.mxu0 %v6186_v5 }
 0xe40   :  { %5533 = vmatpush3.bf16.msra.mxu0 %v5852_v34 }
 0xe41   :  { %5534 = vmatprep.subr.bf16.mxu0 %v6186_v5 }
 0xe44   :  { %5535 = vmatpush3.bf16.msra.mxu0 %v5854_v36 }
 0xe45   :  { %5536 = vmatprep.subr.bf16.mxu0 %v6186_v5 }
 0xe48   :  { %5537 = vmatpush3.bf16.msra.mxu0 %v5856_v38 }
 0xe49   :  { %5538 = vmatprep.subr.bf16.mxu0 %v6186_v5 }
 0xe4c   :  { %5539 = vmatpush3.bf16.msra.mxu0 %v5858_v40 }
 0xe4d   :  { %5540 = vmatprep.subr.bf16.mxu0 %v6186_v5 }
 0xe50   :  { %5541 = vmatpush3.bf16.msra.mxu0 %v5860_v42 }
 0xe51   :  { %5542 = vmatprep.subr.bf16.mxu0 %v6186_v5 }
 0xf0a   :  { %v2275_v19 = vpop.f32.mrb[28].mxu0 }
 0xf0b   :  { %v2276_v4 = vadd.f32 %v4955_v11, %v2275_v19  ;;  %v5506_v20 = vpop.f32.mrb[29].mxu0  ;;  %v5009_v19 = vld [vmem:[%s7323_s2 + $0x1] ss:$0 sm:$0xff] }
 0xf0c   :  { %v2278_v21 = vpop.f32.mrb[30].mxu0 }
 0xf0d   :  { %v6812_v22 = vadd.f32 %v2276_v4, %v6787_v44  ;;  %v2279_v23 = vadd.f32 %v4955_v11, %v2278_v21  ;;  %v5507_v25 = vpop.f32.mrb[31].mxu0  ;;  %v5862_v44 = vld [vmem:[%s7319_s24 + $0x78] sm:$0xff]   ;;  %v4983_v21 = vld [vmem:[%s7324_s7 + $0x1] ss:$0 sm:$0xff] }
 0xf0e   :  { %5543 = vmatpush3.bf16.msra.mxu0 %v5862_v44  ;;  %v5870_v11 = vld [vmem:[%s7322_s30 + $0x78] sm:$0xff]  }
 0xf0f   :  { %v6815_v26 = vadd.f32 %v2279_v23, %v6789_v45  ;;  %2286 = vadd.xlane.f32.xlu1 %v6812_v22  ;;  %v2290_v14 = vmul.f32 %v6812_v22, %v6812_v22  ;;  %5568 = vmatprep.subr.mxu0 %v6186_v5 }
 0xf11   :  { %2288 = vadd.xlane.f32.xlu0 %v6815_v26  ;;  %v2291_v27 = vmul.f32 %v6815_v26, %v6815_v26 }
 0xf13   :  { %2292 = vadd.xlane.f32.xlu1 %v2290_v14 }
 0xf15   :  { %2294 = vadd.xlane.f32.xlu0 %v2291_v27 }
 0xf9c   :  { %v2287_v45 = vpop.xlane.xlu1 %2286 }
 0xf9d   :  { %v2296_v54 = vmul.f32 0.03125, %v2287_v45 }
 0xf9e   :  { %v2289_v46 = vpop.xlane.xlu0 %2288 }
 0xf9f   :  { %v2297_v17 = vmul.f32 0.03125, %v2289_v46  ;;  %v2300_v50 = vmul.f32 %v2296_v54, %v2296_v54  ;;  %v2306_v61 = vsub.f32 %v6812_v22, %v2296_v54 }
 0xfa0   :  { %v2293_v49 = vpop.xlane.xlu1 %2292 }
 0xfa1   :  { %v2298_v51 = vmul.f32 0.03125, %v2293_v49  ;;  %v2301_v24 = vmul.f32 %v2297_v17, %v2297_v17  ;;  %v2307_v62 = vsub.f32 %v6815_v26, %v2297_v17 }
 0xfa2   :  { %v2295_v52 = vpop.xlane.xlu0 %2294 }
 0xfa3   :  { %v2302_v53 = vsub.f32 %v2298_v51, %v2300_v50  ;;  %v2299_v55 = vmul.f32 0.03125, %v2295_v52 }
 0xfa5   :  { %v2304_v56 = vmax.f32 %v2302_v53, 0.0  ;;  %v2303_v57 = vsub.f32 %v2299_v55, %v2301_v24 }
 0xfa7   :  { %v2308_v58 = vadd.f32 1e-12, %v2304_v56  ;;  %v2305_v59 = vmax.f32 %v2303_v57, 0.0 }
 0xfa9   :  { %5957 = vrsqrt.f32 %v2308_v58  ;;  %v2309_v60 = vadd.f32 1e-12, %v2305_v59 }
 0xfab   :  { %5959 = vrsqrt.f32 %v2309_v60 }
 0xfb3   :  { %v5958_v32 = vpop.eup %5957 }
 0xfb4   :  { %v2312_v0 = vmul.f32 %v5958_v32, %v2306_v61 }
 0xfb5   :  { %v5960_v1 = vpop.eup %5959 }
 0xfb6   :  { %v2313_v2 = vmul.f32 %v5960_v1, %v2307_v62  ;;  %v2320_v6 = vmul.f32 %v4964_v63, %v2312_v0 }
 0xfb8   :  { %v2321_v8 = vmul.f32 %v4964_v63, %v2313_v2  ;;  %v6895_v3 = vadd.f32 %v4965_v7, %v2320_v6 }
 0xfba   :  { %v6897_v9 = vadd.f32 %v4965_v7, %v2321_v8 }
 0xfbc   :  { %v2330_v12 = vpack.c.bf16 %v6897_v9, %v6895_v3 }
 0xfbe   :  { %5525 = vmatmul.mubr.bf16.vlgmr.msra.gmra.mrb[28].mxu1 %v2330_v12  ;;  %5545 = vmatmul.mubr.bf16.vlgmr.msra.gmra.mrb[32].mxu0 %v2330_v12 }
 0xfbf   :  { %5549 = vmatpush3.bf16.msra.mxu1 %v5863_v10  ;;  %5564 = vmatprep.mubr.msk.bf16.mxu1 %vm6187_vm0, %v6186_v5 }
 0xfc0   :  { %5550 = vmatprep.subr.bf16.mxu1 %v6186_v5  ;;  %5570 = vmatprep.mubr.msk.f32.mxu0 %vm6187_vm0, %v6186_v5 }
 0xfc3   :  { %5551 = vmatpush3.bf16.msra.mxu1 %v5864_v13 }
 0xfc4   :  { %5552 = vmatprep.subr.bf16.mxu1 %v6186_v5 }
 0xfc7   :  { %5553 = vmatpush3.bf16.msra.mxu1 %v5865_v47 }
 0xfc8   :  { %5554 = vmatprep.subr.bf16.mxu1 %v6186_v5 }
 0xfcb   :  { %5555 = vmatpush3.bf16.msra.mxu1 %v5866_v48 }
 0xfcc   :  { %5556 = vmatprep.subr.bf16.mxu1 %v6186_v5 }
 0xfcf   :  { %5557 = vmatpush3.bf16.msra.mxu1 %v5867_v15 }
 0xfd0   :  { %5558 = vmatprep.subr.bf16.mxu1 %v6186_v5 }
 0xfd3   :  { %5559 = vmatpush3.bf16.msra.mxu1 %v5868_v16 }
 0xfd4   :  { %5560 = vmatprep.subr.bf16.mxu1 %v6186_v5 }
 0xfd7   :  { %5561 = vmatpush3.bf16.msra.mxu1 %v5869_v18 }
 0xfd8   :  { %5562 = vmatprep.subr.bf16.mxu1 %v6186_v5 }
 0xfdb   :  { %5563 = vmatpush3.bf16.msra.mxu1 %v5870_v11 }
 0xfdc   :  { %5603 = vmatprep.subr.mxu1 %v6186_v5 }
 0xfde   :  { %5565 = vmatmul.mubr.bf16.vlgmr.msra.gmra.mrb[32].mxu1 %v2330_v12 }
 0xfdf   :  { %5605 = vmatprep.mubr.msk.f32.mxu1 %vm6187_vm0, %v6186_v5 }
0x1091   :  { %v2438_v4 = vpop.f32.mrb[28].mxu1  ;;  %v2552_v20 = vpop.f32.mrb[32].mxu0 }
0x1092   :  { %v6945_v22 = vadd.f32 %v5009_v19, %v2552_v20  ;;  %v5526_v23 = vpop.f32.mrb[29].mxu1  ;;  %v5546_v25 = vpop.f32.mrb[33].mxu0  ;;  %v6953_v31 = vadd.f32 %v4983_v21, %v2438_v4 }
0x1093   :  { %v2441_v26 = vpop.f32.mrb[30].mxu1  ;;  %v2555_v14 = vpop.f32.mrb[34].mxu0 }
0x1094   :  { %v6947_v27 = vadd.f32 %v4983_v21, %v2441_v26  ;;  %v6949_v28 = vadd.f32 %v5009_v19, %v2555_v14  ;;  %v5527_v29 = vpop.f32.mrb[31].mxu1  ;;  %v5547_v30 = vpop.f32.mrb[35].mxu0  ;;  %5569 = vmatpush3.xpose.msk.msra.mxu0 %vm546_vm1, %v6945_v22 }
0x1095   :  { %5573 = vmatprep.subr.mxu0 %v6186_v5 }
0x1097   :  { %5571 = vmatmul.mubr.msk.f32.vlgmr.msra.gmra.mrb[22].mxu0 %vm546_vm1, %v6953_v31 }
0x1098   :  { %5575 = vmatprep.mubr.msk.f32.mxu0 %vm6187_vm0, %v6186_v5 }
0x10b1   :  { %v2666_v34 = vpop.f32.mrb[32].mxu1 }
0x10b2   :  { %v6963_v35 = vadd.f32 %v5035_v33, %v2666_v34  ;;  %v5566_v36 = vpop.f32.mrb[33].mxu1 }
0x10b3   :  { %v2669_v37 = vpop.f32.mrb[34].mxu1 }
0x10b4   :  { %v6965_v38 = vadd.f32 %v5035_v33, %v2669_v37  ;;  %v5567_v39 = vpop.f32.mrb[35].mxu1  ;;  %5574 = vmatpush3.msra.mxu0 %v6963_v35 }
0x10b5   :  { %5578 = vmatprep.subr.mxu0 %v6186_v5 }
0x116a   :  { %v2745_v40 = vpop.f32.mrb[22].mxu0 }
0x116b   :  { %v2749_v41 = vmul.f32 0.35355338, %v2745_v40  ;;  %v5572_v42 = vpop.f32.mrb[23].mxu0 }
0x116d   :  { %v2750_v44 = vadd.f32 %v6972_v43, %v2749_v41 }
0x116f   :  { %v2751_v45 = vsel %vm546_vm1, %v2750_v44, -inf }
0x1170   :  { %2752 = vmax.xlane.f32.xlu1 %v2751_v45 }
0x1181   :  { %2837 = vrot.lane.b32.xlu1 %v6945_v22, %s6188_s0 }
0x11fd   :  { %v2753_v54 = vpop.xlane.xlu1 %2752 }
0x11fe   :  { %v2754_v46 = vsub.f32 %v2750_v44, %v2753_v54 }
0x1200   :  { %v2755_v17 = vmul.f32 1.442695, %v2754_v46 }
0x1201   :  { %v2838_v53 = vpop.permute.xlu1 %2837 }
0x1202   :  { %5961 = vpow2.f32 %v2755_v17 }
0x120c   :  { %v5962_v49 = vpop.eup %5961 }
0x120d   :  { %v2757_v50 = vsel %vm546_vm1, %v5962_v49, 0.0 }
0x120e   :  { %2758 = vadd.xlane.f32.xlu0 %v2757_v50  ;;  %v6014_v50 = vld [vmem:[%s7326_s10 + $0x1] ss:$0 sm:$0xff] }
0x1224   :  { %2835 = vrot.lane.b32.xlu0 %v6953_v31, %s6188_s0 }
0x129b   :  { %v2759_v51 = vpop.xlane.xlu0 %2758 }
0x129c   :  { %5963 = vrcp.f32 %v2759_v51 }
0x129f   :  { %v2836_v55 = vpop.permute.xlu0 %2835 }
0x12a6   :  { %v5964_v52 = vpop.eup %5963 }
0x12a7   :  { %v2761_v24 = vmul.f32 %v5964_v52, %v5962_v49 }
0x12a9   :  { %5576 = vmatmul.mubr.msk.f32.vlgmr.msra.gmra.mrb[36].mxu0 %vm546_vm1, %v2761_v24 }
0x12aa   :  { %5579 = vmatpush3.xpose.msk.msra.mxu0 %vm546_vm1, %v2838_v53  ;;  %5580 = vmatprep.mubr.msk.f32.mxu0 %vm6187_vm0, %v6186_v5 }
0x12ab   :  { %5583 = vmatprep.subr.mxu0 %v6186_v5 }
0x12ad   :  { %5581 = vmatmul.mubr.msk.f32.vlgmr.msra.gmra.mrb[38].mxu0 %vm546_vm1, %v2836_v55 }
0x12ae   :  { %5585 = vmatprep.mubr.msk.f32.mxu0 %vm6187_vm0, %v6186_v5 }
0x137c   :  { %v6989_v56 = vpop.f32.mrb[36].mxu0 }
0x137d   :  { %v5577_v57 = vpop.f32.mrb[37].mxu0 }
0x1380   :  { %v2909_v58 = vpop.f32.mrb[38].mxu0 }
0x1381   :  { %v2913_v59 = vmul.f32 0.35355338, %v2909_v58  ;;  %v5582_v60 = vpop.f32.mrb[39].mxu0 }
0x1383   :  { %v2914_v61 = vadd.f32 %v6972_v43, %v2913_v59 }
0x1385   :  { %v2915_v32 = vsel %vm546_vm1, %v2914_v61, -inf }
0x1386   :  { %2916 = vmax.xlane.f32.xlu1 %v2915_v32 }
0x1397   :  { %2927 = vrot.lane.b32.xlu1 %v6963_v35, %s6188_s0 }
0x139b   :  { %3003 = vrot.lane.b32.xlu1 %v6953_v31, %s6189_s11 }
0x1413   :  { %v2917_v63 = vpop.xlane.xlu1 %2916 }
0x1414   :  { %v2918_v62 = vsub.f32 %v2914_v61, %v2917_v63 }
0x1416   :  { %v2919_v0 = vmul.f32 1.442695, %v2918_v62 }
0x1417   :  { %v2928_v1 = vpop.permute.xlu1 %2927 }
0x1418   :  { %5965 = vpow2.f32 %v2919_v0  ;;  %5584 = vmatpush3.msra.mxu0 %v2928_v1 }
0x1419   :  { %5588 = vmatprep.subr.mxu0 %v6186_v5 }
0x141b   :  { %v3004_v13 = vpop.permute.xlu1 %3003 }
0x1422   :  { %v5966_v2 = vpop.eup %5965 }
0x1423   :  { %v2921_v6 = vsel %vm546_vm1, %v5966_v2, 0.0 }
0x1424   :  { %2922 = vadd.xlane.f32.xlu0 %v2921_v6 }
0x143a   :  { %3005 = vrot.lane.b32.xlu0 %v6945_v22, %s6189_s11 }
0x14b1   :  { %v2923_v7 = vpop.xlane.xlu0 %2922 }
0x14b2   :  { %5967 = vrcp.f32 %v2923_v7 }
0x14b5   :  { %v3006_v12 = vpop.permute.xlu0 %3005 }
0x14bc   :  { %v5968_v8 = vpop.eup %5967 }
0x14bd   :  { %v2925_v10 = vmul.f32 %v5968_v8, %v5966_v2 }
0x14bf   :  { %5586 = vmatmul.mubr.msk.f32.vlgmr.msra.gmra.mrb[40].mxu0 %vm546_vm1, %v2925_v10 }
0x14c0   :  { %5589 = vmatpush3.xpose.msk.msra.mxu0 %vm546_vm1, %v3006_v12  ;;  %5590 = vmatprep.mubr.msk.f32.mxu0 %vm6187_vm0, %v6186_v5 }
0x14c1   :  { %5593 = vmatprep.subr.mxu0 %v6186_v5 }
0x14c3   :  { %5591 = vmatmul.mubr.msk.f32.vlgmr.msra.gmra.mrb[42].mxu0 %vm546_vm1, %v3004_v13 }
0x14c4   :  { %5595 = vmatprep.mubr.msk.f32.mxu0 %vm6187_vm0, %v6186_v5 }
0x1592   :  { %v7009_v47 = vpop.f32.mrb[40].mxu0 }
0x1593   :  { %v5587_v48 = vpop.f32.mrb[41].mxu0 }
0x1596   :  { %v3077_v15 = vpop.f32.mrb[42].mxu0 }
0x1597   :  { %v3081_v16 = vmul.f32 0.35355338, %v3077_v15  ;;  %v5592_v18 = vpop.f32.mrb[43].mxu0 }
0x1599   :  { %v3082_v11 = vadd.f32 %v6972_v43, %v3081_v16 }
0x159b   :  { %v3083_v19 = vsel %vm546_vm1, %v3082_v11, -inf }
0x159c   :  { %3084 = vmax.xlane.f32.xlu1 %v3083_v19 }
0x15ad   :  { %3172 = vrot.lane.b32.xlu1 %v6945_v22, %s7330_s6 }
0x15b1   :  { %3170 = vrot.lane.b32.xlu1 %v6953_v31, %s7330_s6 }
0x15b5   :  { %3516 = vrot.lane.b32.xlu1 %v6949_v28, %s6188_s0 }
0x15b9   :  { %3684 = vrot.lane.b32.xlu1 %v6949_v28, %s6189_s11 }
0x15bd   :  { %3851 = vrot.lane.b32.xlu1 %v6949_v28, %s7330_s6 }
0x1629   :  { %v3085_v4 = vpop.xlane.xlu1 %3084 }
0x162a   :  { %v3086_v20 = vsub.f32 %v3082_v11, %v3085_v4 }
0x162c   :  { %v3087_v21 = vmul.f32 1.442695, %v3086_v20 }
0x162d   :  { %v3173_v14 = vpop.permute.xlu1 %3172 }
0x162e   :  { %5969 = vpow2.f32 %v3087_v21 }
0x1631   :  { %v3171_v30 = vpop.permute.xlu1 %3170 }
0x1635   :  { %v3517_v33 = vpop.permute.xlu1 %3516 }
0x1638   :  { %v5970_v23 = vpop.eup %5969 }
0x1639   :  { %v3089_v25 = vsel %vm546_vm1, %v5970_v23, 0.0  ;;  %v3685_v36 = vpop.permute.xlu1 %3684 }
0x163a   :  { %3090 = vadd.xlane.f32.xlu0 %v3089_v25 }
0x163d   :  { %v3852_v37 = vpop.permute.xlu1 %3851 }
0x1650   :  { %3094 = vrot.lane.b32.xlu0 %v6963_v35, %s6189_s11 }
0x1654   :  { %3514 = vrot.lane.b32.xlu0 %v6947_v27, %s6188_s0 }
0x1658   :  { %3682 = vrot.lane.b32.xlu0 %v6947_v27, %s6189_s11 }
0x165c   :  { %3849 = vrot.lane.b32.xlu0 %v6947_v27, %s7330_s6 }
0x16c7   :  { %v3091_v22 = vpop.xlane.xlu0 %3090 }
0x16c8   :  { %5971 = vrcp.f32 %v3091_v22 }
0x16cb   :  { %v3095_v26 = vpop.permute.xlu0 %3094 }
0x16cc   :  { %5594 = vmatpush3.msra.mxu0 %v3095_v26 }
0x16cd   :  { %5598 = vmatprep.subr.mxu0 %v6186_v5 }
0x16cf   :  { %v3515_v34 = vpop.permute.xlu0 %3514 }
0x16d2   :  { %v5972_v29 = vpop.eup %5971 }
0x16d3   :  { %v3093_v31 = vmul.f32 %v5972_v29, %v5970_v23 }
0x16d5   :  { %5596 = vmatmul.mubr.msk.f32.vlgmr.msra.gmra.mrb[44].mxu0 %vm546_vm1, %v3093_v31 }
0x16d6   :  { %5599 = vmatpush3.xpose.msk.msra.mxu0 %vm546_vm1, %v3173_v14  ;;  %5600 = vmatprep.mubr.msk.f32.mxu0 %vm6187_vm0, %v6186_v5 }
0x16d7   :  { %5608 = vmatprep.subr.mxu0 %v6186_v5 }
0x16d9   :  { %5601 = vmatmul.mubr.msk.f32.vlgmr.msra.gmra.mrb[46].mxu0 %vm546_vm1, %v3171_v30 }
0x16da   :  { %5609 = vmatpush3.xpose.msk.msra.mxu0 %vm546_vm1, %v6949_v28  ;;  %5610 = vmatprep.mubr.msk.f32.mxu0 %vm6187_vm0, %v6186_v5  ;;  %v3683_v28 = vpop.permute.xlu0 %3682 }
0x16db   :  { %5618 = vmatprep.subr.mxu0 %v6186_v5 }
0x16dd   :  { %5611 = vmatmul.mubr.msk.f32.vlgmr.msra.gmra.mrb[48].mxu0 %vm546_vm1, %v6947_v27 }
0x16de   :  { %5619 = vmatpush3.xpose.msk.msra.mxu0 %vm546_vm1, %v3517_v33  ;;  %5620 = vmatprep.mubr.msk.f32.mxu0 %vm6187_vm0, %v6186_v5  ;;  %v3850_v27 = vpop.permute.xlu0 %3849 }
0x16df   :  { %5628 = vmatprep.subr.mxu0 %v6186_v5 }
0x16e1   :  { %5621 = vmatmul.mubr.msk.f32.vlgmr.msra.gmra.mrb[50].mxu0 %vm546_vm1, %v3515_v34 }
0x16e2   :  { %5629 = vmatpush3.xpose.msk.msra.mxu0 %vm546_vm1, %v3685_v36  ;;  %5630 = vmatprep.mubr.msk.f32.mxu0 %vm6187_vm0, %v6186_v5 }
0x16e3   :  { %5638 = vmatprep.subr.mxu0 %v6186_v5 }
0x16e5   :  { %5631 = vmatmul.mubr.msk.f32.vlgmr.msra.gmra.mrb[52].mxu0 %vm546_vm1, %v3683_v28 }
0x16e6   :  { %5639 = vmatpush3.xpose.msk.msra.mxu0 %vm546_vm1, %v3852_v37  ;;  %5640 = vmatprep.mubr.msk.f32.mxu0 %vm6187_vm0, %v6186_v5 }
0x16e7   :  { %5648 = vmatprep.subr.bf16.mxu0 %v6186_v5 }
0x16e9   :  { %5641 = vmatmul.mubr.msk.f32.vlgmr.msra.gmra.mrb[54].mxu0 %vm546_vm1, %v3850_v27 }
0x16ea   :  { %5652 = vmatprep.mubr.msk.bf16.mxu0 %vm6187_vm0, %v6186_v5 }
0x17a8   :  { %v7063_v39 = vpop.f32.mrb[44].mxu0 }
0x17a9   :  { %v5597_v40 = vpop.f32.mrb[45].mxu0 }
0x17ac   :  { %v3244_v41 = vpop.f32.mrb[46].mxu0 }
0x17ad   :  { %v3248_v42 = vmul.f32 0.35355338, %v3244_v41  ;;  %v5602_v44 = vpop.f32.mrb[47].mxu0 }
0x17af   :  { %v3249_v45 = vadd.f32 %v6972_v43, %v3248_v42 }
0x17b0   :  { %v3424_v54 = vpop.f32.mrb[48].mxu0 }
0x17b1   :  { %v3428_v46 = vmul.f32 0.35355338, %v3424_v54  ;;  %v5612_v17 = vpop.f32.mrb[49].mxu0  ;;  %v3250_v49 = vsel %vm546_vm1, %v3249_v45, -inf }
0x17b2   :  { %3251 = vmax.xlane.f32.xlu1 %v3250_v49 }
0x17b3   :  { %v3429_v51 = vadd.f32 %v6014_v50, %v3428_v46 }
0x17b4   :  { %v3588_v52 = vpop.f32.mrb[50].mxu0 }
0x17b5   :  { %v3592_v24 = vmul.f32 0.35355338, %v3588_v52  ;;  %v5622_v53 = vpop.f32.mrb[51].mxu0  ;;  %v3430_v55 = vsel %vm546_vm1, %v3429_v51, -inf }
0x17b6   :  { %3431 = vmax.xlane.f32.xlu0 %v3430_v55 }
0x17b7   :  { %v3593_v57 = vadd.f32 %v6014_v50, %v3592_v24 }
0x17b8   :  { %v3756_v58 = vpop.f32.mrb[52].mxu0 }
0x17b9   :  { %v3760_v43 = vmul.f32 0.35355338, %v3756_v58  ;;  %v5632_v59 = vpop.f32.mrb[53].mxu0  ;;  %v3594_v60 = vsel %vm546_vm1, %v3593_v57, -inf }
0x17ba   :  { %3595 = vmax.xlane.f32.xlu0 %v3594_v60  ;;  %v5872_v59 = vld [vmem:[%s7327_s16 + $0x18] sm:$0xff]  }
0x17bb   :  { %v3761_v61 = vadd.f32 %v6014_v50, %v3760_v43 }
0x17bc   :  { %v3923_v32 = vpop.f32.mrb[54].mxu0 }
0x17bd   :  { %v3927_v63 = vmul.f32 0.35355338, %v3923_v32  ;;  %v5642_v62 = vpop.f32.mrb[55].mxu0  ;;  %v3762_v0 = vsel %vm546_vm1, %v3761_v61, -inf }
0x17be   :  { %3763 = vmax.xlane.f32.xlu0 %v3762_v0 }
0x17bf   :  { %v3928_v1 = vadd.f32 %v6014_v50, %v3927_v63 }
0x17c1   :  { %v3929_v2 = vsel %vm546_vm1, %v3928_v1, -inf }
0x17c2   :  { %3930 = vmax.xlane.f32.xlu1 %v3929_v2 }
0x17d3   :  { %3261 = vrot.lane.b32.xlu1 %v6963_v35, %s7330_s6 }
0x183f   :  { %v3252_v6 = vpop.xlane.xlu1 %3251 }
0x1840   :  { %v3253_v7 = vsub.f32 %v3249_v45, %v3252_v6 }
0x1842   :  { %v3254_v8 = vmul.f32 1.442695, %v3253_v7 }
0x1843   :  { %v3432_v10 = vpop.xlane.xlu0 %3431 }
0x1844   :  { %5973 = vpow2.f32 %v3254_v8  ;;  %v3433_v12 = vsub.f32 %v3429_v51, %v3432_v10 }
0x1846   :  { %v3434_v13 = vmul.f32 1.442695, %v3433_v12 }
0x1847   :  { %v3596_v48 = vpop.xlane.xlu0 %3595 }
0x1848   :  { %5975 = vpow2.f32 %v3434_v13  ;;  %v3597_v15 = vsub.f32 %v3593_v57, %v3596_v48  ;;  %v5871_v57 = vld [vmem:[%s7327_s16 + $0x10] sm:$0xff]  }
0x1849   :  { %5649 = vmatpush3.bf16.msra.mxu0 %v5871_v57 }
0x184a   :  { %v3598_v16 = vmul.f32 1.442695, %v3597_v15  ;;  %5650 = vmatprep.subr.bf16.mxu0 %v6186_v5 }
0x184b   :  { %v3764_v18 = vpop.xlane.xlu0 %3763 }
0x184c   :  { %5977 = vpow2.f32 %v3598_v16  ;;  %v3765_v11 = vsub.f32 %v3761_v61, %v3764_v18 }
0x184d   :  { %5651 = vmatpush3.bf16.msra.mxu0 %v5872_v59 }
0x184e   :  { %v5974_v19 = vpop.eup %5973  ;;  %v3766_v4 = vmul.f32 1.442695, %v3765_v11  ;;  %5676 = vmatprep.subr.bf16.mxu0 %v6186_v5 }
0x184f   :  { %v3931_v20 = vpop.xlane.xlu1 %3930  ;;  %v3256_v21 = vsel %vm546_vm1, %v5974_v19, 0.0 }
0x1850   :  { %5979 = vpow2.f32 %v3766_v4  ;;  %v3932_v35 = vsub.f32 %v3928_v1, %v3931_v20  ;;  %3257 = vadd.xlane.f32.xlu0 %v3256_v21 }
0x1852   :  { %v5976_v23 = vpop.eup %5975  ;;  %v3933_v25 = vmul.f32 1.442695, %v3932_v35 }
0x1853   :  { %v3262_v22 = vpop.permute.xlu1 %3261  ;;  %v3436_v26 = vsel %vm546_vm1, %v5976_v23, 0.0 }
0x1854   :  { %5981 = vpow2.f32 %v3933_v25  ;;  %3437 = vadd.xlane.f32.xlu1 %v3436_v26  ;;  %5604 = vmatpush3.msra.mxu1 %v3262_v22 }
0x1855   :  { %5613 = vmatprep.subr.mxu1 %v6186_v5 }
0x1856   :  { %v5978_v14 = vpop.eup %5977 }
0x1857   :  { %v3600_v29 = vsel %vm546_vm1, %v5978_v14, 0.0 }
0x1858   :  { %3601 = vadd.xlane.f32.xlu0 %v3600_v29 }
0x185a   :  { %v5980_v30 = vpop.eup %5979 }
0x185b   :  { %v3768_v31 = vsel %vm546_vm1, %v5980_v30, 0.0 }
0x185c   :  { %3769 = vadd.xlane.f32.xlu1 %v3768_v31 }
0x185e   :  { %v5982_v33 = vpop.eup %5981 }
0x185f   :  { %v3935_v34 = vsel %vm546_vm1, %v5982_v33, 0.0 }
0x1860   :  { %3936 = vadd.xlane.f32.xlu0 %v3935_v34  ;;  %v5873_v34 = vld [vmem:[#allocation2 + $0x40] sm:$0xff]  }
0x186d   :  { %3773 = vrot.lane.b32.xlu1 %v6965_v38, %s6189_s11  ;;  %s6194_s11 = smov [#allocation12]  }
0x186e   :  { %s4866_s3 = sshll.u32 %s6194_s11, 4  ;;  %s4867_s3 = int_to_ptr.vmem [resolvable:$true] %s4866_s3 }
0x186f   :  { %p6130_p13 = scmp.lt.s32.totalorder %s4867_s3, %s4867_s3 }
0x1871   :  { %3940 = vrot.lane.b32.xlu1 %v6965_v38, %s7330_s6 }
0x1876   :  { %3606 = vrot.lane.b32.xlu0 %v6965_v38, %s6188_s0 }
0x18dd   :  { %v3258_v36 = vpop.xlane.xlu0 %3257 }
0x18de   :  { %5983 = vrcp.f32 %v3258_v36  ;;  %v5874_v36 = vld [vmem:[#allocation2 + $0x48] sm:$0xff]  }
0x18e1   :  { %v3438_v28 = vpop.xlane.xlu1 %3437 }
0x18e2   :  { %5985 = vrcp.f32 %v3438_v28  ;;  %v5875_v28 = vld [vmem:[#allocation2 + $0x50] sm:$0xff]  }
0x18e5   :  { %v3602_v37 = vpop.xlane.xlu0 %3601 }
0x18e6   :  { %5987 = vrcp.f32 %v3602_v37  ;;  %v5878_v37 = vld [vmem:[#allocation2 + $0x68] sm:$0xff]  }
0x18e8   :  { %v5984_v27 = vpop.eup %5983 }
0x18e9   :  { %v3260_v40 = vmul.f32 %v5984_v27, %v5974_v19  ;;  %v3770_v41 = vpop.xlane.xlu1 %3769  ;;  %v5879_v27 = vld [vmem:[#allocation2 + $0x70] sm:$0xff]  }
0x18ea   :  { %5989 = vrcp.f32 %v3770_v41 }
0x18eb   :  { %5606 = vmatmul.mubr.msk.f32.vlgmr.msra.gmra.mrb[22].mxu1 %vm546_vm1, %v3260_v40  ;;  %v5880_v40 = vld [vmem:[#allocation2 + $0x78] sm:$0xff]  }
0x18ec   :  { %v5986_v42 = vpop.eup %5985  ;;  %5614 = vmatpush3.msra.mxu1 %v6965_v38  ;;  %5615 = vmatprep.mubr.msk.f32.mxu1 %vm6187_vm0, %v6186_v5 }
0x18ed   :  { %v3440_v44 = vmul.f32 %v5986_v42, %v5976_v23  ;;  %v3937_v45 = vpop.xlane.xlu0 %3936  ;;  %5623 = vmatprep.subr.mxu1 %v6186_v5  ;;  %v3774_v17 = vpop.permute.xlu1 %3773 }
0x18ee   :  { %5991 = vrcp.f32 %v3937_v45 }
0x18ef   :  { %5616 = vmatmul.mubr.msk.f32.vlgmr.msra.gmra.mrb[36].mxu1 %vm546_vm1, %v3440_v44 }
0x18f0   :  { %v5988_v54 = vpop.eup %5987  ;;  %5625 = vmatprep.mubr.msk.f32.mxu1 %vm6187_vm0, %v6186_v5 }
0x18f1   :  { %v3604_v46 = vmul.f32 %v5988_v54, %v5978_v14  ;;  %v3607_v49 = vpop.permute.xlu0 %3606  ;;  %v3941_v51 = vpop.permute.xlu1 %3940 }
0x18f2   :  { %5624 = vmatpush3.msra.mxu1 %v3607_v49 }
0x18f3   :  { %5626 = vmatmul.mubr.msk.f32.vlgmr.msra.gmra.mrb[38].mxu1 %vm546_vm1, %v3604_v46  ;;  %5633 = vmatprep.subr.mxu1 %v6186_v5 }
0x18f4   :  { %v5990_v38 = vpop.eup %5989  ;;  %5634 = vmatpush3.msra.mxu1 %v3774_v17  ;;  %5635 = vmatprep.mubr.msk.f32.mxu1 %vm6187_vm0, %v6186_v5 }
0x18f5   :  { %v3772_v50 = vmul.f32 %v5990_v38, %v5980_v30  ;;  %5643 = vmatprep.subr.mxu1 %v6186_v5 }
0x18f7   :  { %5636 = vmatmul.mubr.msk.f32.vlgmr.msra.gmra.mrb[40].mxu1 %vm546_vm1, %v3772_v50 }
0x18f8   :  { %v5992_v52 = vpop.eup %5991  ;;  %5644 = vmatpush3.msra.mxu1 %v3941_v51  ;;  %5645 = vmatprep.mubr.msk.f32.mxu1 %vm6187_vm0, %v6186_v5 }
0x18f9   :  { %v3939_v24 = vmul.f32 %v5992_v52, %v5982_v33  ;;  %5656 = vmatprep.subr.bf16.mxu1 %v6186_v5 }
0x18fb   :  { %5646 = vmatmul.mubr.msk.f32.vlgmr.msra.gmra.mrb[42].mxu1 %vm546_vm1, %v3939_v24 }
0x18fc   :  { %5672 = vmatprep.mubr.msk.bf16.mxu1 %vm6187_vm0, %v6186_v5  ;;  %5657 = vmatpush3.bf16.msra.mxu1 %v5873_v34 }
0x18fd   :  { %5658 = vmatprep.subr.bf16.mxu1 %v6186_v5 }
0x1900   :  { %5659 = vmatpush3.bf16.msra.mxu1 %v5874_v36 }
0x1901   :  { %5660 = vmatprep.subr.bf16.mxu1 %v6186_v5 }
0x1904   :  { %5661 = vmatpush3.bf16.msra.mxu1 %v5875_v28 }
0x1905   :  { %5662 = vmatprep.subr.bf16.mxu1 %v6186_v5 }
0x19be   :  { %v3333_v53 = vpop.f32.mrb[22].mxu1 }
0x19bf   :  { %v5607_v55 = vpop.f32.mrb[23].mxu1 }
0x19c2   :  { %v3510_v58 = vpop.f32.mrb[36].mxu1 }
0x19c3   :  { %v5617_v43 = vpop.f32.mrb[37].mxu1 }
0x19c6   :  { %v3678_v60 = vpop.f32.mrb[38].mxu1 }
0x19c7   :  { %v5790_v61 = vpack.i.bf16 %v3678_v60, %v7009_v47  ;;  %v5627_v32 = vpop.f32.mrb[39].mxu1  ;;  %v5079_v60 = vld [vmem:[%s7329_s8 + $0x1] ss:$0 sm:$0xff] }
0x19c9   :  { %5791 = vrot.lane.b32.xlu1 %v5790_v61, %s7331_s20 }
0x19ca   :  { %v3845_v63 = vpop.f32.mrb[40].mxu1 }
0x19cb   :  { %v5795_v62 = vpack.i.bf16 %v3845_v63, %v7063_v39  ;;  %v5637_v0 = vpop.f32.mrb[41].mxu1 }
0x19cc   :  { %v5080_v0 = vld [vmem:[%s7270_s13 + $0x1] ss:$0 sm:$0xff] }
0x19cd   :  { %5796 = vrot.lane.b32.xlu0 %v5795_v62, %s7332_s9 }
0x19ce   :  { %v4012_v1 = vpop.f32.mrb[42].mxu1 }
0x19cf   :  { %v5800_v2 = vpack.i.bf16 %v4012_v1, %v3333_v53  ;;  %v5647_v6 = vpop.f32.mrb[43].mxu1 }
0x19d1   :  { %5801 = vrot.lane.b32.xlu1 %v5800_v2, %s7333_s1  ;;  %s6125_s1 = scalar_lea.vmem %s4867_s3, 32 }
0x19d2   :  { %p6126_p12 = scmp.ne.s32.totalorder %s4867_s3, %s6125_s1  ;;  %p6131_p0 = scmp.lt.s32.totalorder %s6125_s1, %s6125_s1 }
0x19d4   :  { %p6132_p1 = por %p6131_p0, %p6130_p13 }
0x19d6   :  { %p6133_p2 = pnand %p6132_p1, %p6126_p12 }
0x1a3b   :  { %v5792_v7 = vpop.permute.xlu1 %5791 }
0x1a3c   :  { %v5794_v47 = vunpack.i.h.bf16 %v5792_v7  ;;  %v5793_v10 = vunpack.i.l.bf16 %v5792_v7 }
0x1a3e   :  { %v4028_v15 = vsel %vm546_vm1, %v3510_v58, %v5794_v47  ;;  %v3349_v39 = vsel %vm546_vm1, %v6989_v56, %v5793_v10  ;;  %v5073_v56 = vld [vmem:[%s7328_s12 + $0x1] ss:$0 sm:$0xff]  ;;  %v5882_v47 = vld [vmem:[#allocation5 + $0x48] sm:$0xff]   ;;  %v5883_v10 = vld [vmem:[#allocation5 + $0x50] sm:$0xff]  }
0x1a3f   :  { %v5797_v8 = vpop.permute.xlu0 %5796 }
0x1a40   :  { %v5799_v12 = vunpack.i.h.bf16 %v5797_v8  ;;  %v5798_v13 = vunpack.i.l.bf16 %v5797_v8  ;;  %v5881_v8 = vld [vmem:[#allocation5 + $0x40] sm:$0xff]  }
0x1a42   :  { %v3350_v11 = vsel %vm1230_vm2, %v3349_v39, %v5798_v13  ;;  %v4029_v19 = vsel %vm1230_vm2, %v4028_v15, %v5799_v12  ;;  %v5884_v12 = vld [vmem:[#allocation5 + $0x58] sm:$0xff]   ;;  %v5885_v13 = vld [vmem:[#allocation5 + $0x60] sm:$0xff]   ;;  %v5887_v15 = vld [vmem:[#allocation5 + $0x70] sm:$0xff]  }
0x1a43   :  { %v5802_v48 = vpop.permute.xlu1 %5801  ;;  %v5888_v39 = vld [vmem:[#allocation5 + $0x78] sm:$0xff]  }
0x1a44   :  { %v5804_v16 = vunpack.i.h.bf16 %v5802_v48  ;;  %v5803_v18 = vunpack.i.l.bf16 %v5802_v48  ;;  %v5886_v48 = vld [vmem:[#allocation5 + $0x68] sm:$0xff]  }
0x1a46   :  { %v3351_v4 = vsel %vm1232_vm3, %v3350_v11, %v5803_v18  ;;  %v4030_v20 = vsel %vm1232_vm3, %v4029_v19, %v5804_v16  ;;  %v5082_v16 = vld [vmem:[%s7272_s15 + $0x1] ss:$0 sm:$0xff] }
0x1a47   :  { %v4031_v21 = vpack.c.bf16 %v4030_v20, %v3351_v4 }
0x1a49   :  { %5653 = vmatmul.mubr.msk.bf16.vlgmr.msra.gmra.mrb[56].mxu0 %vm1945_vm4, %v4031_v21 }
0x1a4a   :  { %5692 = vmatprep.mubr.msk.bf16.mxu0 %vm6187_vm0, %v6186_v5  ;;  %5677 = vmatpush3.bf16.msra.mxu0 %v5881_v8 }
0x1a4b   :  { %5678 = vmatprep.subr.bf16.mxu0 %v6186_v5 }
0x1a4e   :  { %5679 = vmatpush3.bf16.msra.mxu0 %v5882_v47 }
0x1a4f   :  { %5680 = vmatprep.subr.bf16.mxu0 %v6186_v5 }
0x1a52   :  { %5681 = vmatpush3.bf16.msra.mxu0 %v5883_v10 }
0x1a53   :  { %5682 = vmatprep.subr.bf16.mxu0 %v6186_v5 }
0x1a56   :  { %5683 = vmatpush3.bf16.msra.mxu0 %v5884_v12 }
0x1a57   :  { %5684 = vmatprep.subr.bf16.mxu0 %v6186_v5 }
0x1a5a   :  { %5685 = vmatpush3.bf16.msra.mxu0 %v5885_v13 }
0x1a5b   :  { %5686 = vmatprep.subr.bf16.mxu0 %v6186_v5 }
0x1a5e   :  { %5687 = vmatpush3.bf16.msra.mxu0 %v5886_v48 }
0x1a5f   :  { %5688 = vmatprep.subr.bf16.mxu0 %v6186_v5 }
0x1a62   :  { %5689 = vmatpush3.bf16.msra.mxu0 %v5887_v15 }
0x1a63   :  { %5690 = vmatprep.subr.bf16.mxu0 %v6186_v5 }
0x1a66   :  { %5691 = vmatpush3.bf16.msra.mxu0 %v5888_v39 }
0x1a67   :  { %5716 = vmatprep.subr.bf16.mxu0 %v6186_v5 }
0x1b1c   :  { %v4094_v35 = vpop.f32.mrb[56].mxu0 }
0x1b1d   :  { %v4095_v23 = vadd.f32 %v5073_v56, %v4094_v35  ;;  %v5654_v25 = vpop.f32.mrb[57].mxu0 }
0x1b1e   :  { %v4097_v22 = vpop.f32.mrb[58].mxu0 }
0x1b1f   :  { %v4101_v26 = vadd.f32 %v4095_v23, %v6895_v3  ;;  %v4098_v14 = vadd.f32 %v5073_v56, %v4097_v22  ;;  %v5655_v29 = vpop.f32.mrb[59].mxu0  ;;  %v5876_v3 = vld [vmem:[#allocation2 + $0x58] sm:$0xff]  }
0x1b20   :  { %5663 = vmatpush3.bf16.msra.mxu1 %v5876_v3 }
0x1b21   :  { %v4102_v30 = vadd.f32 %v4098_v14, %v6897_v9  ;;  %4107 = vadd.xlane.f32.xlu0 %v4101_v26  ;;  %v4111_v31 = vmul.f32 %v4101_v26, %v4101_v26  ;;  %v5877_v9 = vld [vmem:[#allocation2 + $0x60] sm:$0xff]   ;;  %5664 = vmatprep.subr.bf16.mxu1 %v6186_v5 }
0x1b23   :  { %4109 = vadd.xlane.f32.xlu1 %v4102_v30  ;;  %v4112_v33 = vmul.f32 %v4102_v30, %v4102_v30 }
0x1b24   :  { %5665 = vmatpush3.bf16.msra.mxu1 %v5877_v9 }
0x1b25   :  { %4113 = vadd.xlane.f32.xlu0 %v4111_v31  ;;  %5666 = vmatprep.subr.bf16.mxu1 %v6186_v5 }
0x1b28   :  { %5667 = vmatpush3.bf16.msra.mxu1 %v5878_v37 }
0x1b29   :  { %4115 = vadd.xlane.f32.xlu0 %v4112_v33  ;;  %5668 = vmatprep.subr.bf16.mxu1 %v6186_v5 }
0x1b2c   :  { %5669 = vmatpush3.bf16.msra.mxu1 %v5879_v27 }
0x1b2d   :  { %5670 = vmatprep.subr.bf16.mxu1 %v6186_v5 }
0x1b30   :  { %5671 = vmatpush3.bf16.msra.mxu1 %v5880_v40 }
0x1b31   :  { %5696 = vmatprep.subr.bf16.mxu1 %v6186_v5 }
0x1bae   :  { %v4108_v41 = vpop.xlane.xlu0 %4107 }
0x1baf   :  { %v4117_v42 = vmul.f32 0.03125, %v4108_v41  ;;  %v5092_v41 = vld [vmem:[%s7274_s17 + $0x1] ss:$0 sm:$0xff] }
0x1bb0   :  { %v4110_v44 = vpop.xlane.xlu1 %4109 }
0x1bb1   :  { %v4121_v54 = vmul.f32 %v4117_v42, %v4117_v42  ;;  %v4118_v46 = vmul.f32 0.03125, %v4110_v44  ;;  %v4127_v58 = vsub.f32 %v4101_v26, %v4117_v42 }
0x1bb2   :  { %v4114_v45 = vpop.xlane.xlu0 %4113 }
0x1bb3   :  { %v4119_v17 = vmul.f32 0.03125, %v4114_v45  ;;  %v4122_v50 = vmul.f32 %v4118_v46, %v4118_v46  ;;  %v4128_v61 = vsub.f32 %v4102_v30, %v4118_v46 }
0x1bb5   :  { %v4123_v49 = vsub.f32 %v4119_v17, %v4121_v54 }
0x1bb6   :  { %v4116_v38 = vpop.xlane.xlu0 %4115 }
0x1bb7   :  { %v4125_v51 = vmax.f32 %v4123_v49, 0.0  ;;  %v4120_v52 = vmul.f32 0.03125, %v4116_v38 }
0x1bb9   :  { %v4129_v24 = vadd.f32 1e-12, %v4125_v51  ;;  %v4124_v53 = vsub.f32 %v4120_v52, %v4122_v50  ;;  %v5889_v52 = vld [vmem:[#allocation7] sm:$0xff]  }
0x1bbb   :  { %5993 = vrsqrt.f32 %v4129_v24  ;;  %v4126_v55 = vmax.f32 %v4124_v53, 0.0  ;;  %v5890_v24 = vld [vmem:[#allocation7 + $0x8] sm:$0xff]   ;;  %v5891_v53 = vld [vmem:[#allocation7 + $0x10] sm:$0xff]  }
0x1bbd   :  { %v4130_v57 = vadd.f32 1e-12, %v4126_v55  ;;  %v5892_v55 = vld [vmem:[#allocation7 + $0x18] sm:$0xff]  }
0x1bbf   :  { %5995 = vrsqrt.f32 %v4130_v57  ;;  %v5893_v57 = vld [vmem:[#allocation7 + $0x20] sm:$0xff]  }
0x1bc5   :  { %v5994_v43 = vpop.eup %5993 }
0x1bc6   :  { %v4133_v59 = vmul.f32 %v5994_v43, %v4127_v58  ;;  %v5894_v58 = vld [vmem:[#allocation7 + $0x28] sm:$0xff]   ;;  %v5895_v43 = vld [vmem:[#allocation7 + $0x30] sm:$0xff]  }
0x1bc8   :  { %v4141_v62 = vmul.f32 %v5079_v60, %v4133_v59  ;;  %v5896_v59 = vld [vmem:[#allocation7 + $0x38] sm:$0xff]  }
0x1bc9   :  { %v5996_v32 = vpop.eup %5995 }
0x1bca   :  { %v4134_v63 = vmul.f32 %v5996_v32, %v4128_v61  ;;  %v7150_v2 = vadd.f32 %v5080_v0, %v4141_v62 }
0x1bcc   :  { %v4142_v1 = vmul.f32 %v5079_v60, %v4134_v63 }
0x1bce   :  { %v7152_v6 = vadd.f32 %v5080_v0, %v4142_v1 }
0x1bd0   :  { %v4151_v7 = vpack.c.bf16 %v7152_v6, %v7150_v2 }
0x1bd2   :  { %5673 = vmatmul.mubr.bf16.vlgmr.msra.gmra.mrb[44].mxu1 %v4151_v7 }
0x1bd3   :  { %5712 = vmatprep.mubr.msk.bf16.mxu1 %vm6187_vm0, %v6186_v5  ;;  %5697 = vmatpush3.bf16.msra.mxu1 %v5889_v52 }
0x1bd4   :  { %5698 = vmatprep.subr.bf16.mxu1 %v6186_v5 }
0x1bd7   :  { %5699 = vmatpush3.bf16.msra.mxu1 %v5890_v24 }
0x1bd8   :  { %5700 = vmatprep.subr.bf16.mxu1 %v6186_v5 }
0x1bdb   :  { %5701 = vmatpush3.bf16.msra.mxu1 %v5891_v53 }
0x1bdc   :  { %5702 = vmatprep.subr.bf16.mxu1 %v6186_v5 }
0x1bdf   :  { %5703 = vmatpush3.bf16.msra.mxu1 %v5892_v55 }
0x1be0   :  { %5704 = vmatprep.subr.bf16.mxu1 %v6186_v5 }
0x1be3   :  { %5705 = vmatpush3.bf16.msra.mxu1 %v5893_v57 }
0x1be4   :  { %5706 = vmatprep.subr.bf16.mxu1 %v6186_v5 }
0x1be7   :  { %5707 = vmatpush3.bf16.msra.mxu1 %v5894_v58 }
0x1be8   :  { %5708 = vmatprep.subr.bf16.mxu1 %v6186_v5 }
0x1beb   :  { %5709 = vmatpush3.bf16.msra.mxu1 %v5895_v43 }
0x1bec   :  { %5710 = vmatprep.subr.bf16.mxu1 %v6186_v5 }
0x1bef   :  { %5711 = vmatpush3.bf16.msra.mxu1 %v5896_v59  ;;  %v5124_v59 = vld [vmem:[%s7283_s26] ss:$0 sm:$0xff] }
0x1bf0   :  { %5736 = vmatprep.subr.bf16.mxu1 %v6186_v5 }
0x1ca5   :  { %v4259_v18 = vpop.f32.mrb[44].mxu1 }
0x1ca6   :  { %v4260_v11 = vadd.f32 %v5082_v16, %v4259_v18  ;;  %v5674_v19 = vpop.f32.mrb[45].mxu1 }
0x1ca7   :  { %v4262_v4 = vpop.f32.mrb[46].mxu1 }
0x1ca8   :  { %v4268_v20 = vmul.f32 0.044715, %v4260_v11  ;;  %v4263_v21 = vadd.f32 %v5082_v16, %v4262_v4  ;;  %v5675_v56 = vpop.f32.mrb[47].mxu1  ;;  %v4266_v28 = vmul.f32 0.5, %v4260_v11  ;;  %v5103_v16 = vld [vmem:[%s7275_s18 + $0x1] ss:$0 sm:$0xff] }
0x1caa   :  { %v4270_v35 = vmul.f32 %v4268_v20, %v4260_v11  ;;  %v4269_v23 = vmul.f32 0.044715, %v4263_v21  ;;  %v4267_v3 = vmul.f32 0.5, %v4263_v21 }
0x1cac   :  { %v4272_v25 = vmul.f32 %v4270_v35, %v4260_v11  ;;  %v4271_v22 = vmul.f32 %v4269_v23, %v4263_v21 }
0x1cae   :  { %v4274_v26 = vadd.f32 %v4272_v25, %v4260_v11  ;;  %v4273_v14 = vmul.f32 %v4271_v22, %v4263_v21  ;;  %v5897_v25 = vld [vmem:[#allocation10] sm:$0xff]  }
0x1cb0   :  { %v4276_v29 = vmul.f32 0.7978846, %v4274_v26  ;;  %v4275_v30 = vadd.f32 %v4273_v14, %v4263_v21  ;;  %v5104_v21 = vld [vmem:[%s7276_s19 + $0x1] ss:$0 sm:$0xff]  ;;  %v5898_v26 = vld [vmem:[#allocation10 + $0x8] sm:$0xff]   ;;  %v5899_v14 = vld [vmem:[#allocation10 + $0x10] sm:$0xff]  }
0x1cb2   :  { %5997 = vtanh.f32 %v4276_v29  ;;  %v4277_v31 = vmul.f32 0.7978846, %v4275_v30  ;;  %v5900_v29 = vld [vmem:[#allocation10 + $0x18] sm:$0xff]   ;;  %v5901_v30 = vld [vmem:[#allocation10 + $0x20] sm:$0xff]  }
0x1cb4   :  { %5999 = vtanh.f32 %v4277_v31  ;;  %v5902_v31 = vld [vmem:[#allocation10 + $0x28] sm:$0xff]  }
0x1cbc   :  { %v5998_v33 = vpop.eup %5997 }
0x1cbd   :  { %v4280_v34 = vadd.f32 1.0, %v5998_v33  ;;  %v5903_v33 = vld [vmem:[#allocation10 + $0x30] sm:$0xff]  }
0x1cbe   :  { %v6000_v36 = vpop.eup %5999 }
0x1cbf   :  { %v4281_v9 = vadd.f32 1.0, %v6000_v36  ;;  %v4282_v37 = vmul.f32 %v4280_v34, %v4266_v28  ;;  %v5904_v34 = vld [vmem:[#allocation10 + $0x38] sm:$0xff]   ;;  %v5105_v36 = vld [vmem:[%s7278_s21] ss:$0 sm:$0xff] }
0x1cc1   :  { %v4283_v27 = vmul.f32 %v4281_v9, %v4267_v3 }
0x1cc3   :  { %v4284_v40 = vpack.c.bf16 %v4283_v27, %v4282_v37 }
0x1cc5   :  { %5693 = vmatmul.mubr.bf16.vlgmr.msra.gmra.mrb[60].mxu0 %v4284_v40 }
0x1cc6   :  { %5732 = vmatprep.mubr.msk.bf16.mxu0 %vm6187_vm0, %v6186_v5 }
0x1d98   :  { %v4392_v42 = vpop.f32.mrb[60].mxu0 }
0x1d99   :  { %v4393_v44 = vadd.f32 %v5092_v41, %v4392_v42  ;;  %v5694_v45 = vpop.f32.mrb[61].mxu0 }
0x1d9a   :  { %v4395_v54 = vpop.f32.mrb[62].mxu0 }
0x1d9b   :  { %v4399_v46 = vadd.f32 %v4393_v44, %v7150_v2  ;;  %v4396_v17 = vadd.f32 %v5092_v41, %v4395_v54  ;;  %v5695_v49 = vpop.f32.mrb[63].mxu0 }
0x1d9d   :  { %v4400_v38 = vadd.f32 %v4396_v17, %v7152_v6  ;;  %4405 = vadd.xlane.f32.xlu0 %v4399_v46  ;;  %v4409_v50 = vmul.f32 %v4399_v46, %v4399_v46 }
0x1d9f   :  { %4407 = vadd.xlane.f32.xlu1 %v4400_v38  ;;  %v4410_v51 = vmul.f32 %v4400_v38, %v4400_v38 }
0x1da1   :  { %4411 = vadd.xlane.f32.xlu0 %v4409_v50 }
0x1da3   :  { %4413 = vadd.xlane.f32.xlu1 %v4410_v51 }
0x1e2a   :  { %v4406_v60 = vpop.xlane.xlu0 %4405 }
0x1e2b   :  { %v4415_v61 = vmul.f32 0.03125, %v4406_v60 }
0x1e2c   :  { %v4408_v32 = vpop.xlane.xlu1 %4407 }
0x1e2d   :  { %v4416_v63 = vmul.f32 0.03125, %v4408_v32  ;;  %v4419_v0 = vmul.f32 %v4415_v61, %v4415_v61  ;;  %v4425_v15 = vsub.f32 %v4399_v46, %v4415_v61 }
0x1e2e   :  { %v4412_v62 = vpop.xlane.xlu0 %4411 }
0x1e2f   :  { %v4417_v1 = vmul.f32 0.03125, %v4412_v62  ;;  %v4420_v6 = vmul.f32 %v4416_v63, %v4416_v63  ;;  %v4426_v18 = vsub.f32 %v4400_v38, %v4416_v63 }
0x1e30   :  { %v4414_v2 = vpop.xlane.xlu1 %4413 }
0x1e31   :  { %v4421_v7 = vsub.f32 %v4417_v1, %v4419_v0  ;;  %v4418_v8 = vmul.f32 0.03125, %v4414_v2 }
0x1e33   :  { %v4423_v47 = vmax.f32 %v4421_v7, 0.0  ;;  %v4422_v10 = vsub.f32 %v4418_v8, %v4420_v6  ;;  %v5905_v6 = vld [vmem:[#allocation8] sm:$0xff]   ;;  %v5906_v7 = vld [vmem:[#allocation8 + $0x8] sm:$0xff]   ;;  %v5907_v8 = vld [vmem:[#allocation8 + $0x10] sm:$0xff]  }
0x1e34   :  { %5717 = vmatpush3.bf16.msra.mxu0 %v5905_v6 }
0x1e35   :  { %v4427_v12 = vadd.f32 1e-12, %v4423_v47  ;;  %v4424_v13 = vmax.f32 %v4422_v10, 0.0  ;;  %5718 = vmatprep.subr.bf16.mxu0 %v6186_v5  ;;  %v5908_v47 = vld [vmem:[#allocation8 + $0x18] sm:$0xff]   ;;  %v5909_v10 = vld [vmem:[#allocation8 + $0x20] sm:$0xff]  }
0x1e37   :  { %6001 = vrsqrt.f32 %v4427_v12  ;;  %v4428_v48 = vadd.f32 1e-12, %v4424_v13  ;;  %v5910_v12 = vld [vmem:[#allocation8 + $0x28] sm:$0xff]   ;;  %v5911_v13 = vld [vmem:[#allocation8 + $0x30] sm:$0xff]  }
0x1e38   :  { %5719 = vmatpush3.bf16.msra.mxu0 %v5906_v7 }
0x1e39   :  { %6003 = vrsqrt.f32 %v4428_v48  ;;  %5720 = vmatprep.subr.bf16.mxu0 %v6186_v5  ;;  %v5912_v48 = vld [vmem:[#allocation8 + $0x38] sm:$0xff]  }
0x1e3c   :  { %5721 = vmatpush3.bf16.msra.mxu0 %v5907_v8 }
0x1e3d   :  { %5722 = vmatprep.subr.bf16.mxu0 %v6186_v5 }
0x1e40   :  { %5723 = vmatpush3.bf16.msra.mxu0 %v5908_v47 }
0x1e41   :  { %v6002_v39 = vpop.eup %6001  ;;  %5724 = vmatprep.subr.bf16.mxu0 %v6186_v5 }
0x1e42   :  { %v4431_v11 = vmul.f32 %v6002_v39, %v4425_v15 }
0x1e43   :  { %v6004_v19 = vpop.eup %6003 }
0x1e44   :  { %v4432_v4 = vmul.f32 %v6004_v19, %v4426_v18  ;;  %v4439_v20 = vmul.f32 %v5103_v16, %v4431_v11  ;;  %5725 = vmatpush3.bf16.msra.mxu0 %v5909_v10 }
0x1e45   :  { %5726 = vmatprep.subr.bf16.mxu0 %v6186_v5 }
0x1e46   :  { %v4440_v56 = vmul.f32 %v5103_v16, %v4432_v4  ;;  %v4447_v35 = vadd.f32 %v5104_v21, %v4439_v20 }
0x1e48   :  { %v4448_v23 = vadd.f32 %v5104_v21, %v4440_v56  ;;  %5727 = vmatpush3.bf16.msra.mxu0 %v5910_v12 }
0x1e49   :  { %5728 = vmatprep.subr.bf16.mxu0 %v6186_v5 }
0x1e4a   :  { %v4449_v22 = vpack.c.bf16 %v4448_v23, %v4447_v35 }
0x1e4c   :  { %5713 = vmatmul.mubr.bf16.vlgmr.msra.gmra.mrb[48].mxu1 %v4449_v22  ;;  %5729 = vmatpush3.bf16.msra.mxu0 %v5911_v13 }
0x1e4d   :  { %5737 = vmatpush3.bf16.msra.mxu1 %v5897_v25  ;;  %5752 = vmatprep.mubr.msk.bf16.mxu1 %vm6187_vm0, %v6186_v5 }
0x1e4e   :  { %5738 = vmatprep.subr.bf16.mxu1 %v6186_v5  ;;  %5730 = vmatprep.subr.bf16.mxu0 %v6186_v5 }
0x1e50   :  { %5731 = vmatpush3.bf16.msra.mxu0 %v5912_v48 }
0x1e51   :  { %5739 = vmatpush3.bf16.msra.mxu1 %v5898_v26 }
0x1e52   :  { %5740 = vmatprep.subr.bf16.mxu1 %v6186_v5 }
0x1e55   :  { %5741 = vmatpush3.bf16.msra.mxu1 %v5899_v14 }
0x1e56   :  { %5742 = vmatprep.subr.bf16.mxu1 %v6186_v5 }
0x1e59   :  { %5743 = vmatpush3.bf16.msra.mxu1 %v5900_v29 }
0x1e5a   :  { %5744 = vmatprep.subr.bf16.mxu1 %v6186_v5 }
0x1e5d   :  { %5745 = vmatpush3.bf16.msra.mxu1 %v5901_v30  ;;  %v5114_v30 = vld [vmem:[%s7279_s22] ss:$0 sm:$0xff] }
0x1e5e   :  { %5746 = vmatprep.subr.bf16.mxu1 %v6186_v5 }
0x1e61   :  { %5747 = vmatpush3.bf16.msra.mxu1 %v5902_v31 }
0x1e62   :  { %5748 = vmatprep.subr.bf16.mxu1 %v6186_v5 }
0x1e65   :  { %5749 = vmatpush3.bf16.msra.mxu1 %v5903_v33 }
0x1e66   :  { %5750 = vmatprep.subr.bf16.mxu1 %v6186_v5 }
0x1e69   :  { %5751 = vmatpush3.bf16.msra.mxu1 %v5904_v34 }
0x1e6c   :  { %5753 = vmatmul.mubr.bf16.vlgmr.msra.gmra.mrb[52].mxu1 %v4449_v22 }
0x1f1f   :  { %v4555_v28 = vpop.f32.mrb[48].mxu1 }
0x1f20   :  { %v4556_v3 = vadd.f32 %v5105_v36, %v4555_v28  ;;  %v5714_v9 = vpop.f32.mrb[49].mxu1 }
0x1f21   :  { %v4558_v37 = vpop.f32.mrb[50].mxu1 }
0x1f22   :  { %v4564_v27 = vmul.f32 0.044715, %v4556_v3  ;;  %v4559_v40 = vadd.f32 %v5105_v36, %v4558_v37  ;;  %v5715_v41 = vpop.f32.mrb[51].mxu1  ;;  %v4562_v52 = vmul.f32 0.5, %v4556_v3 }
0x1f24   :  { %v4566_v42 = vmul.f32 %v4564_v27, %v4556_v3  ;;  %v4565_v44 = vmul.f32 0.044715, %v4559_v40  ;;  %v4563_v57 = vmul.f32 0.5, %v4559_v40 }
0x1f26   :  { %v4567_v45 = vmul.f32 %v4565_v44, %v4559_v40  ;;  %v4568_v54 = vmul.f32 %v4566_v42, %v4556_v3 }
0x1f28   :  { %v4570_v46 = vadd.f32 %v4568_v54, %v4556_v3  ;;  %v4569_v17 = vmul.f32 %v4567_v45, %v4559_v40  ;;  %v5115_v3 = vld [vmem:[%s7280_s23] ss:$0 sm:$0xff] }
0x1f2a   :  { %v4572_v49 = vmul.f32 0.7978846, %v4570_v46  ;;  %v4571_v38 = vadd.f32 %v4569_v17, %v4559_v40 }
0x1f2c   :  { %6005 = vtanh.f32 %v4572_v49  ;;  %v4573_v50 = vmul.f32 0.7978846, %v4571_v38 }
0x1f2e   :  { %6007 = vtanh.f32 %v4573_v50 }
0x1f36   :  { %v6006_v51 = vpop.eup %6005 }
0x1f37   :  { %v4576_v24 = vadd.f32 1.0, %v6006_v51 }
0x1f38   :  { %v6008_v53 = vpop.eup %6007 }
0x1f39   :  { %v7202_v55 = vmul.f32 %v4576_v24, %v4562_v52  ;;  %v4577_v58 = vadd.f32 1.0, %v6008_v53 }
0x1f3b   :  { %4582 = vadd.xlane.f32.xlu0 %v7202_v55  ;;  %v7205_v43 = vmul.f32 %v4577_v58, %v4563_v57  ;;  %v4586_v60 = vmul.f32 %v7202_v55, %v7202_v55 }
0x1f3d   :  { %4584 = vadd.xlane.f32.xlu1 %v7205_v43  ;;  %v4587_v32 = vmul.f32 %v7205_v43, %v7205_v43 }
0x1f3f   :  { %v4839_v61 = vpop.f32.mrb[52].mxu1  ;;  %4588 = vadd.xlane.f32.xlu0 %v4586_v60 }
0x1f40   :  { %v4840_v63 = vadd.f32 %v5124_v59, %v4839_v61  ;;  %v5754_v62 = vpop.f32.mrb[53].mxu1 }
0x1f41   :  { %v4842_v0 = vpop.f32.mrb[54].mxu1  ;;  %4590 = vadd.xlane.f32.xlu1 %v4587_v32 }
0x1f42   :  { %4846 = vst [vmem:[#allocation12] sm:$0x1] %v4840_v63  ;;  %v4843_v1 = vadd.f32 %v5124_v59, %v4842_v0  ;;  %v5755_v2 = vpop.f32.mrb[55].mxu1 }
0x1f44   :  { %4848 = vst [vmem:[#allocation12 + $0x1] sm:$0x1] %v4843_v1 }
0x1fc8   :  { %v4583_v15 = vpop.xlane.xlu0 %4582 }
0x1fc9   :  { %v4592_v39 = vmul.f32 0.03125, %v4583_v15 }
0x1fca   :  { %v4585_v16 = vpop.xlane.xlu1 %4584 }
0x1fcb   :  { %v4593_v18 = vmul.f32 0.03125, %v4585_v16  ;;  %v4596_v19 = vmul.f32 %v4592_v39, %v4592_v39  ;;  %v4602_v5 = vsub.f32 %v7202_v55, %v4592_v39 }
0x1fcc   :  { %v4589_v11 = vpop.xlane.xlu0 %4588 }
0x1fcd   :  { %v4594_v4 = vmul.f32 0.03125, %v4589_v11  ;;  %v4597_v21 = vmul.f32 %v4593_v18, %v4593_v18  ;;  %v4603_v31 = vsub.f32 %v7205_v43, %v4593_v18 }
0x1fce   :  { %v4591_v20 = vpop.xlane.xlu1 %4590 }
0x1fcf   :  { %v4598_v56 = vsub.f32 %v4594_v4, %v4596_v19  ;;  %v4595_v35 = vmul.f32 0.03125, %v4591_v20 }
0x1fd1   :  { %v4600_v23 = vmax.f32 %v4598_v56, 0.0  ;;  %v4599_v25 = vsub.f32 %v4595_v35, %v4597_v21 }
0x1fd3   :  { %v4604_v22 = vadd.f32 1e-12, %v4600_v23  ;;  %v4601_v26 = vmax.f32 %v4599_v25, 0.0 }
0x1fd5   :  { %6009 = vrsqrt.f32 %v4604_v22  ;;  %v4605_v14 = vadd.f32 1e-12, %v4601_v26 }
0x1fd7   :  { %6011 = vrsqrt.f32 %v4605_v14 }
0x1fdf   :  { %v6010_v29 = vpop.eup %6009 }
0x1fe0   :  { %v4608_v33 = vmul.f32 %v6010_v29, %v4602_v5 }
0x1fe1   :  { %v6012_v34 = vpop.eup %6011 }
0x1fe2   :  { %v4609_v36 = vmul.f32 %v6012_v34, %v4603_v31  ;;  %v4616_v28 = vmul.f32 %v5114_v30, %v4608_v33 }
0x1fe4   :  { %v4617_v9 = vmul.f32 %v5114_v30, %v4609_v36  ;;  %v4624_v37 = vadd.f32 %v5115_v3, %v4616_v28 }
0x1fe6   :  { %v4625_v27 = vadd.f32 %v5115_v3, %v4617_v9 }
0x1fe8   :  { %v4626_v40 = vpack.c.bf16 %v4625_v27, %v4624_v37 }
0x1fea   :  { %5733 = vmatmul.mubr.bf16.vlgmr.msra.gmra.mrb[64].mxu0 %v4626_v40 }
0x1feb   :  { %6136 = shalt.err (!%p6133_p2)
}
0x1fec   :  { %s6137_s24 = scalar_lea.hbm %s7285_s28, 32 }
0x1fed   :  { %p6138_p3 = scmp.ne.s32.totalorder %s7285_s28, %s6137_s24  ;;  %p6141_p4 = scmp.lt.u32.totalorder %s6137_s24, %s7285_s28 }
0x1fef   :  { %p6143_p5 = pnand %p6141_p4, %p6138_p3 }
0x1ff1   :  { %6146 = shalt.err (!%p6143_p5)
}
0x1ff2   :  { %s6195_s30 = smov 1   ;;  %s6196_s15 = smov [#allocation11]  }
0x1ff3   :  { %4872 = dma.vmem_to_hbm [thread:$0]  %s4867_s3, 32, %s7285_s28, [#allocation13], %s7332_s9, %s7332_s9, %s6195_s30  }
0x1ff4   :  { %s4854_s2 = sshll.u32 %s6196_s15, 4  ;;  %s4855_s2 = int_to_ptr.vmem [resolvable:$true] %s4854_s2 }
0x1ff5   :  { %s6147_s17 = scalar_lea.vmem %s4855_s2, 256  ;;  %p6152_p7 = scmp.lt.s32.totalorder %s4855_s2, %s4855_s2 }
0x1ff6   :  { %p6148_p6 = scmp.ne.s32.totalorder %s4855_s2, %s6147_s17  ;;  %p6153_p8 = scmp.lt.s32.totalorder %s6147_s17, %s6147_s17 }
0x1ff8   :  { %p6154_p9 = por %p6153_p8, %p6152_p7 }
0x1ffa   :  { %p6155_p10 = pnand %p6154_p9, %p6148_p6 }
0x20bd   :  { %v4725_v41 = vpop.f32.mrb[64].mxu0 }
0x20be   :  { %4732 = vst [vmem:[#allocation11] sm:$0xff] %v4725_v41  ;;  %v5734_v42 = vpop.f32.mrb[65].mxu0 }
0x20bf   :  { %v4728_v44 = vpop.f32.mrb[66].mxu0 }
0x20c0   :  { %4733 = vst [vmem:[#allocation11 + $0x8] sm:$0xff] %v4728_v44  ;;  %v5735_v45 = vpop.f32.mrb[67].mxu0 }
0x20c1   :  { %6158 = shalt.err (!%p6155_p10)
}
0x20c2   :  { %s6159_s28 = scalar_lea.hbm %s7284_s27, 256 }
0x20c3   :  { %p6160_p11 = scmp.ne.s32.totalorder %s7284_s27, %s6159_s28  ;;  %p6163_p12 = scmp.lt.u32.totalorder %s6159_s28, %s7284_s27 }
0x20c5   :  { %p6165_p13 = pnand %p6163_p12, %p6160_p11 }
0x20c7   :  { %6168 = shalt.err (!%p6165_p13)
}
0x20c8   :  { %s6197_s21 = smov 128  }
0x20c9   :  { %4860 = dma.vmem_to_hbm [thread:$0]  %s4855_s2, 256, %s7284_s27, [#allocation4], %s6197_s21, %s6197_s21, %s7331_s20  }
0x20ca   :  { %6175 = dma.done.wait [#allocation4], 256  }
0x20cb   :  { %6176 = vsyncadd [#allocation4], 4294967040 }
0x20cc   :  { %6177 = dma.done.wait [#allocation13], 32  }
0x20cd   :  { %6178 = vsyncadd [#allocation13], 4294967264 }
0x20ce   :  { %4879 = vsyncpa [#allocation3], 1 }
0x20cf   :  { %4880 = vsyncpa [#allocation6], 1 }
0x20d0   :  { %4881 = vsyncpa [#allocation9], 1 }
0x20d1   :  { %4882 = vsyncpa [#allocation4], 1 }
0x20d2   :  { %4883 = vsyncpa [#allocation13], 1 }

</bundles_post_ra>
